<compile_context>
chip_gen: v6e
topology: v6e:2x2x1
jax: 0.10.0
libtpu: 0.0.40
codegen_flags: <defaults>
</compile_context>

<pallas_src>
import jax
import jax.numpy as jnp
from jax.experimental import pallas as pl
from jax.experimental.pallas import tpu as pltpu

STATE_SIZE = 3
ACTION_SIZE = 3
HIDDEN = 64

# Number of batch sub-tiles stacked along the sublane axis for the block-diagonal fc2 pack.
# PACK * HIDDEN = 256 matches the v6e/v7x 256x256 MXU face (neutral on v5e's 128x128 tiles).
PACK = 4

# Max lane columns (per sub-tile) per grid step -> PACK * 2048 = 8192 batch elements/step.
# Per-step VMEM footprint is ~10 MiB, inside every generation's budget (incl. v7x's 64 MiB).
MAX_LANE_TILE = 2048
_LANE = 128


def _round_up(n, m):
    return -(-n // m) * m


def _qnet_kernel(x_ref, w1_ref, b1_ref, w2b_ref, b2s_ref, w3t_ref, b3s_ref, out_ref):
    """Fused forward on a feature-major, PACK-way sublane-stacked batch tile.

    x_ref   : (PACK*STATE_SIZE, TB)   rows [3g:3g+3]  = features of batch sub-tile g
    w1_ref  : (HIDDEN, STATE_SIZE)    PyTorch (out, in) fc1 weight
    b1_ref  : (HIDDEN, 1)
    w2b_ref : (PACK*HIDDEN, PACK*HIDDEN) bf16 block-diagonal fc2 weight
    b2s_ref : (PACK*HIDDEN, 1)        fc2 bias tiled across sub-tiles
    w3t_ref : (HIDDEN, ACTION_SIZE)   fc3 weight transposed (in, out)
    b3s_ref : (PACK*ACTION_SIZE, 1)   fc3 bias tiled across sub-tiles
    out_ref : (PACK*ACTION_SIZE, TB)  rows [3g:3g+3]  = Q-values of batch sub-tile g
    """
    x = x_ref[...]
    w1 = w1_ref[...]
    b1 = b1_ref[...]

    # fc1 on the VPU: 3 broadcast FMAs per sub-tile, emitted directly in the sublane-stacked
    # (PACK*HIDDEN, TB) layout that the block-diagonal fc2 consumes.
    h1_groups = []
    for g in range(PACK):
        acc = w1[:, 0:1] * x[g * STATE_SIZE : g * STATE_SIZE + 1, :]
        for k in range(1, STATE_SIZE):
            acc = acc + w1[:, k : k + 1] * x[g * STATE_SIZE + k : g * STATE_SIZE + k + 1, :]
        h1_groups.append(jnp.maximum(acc + b1, 0.0))
    h1 = jnp.concatenate(h1_groups, axis=0)                       # (PACK*HIDDEN, TB) f32

    # fc2 + relu on the MXU: bf16 operands, f32 accumulation.  One column stream computes
    # fc2 for all PACK sub-tiles thanks to the block-diagonal weight.
    h2 = jnp.dot(w2b_ref[...], h1.astype(jnp.bfloat16),
                 preferred_element_type=jnp.float32)
    h2 = jnp.maximum(h2 + b2s_ref[...], 0.0)                      # (PACK*HIDDEN, TB) f32

    # fc3 on the VPU/XLU: lane-broadcast multiply + 64-row sublane reduce per output row.
    # Lane-dense (1, TB) row stores; sublane-masked but full-width on the lane axis.
    w3t = w3t_ref[...]
    b3s = b3s_ref[...]
    for g in range(PACK):
        h2g = h2[g * HIDDEN : (g + 1) * HIDDEN, :]
        for a in range(ACTION_SIZE):
            r = g * ACTION_SIZE + a
            row = jnp.sum(h2g * w3t[:, a : a + 1], axis=0, keepdims=True) + b3s[r : r + 1, :]
            out_ref[r : r + 1, :] = row.astype(out_ref.dtype)


@jax.jit
def qnetwork_forward(x, params):
    """x: (B, STATE_SIZE) float32.  params: w1/b1/w2/b2/w3/b3 with PyTorch (out, in) weights."""
    B = x.shape[0]

    # --- batch tiling ---------------------------------------------------------------------
    # The batch is split into PACK sub-tiles stacked along sublanes; each sub-tile owns
    # `cols` lane columns.  The grid tiles `cols` in chunks of `tb` lanes (multiple of 128),
    # with >=2 steps once there is enough work so v7x can shard across both TensorCores.
    cols = _round_up(max(-(-B // PACK), _LANE), _LANE)
    n_steps = max(-(-cols // MAX_LANE_TILE), 2 if cols >= 2 * _LANE else 1)
    tb = _round_up(-(-cols // n_steps), _LANE)
    cols = n_steps * tb
    b_pad = PACK * cols

    # --- operand prep (single fused transpose+pad; padded columns are sliced off below) ----
    x_pad = jnp.pad(x.T.astype(jnp.float32), ((0, 0), (0, b_pad - B)))      # (S, b_pad)
    x_stk = x_pad.reshape(STATE_SIZE, PACK, cols).transpose(1, 0, 2)
    x_stk = x_stk.reshape(PACK * STATE_SIZE, cols)        # row g*S+f <-> batch g*cols + lane

    w1 = params["w1"]
    b1 = params["b1"].reshape(HIDDEN, 1)
    w2b = jnp.kron(jnp.eye(PACK, dtype=jnp.float32), params["w2"]).astype(jnp.bfloat16)
    b2s = jnp.tile(params["b2"], PACK).reshape(PACK * HIDDEN, 1)
    w3t = params["w3"].T                                   # (HIDDEN, ACTION_SIZE)
    b3s = jnp.tile(params["b3"], PACK).reshape(PACK * ACTION_SIZE, 1)

    resident = lambda shape: pl.BlockSpec(shape, lambda i: (0, 0))   # stays in VMEM all steps

    out_stk = pl.pallas_call(
        _qnet_kernel,
        out_shape=jax.ShapeDtypeStruct((PACK * ACTION_SIZE, cols), jnp.float32),
        grid=(cols // tb,),
        in_specs=[
            pl.BlockSpec((PACK * STATE_SIZE, tb), lambda i: (0, i)),   # x tile (batch on lanes)
            resident((HIDDEN, STATE_SIZE)),                            # w1
            resident((HIDDEN, 1)),                                     # b1
            resident((PACK * HIDDEN, PACK * HIDDEN)),                  # w2 block-diag (bf16)
            resident((PACK * HIDDEN, 1)),                              # b2 tiled
            resident((HIDDEN, ACTION_SIZE)),                           # w3^T
            resident((PACK * ACTION_SIZE, 1)),                         # b3 tiled
        ],
        out_specs=pl.BlockSpec((PACK * ACTION_SIZE, tb), lambda i: (0, i)),
        compiler_params=pltpu.CompilerParams(
            dimension_semantics=("parallel",),        # v7x: shard batch tiles across 2 TCs
            vmem_limit_bytes=32 * 1024 * 1024,        # safe on all gens (v5e default is 16 MiB)
        ),
    )(x_stk, w1, b1, w2b, b2s, w3t, b3s)

    # Undo the sub-tile stacking: row g*ACTION+a, lane c  ->  batch g*cols + c, action a.
    out = out_stk.reshape(PACK, ACTION_SIZE, cols).transpose(0, 2, 1)
    return out.reshape(b_pad, ACTION_SIZE)[:B]
    # TODO(synk): if the caller can supply/accept feature-major activations, drop the
    # wrapper transpose/stack passes entirely (they dominate small-batch latency).


def init_params(key):
    """PyTorch nn.Linear-style init: U(-1/sqrt(fan_in), 1/sqrt(fan_in)), weights (out, in)."""
    def linear(key, fan_in, fan_out):
        kw, kb = jax.random.split(key)
        bound = 1.0 / jnp.sqrt(fan_in)
        w = jax.random.uniform(kw, (fan_out, fan_in), jnp.float32, -bound, bound)
        b = jax.random.uniform(kb, (fan_out,), jnp.float32, -bound, bound)
        return w, b

    k1, k2, k3 = jax.random.split(key, 3)
    w1, b1 = linear(k1, STATE_SIZE, HIDDEN)
    w2, b2 = linear(k2, HIDDEN, HIDDEN)
    w3, b3 = linear(k3, HIDDEN, ACTION_SIZE)
    return {"w1": w1, "b1": b1, "w2": w2, "b2": b2, "w3": w3, "b3": b3}


def reference_forward(x, params):
    """Pure-JAX (f32) reference of the PyTorch forward pass (weights stored (out, in))."""
    h = jnp.maximum(x @ params["w1"].T + params["b1"], 0.0)
    h = jnp.maximum(h @ params["w2"].T + params["b2"], 0.0)
    return h @ params["w3"].T + params["b3"]


if __name__ == "__main__":
    key = jax.random.PRNGKey(0)
    kx, kp = jax.random.split(key)

    batch = 8
    x = jax.random.normal(kx, (batch, STATE_SIZE), jnp.float32)
    params = init_params(kp)

    out = jax.block_until_ready(qnetwork_forward(x, params))
    ref = reference_forward(x, params)

    assert out.shape == (batch, ACTION_SIZE), out.shape
    # fc2 uses bf16 MXU operands (f32 accumulation), so compare at bf16-level tolerance.
    max_diff = jnp.max(jnp.abs(out - ref))
    assert jnp.allclose(out, ref, atol=5e-2, rtol=5e-2), f"mismatch vs reference: {max_diff}"

    print("KERNEL_OK")
</pallas_src>

<mosaic_0001>
module attributes {stable_mosaic.version = 11 : i64} {
  func.func @_qnet_kernel(%arg0: i32, %arg1: memref<12x128xf32, #tpu.memory_space<vmem>>, %arg2: memref<64x3xf32, #tpu.memory_space<vmem>>, %arg3: memref<64x1xf32, #tpu.memory_space<vmem>>, %arg4: memref<256x256xbf16, #tpu.memory_space<vmem>>, %arg5: memref<256x1xf32, #tpu.memory_space<vmem>>, %arg6: memref<64x3xf32, #tpu.memory_space<vmem>>, %arg7: memref<12x1xf32, #tpu.memory_space<vmem>>, %arg8: memref<12x128xf32, #tpu.memory_space<vmem>>) attributes {dimension_semantics = [#tpu.dimension_semantics<parallel>], iteration_bounds = array<i64: 1>, scalar_prefetch = 0 : i64, scratch_operands = 0 : i64, tpu.core_type = #tpu.core_type<tc>, window_params = [{transform_indices = @transform_0, window_bounds = array<i64: 12, 128>}, {pipeline_mode = #tpu.pipeline_mode<synchronous>, transform_indices = @transform_1, window_bounds = array<i64: 64, 3>}, {pipeline_mode = #tpu.pipeline_mode<synchronous>, transform_indices = @transform_2, window_bounds = array<i64: 64, 1>}, {pipeline_mode = #tpu.pipeline_mode<synchronous>, transform_indices = @transform_3, window_bounds = array<i64: 256, 256>}, {pipeline_mode = #tpu.pipeline_mode<synchronous>, transform_indices = @transform_4, window_bounds = array<i64: 256, 1>}, {pipeline_mode = #tpu.pipeline_mode<synchronous>, transform_indices = @transform_5, window_bounds = array<i64: 64, 3>}, {pipeline_mode = #tpu.pipeline_mode<synchronous>, transform_indices = @transform_6, window_bounds = array<i64: 12, 1>}, {transform_indices = @transform_7, window_bounds = array<i64: 12, 128>}]} {
    %c0 = arith.constant 0 : index
    %c0_0 = arith.constant 0 : index
    %0 = vector.load %arg1[%c0, %c0_0] : memref<12x128xf32, #tpu.memory_space<vmem>>, vector<12x128xf32>
    %c0_1 = arith.constant 0 : index
    %c0_2 = arith.constant 0 : index
    %1 = vector.load %arg2[%c0_1, %c0_2] : memref<64x3xf32, #tpu.memory_space<vmem>>, vector<64x3xf32>
    %c0_3 = arith.constant 0 : index
    %c0_4 = arith.constant 0 : index
    %2 = vector.load %arg3[%c0_3, %c0_4] : memref<64x1xf32, #tpu.memory_space<vmem>>, vector<64x1xf32>
    %3 = vector.extract_strided_slice %1 {offsets = [0, 0], sizes = [64, 1], strides = [1, 1]} : vector<64x3xf32> to vector<64x1xf32>
    %4 = vector.extract_strided_slice %0 {offsets = [0, 0], sizes = [1, 128], strides = [1, 1]} : vector<12x128xf32> to vector<1x128xf32>
    %5 = vector.broadcast %3 : vector<64x1xf32> to vector<64x128xf32>
    %6 = vector.broadcast %4 : vector<1x128xf32> to vector<64x128xf32>
    %7 = arith.mulf %5, %6 : vector<64x128xf32>
    %8 = vector.extract_strided_slice %1 {offsets = [0, 1], sizes = [64, 1], strides = [1, 1]} : vector<64x3xf32> to vector<64x1xf32>
    %9 = vector.extract_strided_slice %0 {offsets = [1, 0], sizes = [1, 128], strides = [1, 1]} : vector<12x128xf32> to vector<1x128xf32>
    %10 = vector.broadcast %8 : vector<64x1xf32> to vector<64x128xf32>
    %11 = vector.broadcast %9 : vector<1x128xf32> to vector<64x128xf32>
    %12 = arith.mulf %10, %11 : vector<64x128xf32>
    %13 = arith.addf %7, %12 : vector<64x128xf32>
    %14 = vector.extract_strided_slice %1 {offsets = [0, 2], sizes = [64, 1], strides = [1, 1]} : vector<64x3xf32> to vector<64x1xf32>
    %15 = vector.extract_strided_slice %0 {offsets = [2, 0], sizes = [1, 128], strides = [1, 1]} : vector<12x128xf32> to vector<1x128xf32>
    %16 = vector.broadcast %14 : vector<64x1xf32> to vector<64x128xf32>
    %17 = vector.broadcast %15 : vector<1x128xf32> to vector<64x128xf32>
    %18 = arith.mulf %16, %17 : vector<64x128xf32>
    %19 = arith.addf %13, %18 : vector<64x128xf32>
    %20 = vector.broadcast %2 : vector<64x1xf32> to vector<64x128xf32>
    %21 = arith.addf %19, %20 : vector<64x128xf32>
    %cst = arith.constant 0.000000e+00 : f32
    %22 = vector.broadcast %cst : f32 to vector<64x128xf32>
    %23 = arith.maximumf %21, %22 : vector<64x128xf32>
    %24 = vector.extract_strided_slice %1 {offsets = [0, 0], sizes = [64, 1], strides = [1, 1]} : vector<64x3xf32> to vector<64x1xf32>
    %25 = vector.extract_strided_slice %0 {offsets = [3, 0], sizes = [1, 128], strides = [1, 1]} : vector<12x128xf32> to vector<1x128xf32>
    %26 = vector.broadcast %24 : vector<64x1xf32> to vector<64x128xf32>
    %27 = vector.broadcast %25 : vector<1x128xf32> to vector<64x128xf32>
    %28 = arith.mulf %26, %27 : vector<64x128xf32>
    %29 = vector.extract_strided_slice %1 {offsets = [0, 1], sizes = [64, 1], strides = [1, 1]} : vector<64x3xf32> to vector<64x1xf32>
    %30 = vector.extract_strided_slice %0 {offsets = [4, 0], sizes = [1, 128], strides = [1, 1]} : vector<12x128xf32> to vector<1x128xf32>
    %31 = vector.broadcast %29 : vector<64x1xf32> to vector<64x128xf32>
    %32 = vector.broadcast %30 : vector<1x128xf32> to vector<64x128xf32>
    %33 = arith.mulf %31, %32 : vector<64x128xf32>
    %34 = arith.addf %28, %33 : vector<64x128xf32>
    %35 = vector.extract_strided_slice %1 {offsets = [0, 2], sizes = [64, 1], strides = [1, 1]} : vector<64x3xf32> to vector<64x1xf32>
    %36 = vector.extract_strided_slice %0 {offsets = [5, 0], sizes = [1, 128], strides = [1, 1]} : vector<12x128xf32> to vector<1x128xf32>
    %37 = vector.broadcast %35 : vector<64x1xf32> to vector<64x128xf32>
    %38 = vector.broadcast %36 : vector<1x128xf32> to vector<64x128xf32>
    %39 = arith.mulf %37, %38 : vector<64x128xf32>
    %40 = arith.addf %34, %39 : vector<64x128xf32>
    %41 = vector.broadcast %2 : vector<64x1xf32> to vector<64x128xf32>
    %42 = arith.addf %40, %41 : vector<64x128xf32>
    %cst_5 = arith.constant 0.000000e+00 : f32
    %43 = vector.broadcast %cst_5 : f32 to vector<64x128xf32>
    %44 = arith.maximumf %42, %43 : vector<64x128xf32>
    %45 = vector.extract_strided_slice %1 {offsets = [0, 0], sizes = [64, 1], strides = [1, 1]} : vector<64x3xf32> to vector<64x1xf32>
    %46 = vector.extract_strided_slice %0 {offsets = [6, 0], sizes = [1, 128], strides = [1, 1]} : vector<12x128xf32> to vector<1x128xf32>
    %47 = vector.broadcast %45 : vector<64x1xf32> to vector<64x128xf32>
    %48 = vector.broadcast %46 : vector<1x128xf32> to vector<64x128xf32>
    %49 = arith.mulf %47, %48 : vector<64x128xf32>
    %50 = vector.extract_strided_slice %1 {offsets = [0, 1], sizes = [64, 1], strides = [1, 1]} : vector<64x3xf32> to vector<64x1xf32>
    %51 = vector.extract_strided_slice %0 {offsets = [7, 0], sizes = [1, 128], strides = [1, 1]} : vector<12x128xf32> to vector<1x128xf32>
    %52 = vector.broadcast %50 : vector<64x1xf32> to vector<64x128xf32>
    %53 = vector.broadcast %51 : vector<1x128xf32> to vector<64x128xf32>
    %54 = arith.mulf %52, %53 : vector<64x128xf32>
    %55 = arith.addf %49, %54 : vector<64x128xf32>
    %56 = vector.extract_strided_slice %1 {offsets = [0, 2], sizes = [64, 1], strides = [1, 1]} : vector<64x3xf32> to vector<64x1xf32>
    %57 = vector.extract_strided_slice %0 {offsets = [8, 0], sizes = [1, 128], strides = [1, 1]} : vector<12x128xf32> to vector<1x128xf32>
    %58 = vector.broadcast %56 : vector<64x1xf32> to vector<64x128xf32>
    %59 = vector.broadcast %57 : vector<1x128xf32> to vector<64x128xf32>
    %60 = arith.mulf %58, %59 : vector<64x128xf32>
    %61 = arith.addf %55, %60 : vector<64x128xf32>
    %62 = vector.broadcast %2 : vector<64x1xf32> to vector<64x128xf32>
    %63 = arith.addf %61, %62 : vector<64x128xf32>
    %cst_6 = arith.constant 0.000000e+00 : f32
    %64 = vector.broadcast %cst_6 : f32 to vector<64x128xf32>
    %65 = arith.maximumf %63, %64 : vector<64x128xf32>
    %66 = vector.extract_strided_slice %1 {offsets = [0, 0], sizes = [64, 1], strides = [1, 1]} : vector<64x3xf32> to vector<64x1xf32>
    %67 = vector.extract_strided_slice %0 {offsets = [9, 0], sizes = [1, 128], strides = [1, 1]} : vector<12x128xf32> to vector<1x128xf32>
    %68 = vector.broadcast %66 : vector<64x1xf32> to vector<64x128xf32>
    %69 = vector.broadcast %67 : vector<1x128xf32> to vector<64x128xf32>
    %70 = arith.mulf %68, %69 : vector<64x128xf32>
    %71 = vector.extract_strided_slice %1 {offsets = [0, 1], sizes = [64, 1], strides = [1, 1]} : vector<64x3xf32> to vector<64x1xf32>
    %72 = vector.extract_strided_slice %0 {offsets = [10, 0], sizes = [1, 128], strides = [1, 1]} : vector<12x128xf32> to vector<1x128xf32>
    %73 = vector.broadcast %71 : vector<64x1xf32> to vector<64x128xf32>
    %74 = vector.broadcast %72 : vector<1x128xf32> to vector<64x128xf32>
    %75 = arith.mulf %73, %74 : vector<64x128xf32>
    %76 = arith.addf %70, %75 : vector<64x128xf32>
    %77 = vector.extract_strided_slice %1 {offsets = [0, 2], sizes = [64, 1], strides = [1, 1]} : vector<64x3xf32> to vector<64x1xf32>
    %78 = vector.extract_strided_slice %0 {offsets = [11, 0], sizes = [1, 128], strides = [1, 1]} : vector<12x128xf32> to vector<1x128xf32>
    %79 = vector.broadcast %77 : vector<64x1xf32> to vector<64x128xf32>
    %80 = vector.broadcast %78 : vector<1x128xf32> to vector<64x128xf32>
    %81 = arith.mulf %79, %80 : vector<64x128xf32>
    %82 = arith.addf %76, %81 : vector<64x128xf32>
    %83 = vector.broadcast %2 : vector<64x1xf32> to vector<64x128xf32>
    %84 = arith.addf %82, %83 : vector<64x128xf32>
    %cst_7 = arith.constant 0.000000e+00 : f32
    %85 = vector.broadcast %cst_7 : f32 to vector<64x128xf32>
    %86 = arith.maximumf %84, %85 : vector<64x128xf32>
    %87 = tpu.concatenate %23, %44, %65, %86 in 0 : vector<64x128xf32>, vector<64x128xf32>, vector<64x128xf32>, vector<64x128xf32> -> vector<256x128xf32>
    %c0_8 = arith.constant 0 : index
    %c0_9 = arith.constant 0 : index
    %88 = vector.load %arg4[%c0_8, %c0_9] : memref<256x256xbf16, #tpu.memory_space<vmem>>, vector<256x256xbf16>
    %89 = arith.truncf %87 : vector<256x128xf32> to vector<256x128xbf16>
    %cst_10 = arith.constant dense<0.000000e+00> : vector<256x128xf32>
    %90 = tpu.matmul %88, %89, %cst_10 {dimension_numbers = #tpu.dot_dimension_numbers<[1], [0], [0], [1], [0, 0, 1, 1], [], []>} : vector<256x256xbf16>, vector<256x128xbf16>, vector<256x128xf32> -> vector<256x128xf32>
    %c0_11 = arith.constant 0 : index
    %c0_12 = arith.constant 0 : index
    %91 = vector.load %arg5[%c0_11, %c0_12] : memref<256x1xf32, #tpu.memory_space<vmem>>, vector<256x1xf32>
    %92 = vector.broadcast %91 : vector<256x1xf32> to vector<256x128xf32>
    %93 = arith.addf %90, %92 : vector<256x128xf32>
    %cst_13 = arith.constant 0.000000e+00 : f32
    %94 = vector.broadcast %cst_13 : f32 to vector<256x128xf32>
    %95 = arith.maximumf %93, %94 : vector<256x128xf32>
    %c0_14 = arith.constant 0 : index
    %c0_15 = arith.constant 0 : index
    %96 = vector.load %arg6[%c0_14, %c0_15] : memref<64x3xf32, #tpu.memory_space<vmem>>, vector<64x3xf32>
    %c0_16 = arith.constant 0 : index
    %c0_17 = arith.constant 0 : index
    %97 = vector.load %arg7[%c0_16, %c0_17] : memref<12x1xf32, #tpu.memory_space<vmem>>, vector<12x1xf32>
    %98 = vector.extract_strided_slice %95 {offsets = [0, 0], sizes = [64, 128], strides = [1, 1]} : vector<256x128xf32> to vector<64x128xf32>
    %99 = vector.extract_strided_slice %96 {offsets = [0, 0], sizes = [64, 1], strides = [1, 1]} : vector<64x3xf32> to vector<64x1xf32>
    %100 = vector.broadcast %99 : vector<64x1xf32> to vector<64x128xf32>
    %101 = arith.mulf %98, %100 : vector<64x128xf32>
    %cst_18 = arith.constant dense<0.000000e+00> : vector<128xf32>
    %102 = vector.multi_reduction <add>, %101, %cst_18 [0] : vector<64x128xf32> to vector<128xf32>
    %103 = vector.shape_cast %102 : vector<128xf32> to vector<1x128xf32>
    %104 = vector.extract_strided_slice %97 {offsets = [0, 0], sizes = [1, 1], strides = [1, 1]} : vector<12x1xf32> to vector<1x1xf32>
    %105 = vector.broadcast %104 : vector<1x1xf32> to vector<1x128xf32>
    %106 = arith.addf %103, %105 : vector<1x128xf32>
    %c0_19 = arith.constant 0 : index
    %c0_20 = arith.constant 0 : index
    %107 = vector.load %arg8[%c0_19, %c0_20] : memref<12x128xf32, #tpu.memory_space<vmem>>, vector<1x128xf32>
    tpu.vector_store %arg8[%c0_19, %c0_20], %106 {strides = array<i32>} : memref<12x128xf32, #tpu.memory_space<vmem>>, vector<1x128xf32>,
    %108 = vector.extract_strided_slice %96 {offsets = [0, 1], sizes = [64, 1], strides = [1, 1]} : vector<64x3xf32> to vector<64x1xf32>
    %109 = vector.broadcast %108 : vector<64x1xf32> to vector<64x128xf32>
    %110 = arith.mulf %98, %109 : vector<64x128xf32>
    %cst_21 = arith.constant dense<0.000000e+00> : vector<128xf32>
    %111 = vector.multi_reduction <add>, %110, %cst_21 [0] : vector<64x128xf32> to vector<128xf32>
    %112 = vector.shape_cast %111 : vector<128xf32> to vector<1x128xf32>
    %113 = vector.extract_strided_slice %97 {offsets = [1, 0], sizes = [1, 1], strides = [1, 1]} : vector<12x1xf32> to vector<1x1xf32>
    %114 = vector.broadcast %113 : vector<1x1xf32> to vector<1x128xf32>
    %115 = arith.addf %112, %114 : vector<1x128xf32>
    %c1 = arith.constant 1 : index
    %c0_22 = arith.constant 0 : index
    %116 = vector.load %arg8[%c1, %c0_22] : memref<12x128xf32, #tpu.memory_space<vmem>>, vector<1x128xf32>
    tpu.vector_store %arg8[%c1, %c0_22], %115 {strides = array<i32>} : memref<12x128xf32, #tpu.memory_space<vmem>>, vector<1x128xf32>,
    %117 = vector.extract_strided_slice %96 {offsets = [0, 2], sizes = [64, 1], strides = [1, 1]} : vector<64x3xf32> to vector<64x1xf32>
    %118 = vector.broadcast %117 : vector<64x1xf32> to vector<64x128xf32>
    %119 = arith.mulf %98, %118 : vector<64x128xf32>
    %cst_23 = arith.constant dense<0.000000e+00> : vector<128xf32>
    %120 = vector.multi_reduction <add>, %119, %cst_23 [0] : vector<64x128xf32> to vector<128xf32>
    %121 = vector.shape_cast %120 : vector<128xf32> to vector<1x128xf32>
    %122 = vector.extract_strided_slice %97 {offsets = [2, 0], sizes = [1, 1], strides = [1, 1]} : vector<12x1xf32> to vector<1x1xf32>
    %123 = vector.broadcast %122 : vector<1x1xf32> to vector<1x128xf32>
    %124 = arith.addf %121, %123 : vector<1x128xf32>
    %c2 = arith.constant 2 : index
    %c0_24 = arith.constant 0 : index
    %125 = vector.load %arg8[%c2, %c0_24] : memref<12x128xf32, #tpu.memory_space<vmem>>, vector<1x128xf32>
    tpu.vector_store %arg8[%c2, %c0_24], %124 {strides = array<i32>} : memref<12x128xf32, #tpu.memory_space<vmem>>, vector<1x128xf32>,
    %126 = vector.extract_strided_slice %95 {offsets = [64, 0], sizes = [64, 128], strides = [1, 1]} : vector<256x128xf32> to vector<64x128xf32>
    %127 = vector.extract_strided_slice %96 {offsets = [0, 0], sizes = [64, 1], strides = [1, 1]} : vector<64x3xf32> to vector<64x1xf32>
    %128 = vector.broadcast %127 : vector<64x1xf32> to vector<64x128xf32>
    %129 = arith.mulf %126, %128 : vector<64x128xf32>
    %cst_25 = arith.constant dense<0.000000e+00> : vector<128xf32>
    %130 = vector.multi_reduction <add>, %129, %cst_25 [0] : vector<64x128xf32> to vector<128xf32>
    %131 = vector.shape_cast %130 : vector<128xf32> to vector<1x128xf32>
    %132 = vector.extract_strided_slice %97 {offsets = [3, 0], sizes = [1, 1], strides = [1, 1]} : vector<12x1xf32> to vector<1x1xf32>
    %133 = vector.broadcast %132 : vector<1x1xf32> to vector<1x128xf32>
    %134 = arith.addf %131, %133 : vector<1x128xf32>
    %c3 = arith.constant 3 : index
    %c0_26 = arith.constant 0 : index
    %135 = vector.load %arg8[%c3, %c0_26] : memref<12x128xf32, #tpu.memory_space<vmem>>, vector<1x128xf32>
    tpu.vector_store %arg8[%c3, %c0_26], %134 {strides = array<i32>} : memref<12x128xf32, #tpu.memory_space<vmem>>, vector<1x128xf32>,
    %136 = vector.extract_strided_slice %96 {offsets = [0, 1], sizes = [64, 1], strides = [1, 1]} : vector<64x3xf32> to vector<64x1xf32>
    %137 = vector.broadcast %136 : vector<64x1xf32> to vector<64x128xf32>
    %138 = arith.mulf %126, %137 : vector<64x128xf32>
    %cst_27 = arith.constant dense<0.000000e+00> : vector<128xf32>
    %139 = vector.multi_reduction <add>, %138, %cst_27 [0] : vector<64x128xf32> to vector<128xf32>
    %140 = vector.shape_cast %139 : vector<128xf32> to vector<1x128xf32>
    %141 = vector.extract_strided_slice %97 {offsets = [4, 0], sizes = [1, 1], strides = [1, 1]} : vector<12x1xf32> to vector<1x1xf32>
    %142 = vector.broadcast %141 : vector<1x1xf32> to vector<1x128xf32>
    %143 = arith.addf %140, %142 : vector<1x128xf32>
    %c4 = arith.constant 4 : index
    %c0_28 = arith.constant 0 : index
    %144 = vector.load %arg8[%c4, %c0_28] : memref<12x128xf32, #tpu.memory_space<vmem>>, vector<1x128xf32>
    tpu.vector_store %arg8[%c4, %c0_28], %143 {strides = array<i32>} : memref<12x128xf32, #tpu.memory_space<vmem>>, vector<1x128xf32>,
    %145 = vector.extract_strided_slice %96 {offsets = [0, 2], sizes = [64, 1], strides = [1, 1]} : vector<64x3xf32> to vector<64x1xf32>
    %146 = vector.broadcast %145 : vector<64x1xf32> to vector<64x128xf32>
    %147 = arith.mulf %126, %146 : vector<64x128xf32>
    %cst_29 = arith.constant dense<0.000000e+00> : vector<128xf32>
    %148 = vector.multi_reduction <add>, %147, %cst_29 [0] : vector<64x128xf32> to vector<128xf32>
    %149 = vector.shape_cast %148 : vector<128xf32> to vector<1x128xf32>
    %150 = vector.extract_strided_slice %97 {offsets = [5, 0], sizes = [1, 1], strides = [1, 1]} : vector<12x1xf32> to vector<1x1xf32>
    %151 = vector.broadcast %150 : vector<1x1xf32> to vector<1x128xf32>
    %152 = arith.addf %149, %151 : vector<1x128xf32>
    %c5 = arith.constant 5 : index
    %c0_30 = arith.constant 0 : index
    %153 = vector.load %arg8[%c5, %c0_30] : memref<12x128xf32, #tpu.memory_space<vmem>>, vector<1x128xf32>
    tpu.vector_store %arg8[%c5, %c0_30], %152 {strides = array<i32>} : memref<12x128xf32, #tpu.memory_space<vmem>>, vector<1x128xf32>,
    %154 = vector.extract_strided_slice %95 {offsets = [128, 0], sizes = [64, 128], strides = [1, 1]} : vector<256x128xf32> to vector<64x128xf32>
    %155 = vector.extract_strided_slice %96 {offsets = [0, 0], sizes = [64, 1], strides = [1, 1]} : vector<64x3xf32> to vector<64x1xf32>
    %156 = vector.broadcast %155 : vector<64x1xf32> to vector<64x128xf32>
    %157 = arith.mulf %154, %156 : vector<64x128xf32>
    %cst_31 = arith.constant dense<0.000000e+00> : vector<128xf32>
    %158 = vector.multi_reduction <add>, %157, %cst_31 [0] : vector<64x128xf32> to vector<128xf32>
    %159 = vector.shape_cast %158 : vector<128xf32> to vector<1x128xf32>
    %160 = vector.extract_strided_slice %97 {offsets = [6, 0], sizes = [1, 1], strides = [1, 1]} : vector<12x1xf32> to vector<1x1xf32>
    %161 = vector.broadcast %160 : vector<1x1xf32> to vector<1x128xf32>
    %162 = arith.addf %159, %161 : vector<1x128xf32>
    %c6 = arith.constant 6 : index
    %c0_32 = arith.constant 0 : index
    %163 = vector.load %arg8[%c6, %c0_32] : memref<12x128xf32, #tpu.memory_space<vmem>>, vector<1x128xf32>
    tpu.vector_store %arg8[%c6, %c0_32], %162 {strides = array<i32>} : memref<12x128xf32, #tpu.memory_space<vmem>>, vector<1x128xf32>,
    %164 = vector.extract_strided_slice %96 {offsets = [0, 1], sizes = [64, 1], strides = [1, 1]} : vector<64x3xf32> to vector<64x1xf32>
    %165 = vector.broadcast %164 : vector<64x1xf32> to vector<64x128xf32>
    %166 = arith.mulf %154, %165 : vector<64x128xf32>
    %cst_33 = arith.constant dense<0.000000e+00> : vector<128xf32>
    %167 = vector.multi_reduction <add>, %166, %cst_33 [0] : vector<64x128xf32> to vector<128xf32>
    %168 = vector.shape_cast %167 : vector<128xf32> to vector<1x128xf32>
    %169 = vector.extract_strided_slice %97 {offsets = [7, 0], sizes = [1, 1], strides = [1, 1]} : vector<12x1xf32> to vector<1x1xf32>
    %170 = vector.broadcast %169 : vector<1x1xf32> to vector<1x128xf32>
    %171 = arith.addf %168, %170 : vector<1x128xf32>
    %c7 = arith.constant 7 : index
    %c0_34 = arith.constant 0 : index
    %172 = vector.load %arg8[%c7, %c0_34] : memref<12x128xf32, #tpu.memory_space<vmem>>, vector<1x128xf32>
    tpu.vector_store %arg8[%c7, %c0_34], %171 {strides = array<i32>} : memref<12x128xf32, #tpu.memory_space<vmem>>, vector<1x128xf32>,
    %173 = vector.extract_strided_slice %96 {offsets = [0, 2], sizes = [64, 1], strides = [1, 1]} : vector<64x3xf32> to vector<64x1xf32>
    %174 = vector.broadcast %173 : vector<64x1xf32> to vector<64x128xf32>
    %175 = arith.mulf %154, %174 : vector<64x128xf32>
    %cst_35 = arith.constant dense<0.000000e+00> : vector<128xf32>
    %176 = vector.multi_reduction <add>, %175, %cst_35 [0] : vector<64x128xf32> to vector<128xf32>
    %177 = vector.shape_cast %176 : vector<128xf32> to vector<1x128xf32>
    %178 = vector.extract_strided_slice %97 {offsets = [8, 0], sizes = [1, 1], strides = [1, 1]} : vector<12x1xf32> to vector<1x1xf32>
    %179 = vector.broadcast %178 : vector<1x1xf32> to vector<1x128xf32>
    %180 = arith.addf %177, %179 : vector<1x128xf32>
    %c8 = arith.constant 8 : index
    %c0_36 = arith.constant 0 : index
    %181 = vector.load %arg8[%c8, %c0_36] : memref<12x128xf32, #tpu.memory_space<vmem>>, vector<1x128xf32>
    tpu.vector_store %arg8[%c8, %c0_36], %180 {strides = array<i32>} : memref<12x128xf32, #tpu.memory_space<vmem>>, vector<1x128xf32>,
    %182 = vector.extract_strided_slice %95 {offsets = [192, 0], sizes = [64, 128], strides = [1, 1]} : vector<256x128xf32> to vector<64x128xf32>
    %183 = vector.extract_strided_slice %96 {offsets = [0, 0], sizes = [64, 1], strides = [1, 1]} : vector<64x3xf32> to vector<64x1xf32>
    %184 = vector.broadcast %183 : vector<64x1xf32> to vector<64x128xf32>
    %185 = arith.mulf %182, %184 : vector<64x128xf32>
    %cst_37 = arith.constant dense<0.000000e+00> : vector<128xf32>
    %186 = vector.multi_reduction <add>, %185, %cst_37 [0] : vector<64x128xf32> to vector<128xf32>
    %187 = vector.shape_cast %186 : vector<128xf32> to vector<1x128xf32>
    %188 = vector.extract_strided_slice %97 {offsets = [9, 0], sizes = [1, 1], strides = [1, 1]} : vector<12x1xf32> to vector<1x1xf32>
    %189 = vector.broadcast %188 : vector<1x1xf32> to vector<1x128xf32>
    %190 = arith.addf %187, %189 : vector<1x128xf32>
    %c9 = arith.constant 9 : index
    %c0_38 = arith.constant 0 : index
    %191 = vector.load %arg8[%c9, %c0_38] : memref<12x128xf32, #tpu.memory_space<vmem>>, vector<1x128xf32>
    tpu.vector_store %arg8[%c9, %c0_38], %190 {strides = array<i32>} : memref<12x128xf32, #tpu.memory_space<vmem>>, vector<1x128xf32>,
    %192 = vector.extract_strided_slice %96 {offsets = [0, 1], sizes = [64, 1], strides = [1, 1]} : vector<64x3xf32> to vector<64x1xf32>
    %193 = vector.broadcast %192 : vector<64x1xf32> to vector<64x128xf32>
    %194 = arith.mulf %182, %193 : vector<64x128xf32>
    %cst_39 = arith.constant dense<0.000000e+00> : vector<128xf32>
    %195 = vector.multi_reduction <add>, %194, %cst_39 [0] : vector<64x128xf32> to vector<128xf32>
    %196 = vector.shape_cast %195 : vector<128xf32> to vector<1x128xf32>
    %197 = vector.extract_strided_slice %97 {offsets = [10, 0], sizes = [1, 1], strides = [1, 1]} : vector<12x1xf32> to vector<1x1xf32>
    %198 = vector.broadcast %197 : vector<1x1xf32> to vector<1x128xf32>
    %199 = arith.addf %196, %198 : vector<1x128xf32>
    %c10 = arith.constant 10 : index
    %c0_40 = arith.constant 0 : index
    %200 = vector.load %arg8[%c10, %c0_40] : memref<12x128xf32, #tpu.memory_space<vmem>>, vector<1x128xf32>
    tpu.vector_store %arg8[%c10, %c0_40], %199 {strides = array<i32>} : memref<12x128xf32, #tpu.memory_space<vmem>>, vector<1x128xf32>,
    %201 = vector.extract_strided_slice %96 {offsets = [0, 2], sizes = [64, 1], strides = [1, 1]} : vector<64x3xf32> to vector<64x1xf32>
    %202 = vector.broadcast %201 : vector<64x1xf32> to vector<64x128xf32>
    %203 = arith.mulf %182, %202 : vector<64x128xf32>
    %cst_41 = arith.constant dense<0.000000e+00> : vector<128xf32>
    %204 = vector.multi_reduction <add>, %203, %cst_41 [0] : vector<64x128xf32> to vector<128xf32>
    %205 = vector.shape_cast %204 : vector<128xf32> to vector<1x128xf32>
    %206 = vector.extract_strided_slice %97 {offsets = [11, 0], sizes = [1, 1], strides = [1, 1]} : vector<12x1xf32> to vector<1x1xf32>
    %207 = vector.broadcast %206 : vector<1x1xf32> to vector<1x128xf32>
    %208 = arith.addf %205, %207 : vector<1x128xf32>
    %c11 = arith.constant 11 : index
    %c0_42 = arith.constant 0 : index
    %209 = vector.load %arg8[%c11, %c0_42] : memref<12x128xf32, #tpu.memory_space<vmem>>, vector<1x128xf32>
    tpu.vector_store %arg8[%c11, %c0_42], %208 {strides = array<i32>} : memref<12x128xf32, #tpu.memory_space<vmem>>, vector<1x128xf32>,
    return
  }
  func.func @transform_0(%arg0: i32) -> (i32, i32) {
    %c0_i32 = arith.constant 0 : i32
    %c0_i32_0 = arith.constant 0 : i32
    return %c0_i32, %arg0 : i32, i32
  }
  func.func @transform_1(%arg0: i32) -> (i32, i32) {
    %c0_i32 = arith.constant 0 : i32
    %c0_i32_0 = arith.constant 0 : i32
    %c0_i32_1 = arith.constant 0 : i32
    return %c0_i32, %c0_i32_0 : i32, i32
  }
  func.func @transform_2(%arg0: i32) -> (i32, i32) {
    %c0_i32 = arith.constant 0 : i32
    %c0_i32_0 = arith.constant 0 : i32
    %c0_i32_1 = arith.constant 0 : i32
    return %c0_i32, %c0_i32_0 : i32, i32
  }
  func.func @transform_3(%arg0: i32) -> (i32, i32) {
    %c0_i32 = arith.constant 0 : i32
    %c0_i32_0 = arith.constant 0 : i32
    %c0_i32_1 = arith.constant 0 : i32
    return %c0_i32, %c0_i32_0 : i32, i32
  }
  func.func @transform_4(%arg0: i32) -> (i32, i32) {
    %c0_i32 = arith.constant 0 : i32
    %c0_i32_0 = arith.constant 0 : i32
    %c0_i32_1 = arith.constant 0 : i32
    return %c0_i32, %c0_i32_0 : i32, i32
  }
  func.func @transform_5(%arg0: i32) -> (i32, i32) {
    %c0_i32 = arith.constant 0 : i32
    %c0_i32_0 = arith.constant 0 : i32
    %c0_i32_1 = arith.constant 0 : i32
    return %c0_i32, %c0_i32_0 : i32, i32
  }
  func.func @transform_6(%arg0: i32) -> (i32, i32) {
    %c0_i32 = arith.constant 0 : i32
    %c0_i32_0 = arith.constant 0 : i32
    %c0_i32_1 = arith.constant 0 : i32
    return %c0_i32, %c0_i32_0 : i32, i32
  }
  func.func @transform_7(%arg0: i32) -> (i32, i32) {
    %c0_i32 = arith.constant 0 : i32
    %c0_i32_0 = arith.constant 0 : i32
    return %c0_i32, %arg0 : i32, i32
  }
}

</mosaic_0001>

<bundles_post_ra>
// kernel: tile.13
= control target key start
LH: loop header
LB: loop body
LE: loop exit
PB: predicated region body
PF: predicated region fallthrough
CT: control target
= control target key end

     0   :  { %s22_s0 = inlined_call_operand.vmem [shape: f32[64], index: 0, kind: input, shape index: {}]   ;;  %s23_s1 = inlined_call_operand.vmem [shape: f32[4,64], index: 1, kind: output, shape index: {}]  }
   0x1   :  { %v4_v0 = vld [vmem:[%s22_s0] ss:$0 sm:$0xff] }
   0x2   :  { %5 = vst [vmem:[%s23_s1] sm:$0xf] %v4_v0 }

// kernel: tile.0
= control target key start
LH: loop header
LB: loop body
LE: loop exit
PB: predicated region body
PF: predicated region fallthrough
CT: control target
= control target key end

     0   :  { %s1091_s8 = smov 125   ;;  %s1092_s9 = smov 126   ;;  %vm8_vm0 = vcmask 7168   ;;  %s2190_s0 = inlined_call_operand.vmem [shape: f32[4,64], index: 0, kind: input, shape index: {}]   ;;  %s2191_s1 = inlined_call_operand.vmem [shape: f32[256,1], index: 1, kind: output, shape index: {}]  }
   0x1   :  { %v5_v0 = vld [vmem:[%s2190_s0] sm:$0xf]  ;;  %s1090_s0 = smov 127   ;;  %s1093_s10 = smov 124  }
   0x2   :  { %6 = vst [vmem:[#allocation0] sm:$0xf] %v5_v0  ;;  %s1094_s11 = smov 123   ;;  %s1095_s12 = smov 122  }
   0x3   :  { %s1096_s13 = smov 121   ;;  %s1097_s14 = smov 120  }
   0x4   :  { %s1098_s15 = smov 119   ;;  %s1099_s16 = smov 118  }
   0x5   :  { %s1100_s17 = smov 117   ;;  %s1101_s18 = smov 116  }
   0x6   :  { %s1102_s19 = smov 115   ;;  %s1103_s20 = smov 114  }
   0x7   :  { %s1104_s21 = smov 113   ;;  %s1105_s22 = smov 112  }
   0x8   :  { %s1106_s23 = smov 111   ;;  %s1107_s24 = smov 110  }
   0x9   :  { %v16_v1 = vld [vmem:[#allocation0] sm:$0xf]   ;;  %s1108_s25 = smov 109   ;;  %s1109_s26 = smov 108  }
   0xa   :  { %v40_v2 = vld [vmem:[#allocation0] sm:$0xf]   ;;  %17 = vrot.lane.b32.xlu0 %v16_v1, %s1090_s0  ;;  %s1110_s27 = smov 107   ;;  %s1111_s28 = smov 106  }
   0xb   :  { %41 = vrot.lane.b32.xlu1 %v40_v2, %s1091_s8  ;;  %v28_v3 = vld [vmem:[#allocation0] sm:$0xf]   ;;  %s1112_s29 = smov 105   ;;  %s1113_s30 = smov 104  }
   0xc   :  { %v52_v4 = vld [vmem:[#allocation0] sm:$0xf]   ;;  %s1114_s2 = smov 103   ;;  %s1115_s3 = smov 102  }
   0xd   :  { %v64_v5 = vld [vmem:[#allocation0] sm:$0xf]   ;;  %s1116_s4 = smov 101   ;;  %s1117_s5 = smov 100  }
   0xe   :  { %29 = vrot.lane.b32.xlu0 %v28_v3, %s1092_s9  ;;  %v76_v6 = vld [vmem:[#allocation0] sm:$0xf]   ;;  %s1118_s6 = smov 99   ;;  %s1119_s7 = smov 98  }
   0xf   :  { %53 = vrot.lane.b32.xlu1 %v52_v4, %s1093_s10  ;;  %v88_v7 = vld [vmem:[#allocation0] sm:$0xf]   ;;  %s1120_s0 = smov 97   ;;  %s1121_s8 = smov 96  }
  0x10   :  { %v100_v8 = vld [vmem:[#allocation0] sm:$0xf]   ;;  %s1122_s9 = smov 95   ;;  %s1123_s10 = smov 94  }
  0x11   :  { %v112_v9 = vld [vmem:[#allocation0] sm:$0xf]  }
  0x12   :  { %65 = vrot.lane.b32.xlu0 %v64_v5, %s1094_s11  ;;  %v124_v10 = vld [vmem:[#allocation0] sm:$0xf]   ;;  %s1124_s11 = smov 93  }
  0x13   :  { %77 = vrot.lane.b32.xlu1 %v76_v6, %s1095_s12  ;;  %v136_v11 = vld [vmem:[#allocation0] sm:$0xf]   ;;  %s1125_s12 = smov 92  }
  0x14   :  { %v148_v12 = vld [vmem:[#allocation0] sm:$0xf]  }
  0x15   :  { %v160_v13 = vld [vmem:[#allocation0] sm:$0xf]  }
  0x16   :  { %89 = vrot.lane.b32.xlu0 %v88_v7, %s1096_s13  ;;  %v172_v14 = vld [vmem:[#allocation0] sm:$0xf]   ;;  %s1126_s13 = smov 91  }
  0x17   :  { %101 = vrot.lane.b32.xlu1 %v100_v8, %s1097_s14  ;;  %v184_v15 = vld [vmem:[#allocation0] sm:$0xf]   ;;  %s1127_s14 = smov 90  }
  0x18   :  { %v196_v16 = vld [vmem:[#allocation0] sm:$0xf]  }
  0x19   :  { %v208_v17 = vld [vmem:[#allocation0] sm:$0xf]  }
  0x1a   :  { %113 = vrot.lane.b32.xlu0 %v112_v9, %s1098_s15  ;;  %v220_v18 = vld [vmem:[#allocation0] sm:$0xf]   ;;  %s1128_s15 = smov 89  }
  0x1b   :  { %125 = vrot.lane.b32.xlu1 %v124_v10, %s1099_s16  ;;  %v232_v19 = vld [vmem:[#allocation0] sm:$0xf]   ;;  %s1129_s16 = smov 88  }
  0x1c   :  { %v244_v20 = vld [vmem:[#allocation0] sm:$0xf]  }
  0x1d   :  { %v256_v21 = vld [vmem:[#allocation0] sm:$0xf]  }
  0x1e   :  { %137 = vrot.lane.b32.xlu0 %v136_v11, %s1100_s17  ;;  %v268_v22 = vld [vmem:[#allocation0] sm:$0xf]   ;;  %s1130_s17 = smov 87  }
  0x1f   :  { %149 = vrot.lane.b32.xlu1 %v148_v12, %s1101_s18  ;;  %v280_v23 = vld [vmem:[#allocation0] sm:$0xf]   ;;  %s1131_s18 = smov 86  }
  0x20   :  { %v292_v24 = vld [vmem:[#allocation0] sm:$0xf]  }
  0x21   :  { %v304_v25 = vld [vmem:[#allocation0] sm:$0xf]  }
  0x22   :  { %161 = vrot.lane.b32.xlu0 %v160_v13, %s1102_s19  ;;  %v316_v26 = vld [vmem:[#allocation0] sm:$0xf]   ;;  %s1132_s19 = smov 85  }
  0x23   :  { %173 = vrot.lane.b32.xlu1 %v172_v14, %s1103_s20  ;;  %v328_v27 = vld [vmem:[#allocation0] sm:$0xf]   ;;  %s1133_s20 = smov 84  }
  0x24   :  { %v340_v28 = vld [vmem:[#allocation0] sm:$0xf]  }
  0x25   :  { %v352_v29 = vld [vmem:[#allocation0] sm:$0xf]  }
  0x26   :  { %185 = vrot.lane.b32.xlu0 %v184_v15, %s1104_s21  ;;  %v364_v30 = vld [vmem:[#allocation0] sm:$0xf]   ;;  %s1134_s21 = smov 83  }
  0x27   :  { %197 = vrot.lane.b32.xlu1 %v196_v16, %s1105_s22  ;;  %v376_v31 = vld [vmem:[#allocation0] sm:$0xf]   ;;  %s1135_s22 = smov 82  }
  0x28   :  { %v388_v32 = vld [vmem:[#allocation0] sm:$0xf]  }
  0x29   :  { %v400_v33 = vld [vmem:[#allocation0] sm:$0xf]  }
  0x2a   :  { %209 = vrot.lane.b32.xlu0 %v208_v17, %s1106_s23  ;;  %v412_v34 = vld [vmem:[#allocation0] sm:$0xf]   ;;  %s1136_s23 = smov 81  }
  0x2b   :  { %221 = vrot.lane.b32.xlu1 %v220_v18, %s1107_s24  ;;  %v424_v35 = vld [vmem:[#allocation0] sm:$0xf]   ;;  %s1137_s24 = smov 80  }
  0x2c   :  { %v436_v36 = vld [vmem:[#allocation0] sm:$0xf]  }
  0x2d   :  { %v448_v37 = vld [vmem:[#allocation0] sm:$0xf]  }
  0x2e   :  { %233 = vrot.lane.b32.xlu0 %v232_v19, %s1108_s25  ;;  %v460_v38 = vld [vmem:[#allocation0] sm:$0xf]   ;;  %s1138_s25 = smov 79  }
  0x2f   :  { %245 = vrot.lane.b32.xlu1 %v244_v20, %s1109_s26  ;;  %v472_v39 = vld [vmem:[#allocation0] sm:$0xf]   ;;  %s1139_s26 = smov 78  }
  0x30   :  { %v484_v40 = vld [vmem:[#allocation0] sm:$0xf]  }
  0x31   :  { %v496_v41 = vld [vmem:[#allocation0] sm:$0xf]  }
  0x32   :  { %257 = vrot.lane.b32.xlu0 %v256_v21, %s1110_s27  ;;  %v508_v42 = vld [vmem:[#allocation0] sm:$0xf]   ;;  %s1140_s27 = smov 77  }
  0x33   :  { %269 = vrot.lane.b32.xlu1 %v268_v22, %s1111_s28  ;;  %v520_v43 = vld [vmem:[#allocation0] sm:$0xf]   ;;  %s1141_s28 = smov 76  }
  0x34   :  { %v532_v44 = vld [vmem:[#allocation0] sm:$0xf]  }
  0x35   :  { %v544_v45 = vld [vmem:[#allocation0] sm:$0xf]  }
  0x36   :  { %281 = vrot.lane.b32.xlu0 %v280_v23, %s1112_s29  ;;  %v556_v46 = vld [vmem:[#allocation0] sm:$0xf]   ;;  %s1142_s29 = smov 75  }
  0x37   :  { %293 = vrot.lane.b32.xlu1 %v292_v24, %s1113_s30  ;;  %v568_v47 = vld [vmem:[#allocation0] sm:$0xf]   ;;  %s1143_s30 = smov 74  }
  0x38   :  { %v580_v48 = vld [vmem:[#allocation0] sm:$0xf]  }
  0x39   :  { %v592_v49 = vld [vmem:[#allocation0] sm:$0xf]  }
  0x3a   :  { %305 = vrot.lane.b32.xlu0 %v304_v25, %s1114_s2  ;;  %v604_v50 = vld [vmem:[#allocation0] sm:$0xf]   ;;  %s1144_s2 = smov 73  }
  0x3b   :  { %317 = vrot.lane.b32.xlu1 %v316_v26, %s1115_s3  ;;  %v616_v51 = vld [vmem:[#allocation0] sm:$0xf]   ;;  %s1145_s3 = smov 72  }
  0x3c   :  { %v628_v52 = vld [vmem:[#allocation0] sm:$0xf]  }
  0x3d   :  { %v640_v53 = vld [vmem:[#allocation0] sm:$0xf]  }
  0x3e   :  { %329 = vrot.lane.b32.xlu0 %v328_v27, %s1116_s4  ;;  %v652_v54 = vld [vmem:[#allocation0] sm:$0xf]  }
  0x3f   :  { %341 = vrot.lane.b32.xlu1 %v340_v28, %s1117_s5  ;;  %v664_v55 = vld [vmem:[#allocation0] sm:$0xf]  }
  0x40   :  { %v676_v56 = vld [vmem:[#allocation0] sm:$0xf]  }
  0x41   :  { %v688_v57 = vld [vmem:[#allocation0] sm:$0xf]  }
  0x42   :  { %353 = vrot.lane.b32.xlu0 %v352_v29, %s1118_s6  ;;  %v700_v58 = vld [vmem:[#allocation0] sm:$0xf]   ;;  %s1152_s6 = smov 65  }
  0x43   :  { %365 = vrot.lane.b32.xlu1 %v364_v30, %s1119_s7  ;;  %v7_v59 = vld [vmem:[#allocation0] sm:$0xf]  }
  0x44   :  { %9 = vst.msk [vmem:[%s2191_s1] sm:$0x1] %vm8_vm0, %v7_v59   ;;  %772 = vst.msk [vmem:[%s2191_s1 + $0x3f] sm:$0x2] %vm8_vm0, %v7_v59   ;;  %v712_v60 = vld [vmem:[#allocation0] sm:$0xf]  }
  0x45   :  { %773 = vst.msk [vmem:[%s2191_s1 + $0x7e] sm:$0x4] %vm8_vm0, %v7_v59   ;;  %774 = vst.msk [vmem:[%s2191_s1 + $0xbd] sm:$0x8] %vm8_vm0, %v7_v59   ;;  %v724_v61 = vld [vmem:[#allocation0] sm:$0xf]  }
  0x46   :  { %377 = vrot.lane.b32.xlu0 %v376_v31, %s1120_s0  ;;  %v736_v0 = vld [vmem:[#allocation0] sm:$0xf]  }
  0x47   :  { %389 = vrot.lane.b32.xlu1 %v388_v32, %s1121_s8  ;;  %v748_v1 = vld [vmem:[#allocation0] sm:$0xf]  }
  0x48   :  { %v760_v4 = vld [vmem:[#allocation0] sm:$0xf]  }
  0x4a   :  { %401 = vrot.lane.b32.xlu0 %v400_v33, %s1122_s9 }
  0x4b   :  { %413 = vrot.lane.b32.xlu1 %v412_v34, %s1123_s10 }
  0x4e   :  { %425 = vrot.lane.b32.xlu0 %v424_v35, %s1124_s11  ;;  %s1146_s11 = smov 71  }
  0x4f   :  { %437 = vrot.lane.b32.xlu1 %v436_v36, %s1125_s12  ;;  %s1147_s12 = smov 70  }
  0x52   :  { %449 = vrot.lane.b32.xlu0 %v448_v37, %s1126_s13 }
  0x53   :  { %461 = vrot.lane.b32.xlu1 %v460_v38, %s1127_s14 }
  0x56   :  { %473 = vrot.lane.b32.xlu0 %v472_v39, %s1128_s15 }
  0x57   :  { %485 = vrot.lane.b32.xlu1 %v484_v40, %s1129_s16 }
  0x5a   :  { %497 = vrot.lane.b32.xlu0 %v496_v41, %s1130_s17  ;;  %s1150_s17 = smov 67  }
  0x5b   :  { %509 = vrot.lane.b32.xlu1 %v508_v42, %s1131_s18  ;;  %s1151_s18 = smov 66  }
  0x5e   :  { %521 = vrot.lane.b32.xlu0 %v520_v43, %s1132_s19 }
  0x5f   :  { %533 = vrot.lane.b32.xlu1 %v532_v44, %s1133_s20 }
  0x62   :  { %545 = vrot.lane.b32.xlu0 %v544_v45, %s1134_s21 }
  0x63   :  { %557 = vrot.lane.b32.xlu1 %v556_v46, %s1135_s22 }
  0x66   :  { %569 = vrot.lane.b32.xlu0 %v568_v47, %s1136_s23 }
  0x67   :  { %581 = vrot.lane.b32.xlu1 %v580_v48, %s1137_s24 }
  0x6a   :  { %593 = vrot.lane.b32.xlu0 %v592_v49, %s1138_s25 }
  0x6b   :  { %605 = vrot.lane.b32.xlu1 %v604_v50, %s1139_s26 }
  0x6e   :  { %617 = vrot.lane.b32.xlu0 %v616_v51, %s1140_s27 }
  0x6f   :  { %629 = vrot.lane.b32.xlu1 %v628_v52, %s1141_s28 }
  0x72   :  { %641 = vrot.lane.b32.xlu0 %v640_v53, %s1142_s29  ;;  %s1148_s29 = smov 69  }
  0x73   :  { %653 = vrot.lane.b32.xlu1 %v652_v54, %s1143_s30  ;;  %s1149_s30 = smov 68  }
  0x76   :  { %665 = vrot.lane.b32.xlu0 %v664_v55, %s1144_s2 }
  0x77   :  { %677 = vrot.lane.b32.xlu1 %v676_v56, %s1145_s3 }
  0x7a   :  { %689 = vrot.lane.b32.xlu0 %v688_v57, %s1146_s11 }
  0x7b   :  { %701 = vrot.lane.b32.xlu1 %v700_v58, %s1147_s12 }
  0x7c   :  { %v18_v62 = vpop.permute.xlu0 %17  }
  0x7d   :  { %v42_v63 = vpop.permute.xlu1 %41   ;;  %775 = vst.msk [vmem:[%s2191_s1 + $0x1] sm:$0x1] %vm8_vm0, %v18_v62   ;;  %776 = vst.msk [vmem:[%s2191_s1 + $0x40] sm:$0x2] %vm8_vm0, %v18_v62  }
  0x7e   :  { %777 = vst.msk [vmem:[%s2191_s1 + $0x7f] sm:$0x4] %vm8_vm0, %v18_v62   ;;  %778 = vst.msk [vmem:[%s2191_s1 + $0xbe] sm:$0x8] %vm8_vm0, %v18_v62   ;;  %713 = vrot.lane.b32.xlu0 %v712_v60, %s1148_s29 }
  0x7f   :  { %783 = vst.msk [vmem:[%s2191_s1 + $0x3] sm:$0x1] %vm8_vm0, %v42_v63   ;;  %784 = vst.msk [vmem:[%s2191_s1 + $0x42] sm:$0x2] %vm8_vm0, %v42_v63   ;;  %725 = vrot.lane.b32.xlu1 %v724_v61, %s1149_s30 }
  0x80   :  { %785 = vst.msk [vmem:[%s2191_s1 + $0x81] sm:$0x4] %vm8_vm0, %v42_v63   ;;  %786 = vst.msk [vmem:[%s2191_s1 + $0xc0] sm:$0x8] %vm8_vm0, %v42_v63   ;;  %v30_v2 = vpop.permute.xlu0 %29  }
  0x81   :  { %v54_v3 = vpop.permute.xlu1 %53   ;;  %779 = vst.msk [vmem:[%s2191_s1 + $0x2] sm:$0x1] %vm8_vm0, %v30_v2   ;;  %780 = vst.msk [vmem:[%s2191_s1 + $0x41] sm:$0x2] %vm8_vm0, %v30_v2  }
  0x82   :  { %781 = vst.msk [vmem:[%s2191_s1 + $0x80] sm:$0x4] %vm8_vm0, %v30_v2   ;;  %782 = vst.msk [vmem:[%s2191_s1 + $0xbf] sm:$0x8] %vm8_vm0, %v30_v2   ;;  %737 = vrot.lane.b32.xlu0 %v736_v0, %s1150_s17 }
  0x83   :  { %787 = vst.msk [vmem:[%s2191_s1 + $0x4] sm:$0x1] %vm8_vm0, %v54_v3   ;;  %788 = vst.msk [vmem:[%s2191_s1 + $0x43] sm:$0x2] %vm8_vm0, %v54_v3   ;;  %749 = vrot.lane.b32.xlu1 %v748_v1, %s1151_s18 }
  0x84   :  { %789 = vst.msk [vmem:[%s2191_s1 + $0x82] sm:$0x4] %vm8_vm0, %v54_v3   ;;  %790 = vst.msk [vmem:[%s2191_s1 + $0xc1] sm:$0x8] %vm8_vm0, %v54_v3   ;;  %v66_v5 = vpop.permute.xlu0 %65  }
  0x85   :  { %v78_v6 = vpop.permute.xlu1 %77   ;;  %791 = vst.msk [vmem:[%s2191_s1 + $0x5] sm:$0x1] %vm8_vm0, %v66_v5   ;;  %792 = vst.msk [vmem:[%s2191_s1 + $0x44] sm:$0x2] %vm8_vm0, %v66_v5  }
  0x86   :  { %793 = vst.msk [vmem:[%s2191_s1 + $0x83] sm:$0x4] %vm8_vm0, %v66_v5   ;;  %794 = vst.msk [vmem:[%s2191_s1 + $0xc2] sm:$0x8] %vm8_vm0, %v66_v5   ;;  %761 = vrot.lane.b32.xlu0 %v760_v4, %s1152_s6 }
  0x87   :  { %795 = vst.msk [vmem:[%s2191_s1 + $0x6] sm:$0x1] %vm8_vm0, %v78_v6   ;;  %796 = vst.msk [vmem:[%s2191_s1 + $0x45] sm:$0x2] %vm8_vm0, %v78_v6  }
  0x88   :  { %797 = vst.msk [vmem:[%s2191_s1 + $0x84] sm:$0x4] %vm8_vm0, %v78_v6   ;;  %798 = vst.msk [vmem:[%s2191_s1 + $0xc3] sm:$0x8] %vm8_vm0, %v78_v6   ;;  %v90_v7 = vpop.permute.xlu0 %89  }
  0x89   :  { %v102_v8 = vpop.permute.xlu1 %101   ;;  %799 = vst.msk [vmem:[%s2191_s1 + $0x7] sm:$0x1] %vm8_vm0, %v90_v7   ;;  %800 = vst.msk [vmem:[%s2191_s1 + $0x46] sm:$0x2] %vm8_vm0, %v90_v7  }
  0x8a   :  { %801 = vst.msk [vmem:[%s2191_s1 + $0x85] sm:$0x4] %vm8_vm0, %v90_v7   ;;  %802 = vst.msk [vmem:[%s2191_s1 + $0xc4] sm:$0x8] %vm8_vm0, %v90_v7  }
  0x8b   :  { %803 = vst.msk [vmem:[%s2191_s1 + $0x8] sm:$0x1] %vm8_vm0, %v102_v8   ;;  %804 = vst.msk [vmem:[%s2191_s1 + $0x47] sm:$0x2] %vm8_vm0, %v102_v8  }
  0x8c   :  { %805 = vst.msk [vmem:[%s2191_s1 + $0x86] sm:$0x4] %vm8_vm0, %v102_v8   ;;  %806 = vst.msk [vmem:[%s2191_s1 + $0xc5] sm:$0x8] %vm8_vm0, %v102_v8   ;;  %v114_v9 = vpop.permute.xlu0 %113  }
  0x8d   :  { %v126_v10 = vpop.permute.xlu1 %125   ;;  %807 = vst.msk [vmem:[%s2191_s1 + $0x9] sm:$0x1] %vm8_vm0, %v114_v9   ;;  %808 = vst.msk [vmem:[%s2191_s1 + $0x48] sm:$0x2] %vm8_vm0, %v114_v9  }
  0x8e   :  { %809 = vst.msk [vmem:[%s2191_s1 + $0x87] sm:$0x4] %vm8_vm0, %v114_v9   ;;  %810 = vst.msk [vmem:[%s2191_s1 + $0xc6] sm:$0x8] %vm8_vm0, %v114_v9  }
  0x8f   :  { %811 = vst.msk [vmem:[%s2191_s1 + $0xa] sm:$0x1] %vm8_vm0, %v126_v10   ;;  %812 = vst.msk [vmem:[%s2191_s1 + $0x49] sm:$0x2] %vm8_vm0, %v126_v10  }
  0x90   :  { %813 = vst.msk [vmem:[%s2191_s1 + $0x88] sm:$0x4] %vm8_vm0, %v126_v10   ;;  %814 = vst.msk [vmem:[%s2191_s1 + $0xc7] sm:$0x8] %vm8_vm0, %v126_v10   ;;  %v138_v11 = vpop.permute.xlu0 %137  }
  0x91   :  { %v150_v12 = vpop.permute.xlu1 %149   ;;  %815 = vst.msk [vmem:[%s2191_s1 + $0xb] sm:$0x1] %vm8_vm0, %v138_v11   ;;  %816 = vst.msk [vmem:[%s2191_s1 + $0x4a] sm:$0x2] %vm8_vm0, %v138_v11  }
  0x92   :  { %817 = vst.msk [vmem:[%s2191_s1 + $0x89] sm:$0x4] %vm8_vm0, %v138_v11   ;;  %818 = vst.msk [vmem:[%s2191_s1 + $0xc8] sm:$0x8] %vm8_vm0, %v138_v11  }
  0x93   :  { %819 = vst.msk [vmem:[%s2191_s1 + $0xc] sm:$0x1] %vm8_vm0, %v150_v12   ;;  %820 = vst.msk [vmem:[%s2191_s1 + $0x4b] sm:$0x2] %vm8_vm0, %v150_v12  }
  0x94   :  { %821 = vst.msk [vmem:[%s2191_s1 + $0x8a] sm:$0x4] %vm8_vm0, %v150_v12   ;;  %822 = vst.msk [vmem:[%s2191_s1 + $0xc9] sm:$0x8] %vm8_vm0, %v150_v12   ;;  %v162_v13 = vpop.permute.xlu0 %161  }
  0x95   :  { %v174_v14 = vpop.permute.xlu1 %173   ;;  %823 = vst.msk [vmem:[%s2191_s1 + $0xd] sm:$0x1] %vm8_vm0, %v162_v13   ;;  %824 = vst.msk [vmem:[%s2191_s1 + $0x4c] sm:$0x2] %vm8_vm0, %v162_v13  }
  0x96   :  { %825 = vst.msk [vmem:[%s2191_s1 + $0x8b] sm:$0x4] %vm8_vm0, %v162_v13   ;;  %826 = vst.msk [vmem:[%s2191_s1 + $0xca] sm:$0x8] %vm8_vm0, %v162_v13  }
  0x97   :  { %827 = vst.msk [vmem:[%s2191_s1 + $0xe] sm:$0x1] %vm8_vm0, %v174_v14   ;;  %828 = vst.msk [vmem:[%s2191_s1 + $0x4d] sm:$0x2] %vm8_vm0, %v174_v14  }
  0x98   :  { %829 = vst.msk [vmem:[%s2191_s1 + $0x8c] sm:$0x4] %vm8_vm0, %v174_v14   ;;  %830 = vst.msk [vmem:[%s2191_s1 + $0xcb] sm:$0x8] %vm8_vm0, %v174_v14   ;;  %v186_v15 = vpop.permute.xlu0 %185  }
  0x99   :  { %v198_v16 = vpop.permute.xlu1 %197   ;;  %831 = vst.msk [vmem:[%s2191_s1 + $0xf] sm:$0x1] %vm8_vm0, %v186_v15   ;;  %832 = vst.msk [vmem:[%s2191_s1 + $0x4e] sm:$0x2] %vm8_vm0, %v186_v15  }
  0x9a   :  { %833 = vst.msk [vmem:[%s2191_s1 + $0x8d] sm:$0x4] %vm8_vm0, %v186_v15   ;;  %834 = vst.msk [vmem:[%s2191_s1 + $0xcc] sm:$0x8] %vm8_vm0, %v186_v15  }
  0x9b   :  { %835 = vst.msk [vmem:[%s2191_s1 + $0x10] sm:$0x1] %vm8_vm0, %v198_v16   ;;  %836 = vst.msk [vmem:[%s2191_s1 + $0x4f] sm:$0x2] %vm8_vm0, %v198_v16  }
  0x9c   :  { %837 = vst.msk [vmem:[%s2191_s1 + $0x8e] sm:$0x4] %vm8_vm0, %v198_v16   ;;  %838 = vst.msk [vmem:[%s2191_s1 + $0xcd] sm:$0x8] %vm8_vm0, %v198_v16   ;;  %v210_v17 = vpop.permute.xlu0 %209  }
  0x9d   :  { %v222_v18 = vpop.permute.xlu1 %221   ;;  %839 = vst.msk [vmem:[%s2191_s1 + $0x11] sm:$0x1] %vm8_vm0, %v210_v17   ;;  %840 = vst.msk [vmem:[%s2191_s1 + $0x50] sm:$0x2] %vm8_vm0, %v210_v17  }
  0x9e   :  { %841 = vst.msk [vmem:[%s2191_s1 + $0x8f] sm:$0x4] %vm8_vm0, %v210_v17   ;;  %842 = vst.msk [vmem:[%s2191_s1 + $0xce] sm:$0x8] %vm8_vm0, %v210_v17  }
  0x9f   :  { %843 = vst.msk [vmem:[%s2191_s1 + $0x12] sm:$0x1] %vm8_vm0, %v222_v18   ;;  %844 = vst.msk [vmem:[%s2191_s1 + $0x51] sm:$0x2] %vm8_vm0, %v222_v18  }
  0xa0   :  { %845 = vst.msk [vmem:[%s2191_s1 + $0x90] sm:$0x4] %vm8_vm0, %v222_v18   ;;  %846 = vst.msk [vmem:[%s2191_s1 + $0xcf] sm:$0x8] %vm8_vm0, %v222_v18   ;;  %v234_v19 = vpop.permute.xlu0 %233  }
  0xa1   :  { %v246_v20 = vpop.permute.xlu1 %245   ;;  %847 = vst.msk [vmem:[%s2191_s1 + $0x13] sm:$0x1] %vm8_vm0, %v234_v19   ;;  %848 = vst.msk [vmem:[%s2191_s1 + $0x52] sm:$0x2] %vm8_vm0, %v234_v19  }
  0xa2   :  { %849 = vst.msk [vmem:[%s2191_s1 + $0x91] sm:$0x4] %vm8_vm0, %v234_v19   ;;  %850 = vst.msk [vmem:[%s2191_s1 + $0xd0] sm:$0x8] %vm8_vm0, %v234_v19  }
  0xa3   :  { %851 = vst.msk [vmem:[%s2191_s1 + $0x14] sm:$0x1] %vm8_vm0, %v246_v20   ;;  %852 = vst.msk [vmem:[%s2191_s1 + $0x53] sm:$0x2] %vm8_vm0, %v246_v20  }
  0xa4   :  { %853 = vst.msk [vmem:[%s2191_s1 + $0x92] sm:$0x4] %vm8_vm0, %v246_v20   ;;  %854 = vst.msk [vmem:[%s2191_s1 + $0xd1] sm:$0x8] %vm8_vm0, %v246_v20   ;;  %v258_v21 = vpop.permute.xlu0 %257  }
  0xa5   :  { %v270_v22 = vpop.permute.xlu1 %269   ;;  %855 = vst.msk [vmem:[%s2191_s1 + $0x15] sm:$0x1] %vm8_vm0, %v258_v21   ;;  %856 = vst.msk [vmem:[%s2191_s1 + $0x54] sm:$0x2] %vm8_vm0, %v258_v21  }
  0xa6   :  { %857 = vst.msk [vmem:[%s2191_s1 + $0x93] sm:$0x4] %vm8_vm0, %v258_v21   ;;  %858 = vst.msk [vmem:[%s2191_s1 + $0xd2] sm:$0x8] %vm8_vm0, %v258_v21  }
  0xa7   :  { %859 = vst.msk [vmem:[%s2191_s1 + $0x16] sm:$0x1] %vm8_vm0, %v270_v22   ;;  %860 = vst.msk [vmem:[%s2191_s1 + $0x55] sm:$0x2] %vm8_vm0, %v270_v22  }
  0xa8   :  { %861 = vst.msk [vmem:[%s2191_s1 + $0x94] sm:$0x4] %vm8_vm0, %v270_v22   ;;  %862 = vst.msk [vmem:[%s2191_s1 + $0xd3] sm:$0x8] %vm8_vm0, %v270_v22   ;;  %v282_v23 = vpop.permute.xlu0 %281  }
  0xa9   :  { %v294_v24 = vpop.permute.xlu1 %293   ;;  %863 = vst.msk [vmem:[%s2191_s1 + $0x17] sm:$0x1] %vm8_vm0, %v282_v23   ;;  %864 = vst.msk [vmem:[%s2191_s1 + $0x56] sm:$0x2] %vm8_vm0, %v282_v23  }
  0xaa   :  { %865 = vst.msk [vmem:[%s2191_s1 + $0x95] sm:$0x4] %vm8_vm0, %v282_v23   ;;  %866 = vst.msk [vmem:[%s2191_s1 + $0xd4] sm:$0x8] %vm8_vm0, %v282_v23  }
  0xab   :  { %867 = vst.msk [vmem:[%s2191_s1 + $0x18] sm:$0x1] %vm8_vm0, %v294_v24   ;;  %868 = vst.msk [vmem:[%s2191_s1 + $0x57] sm:$0x2] %vm8_vm0, %v294_v24  }
  0xac   :  { %869 = vst.msk [vmem:[%s2191_s1 + $0x96] sm:$0x4] %vm8_vm0, %v294_v24   ;;  %870 = vst.msk [vmem:[%s2191_s1 + $0xd5] sm:$0x8] %vm8_vm0, %v294_v24   ;;  %v306_v25 = vpop.permute.xlu0 %305  }
  0xad   :  { %v318_v26 = vpop.permute.xlu1 %317   ;;  %871 = vst.msk [vmem:[%s2191_s1 + $0x19] sm:$0x1] %vm8_vm0, %v306_v25   ;;  %872 = vst.msk [vmem:[%s2191_s1 + $0x58] sm:$0x2] %vm8_vm0, %v306_v25  }
  0xae   :  { %873 = vst.msk [vmem:[%s2191_s1 + $0x97] sm:$0x4] %vm8_vm0, %v306_v25   ;;  %874 = vst.msk [vmem:[%s2191_s1 + $0xd6] sm:$0x8] %vm8_vm0, %v306_v25  }
  0xaf   :  { %875 = vst.msk [vmem:[%s2191_s1 + $0x1a] sm:$0x1] %vm8_vm0, %v318_v26   ;;  %876 = vst.msk [vmem:[%s2191_s1 + $0x59] sm:$0x2] %vm8_vm0, %v318_v26  }
  0xb0   :  { %877 = vst.msk [vmem:[%s2191_s1 + $0x98] sm:$0x4] %vm8_vm0, %v318_v26   ;;  %878 = vst.msk [vmem:[%s2191_s1 + $0xd7] sm:$0x8] %vm8_vm0, %v318_v26   ;;  %v330_v27 = vpop.permute.xlu0 %329  }
  0xb1   :  { %v342_v28 = vpop.permute.xlu1 %341   ;;  %879 = vst.msk [vmem:[%s2191_s1 + $0x1b] sm:$0x1] %vm8_vm0, %v330_v27   ;;  %880 = vst.msk [vmem:[%s2191_s1 + $0x5a] sm:$0x2] %vm8_vm0, %v330_v27  }
  0xb2   :  { %881 = vst.msk [vmem:[%s2191_s1 + $0x99] sm:$0x4] %vm8_vm0, %v330_v27   ;;  %882 = vst.msk [vmem:[%s2191_s1 + $0xd8] sm:$0x8] %vm8_vm0, %v330_v27  }
  0xb3   :  { %883 = vst.msk [vmem:[%s2191_s1 + $0x1c] sm:$0x1] %vm8_vm0, %v342_v28   ;;  %884 = vst.msk [vmem:[%s2191_s1 + $0x5b] sm:$0x2] %vm8_vm0, %v342_v28  }
  0xb4   :  { %885 = vst.msk [vmem:[%s2191_s1 + $0x9a] sm:$0x4] %vm8_vm0, %v342_v28   ;;  %886 = vst.msk [vmem:[%s2191_s1 + $0xd9] sm:$0x8] %vm8_vm0, %v342_v28   ;;  %v354_v29 = vpop.permute.xlu0 %353  }
  0xb5   :  { %v366_v30 = vpop.permute.xlu1 %365   ;;  %887 = vst.msk [vmem:[%s2191_s1 + $0x1d] sm:$0x1] %vm8_vm0, %v354_v29   ;;  %888 = vst.msk [vmem:[%s2191_s1 + $0x5c] sm:$0x2] %vm8_vm0, %v354_v29  }
  0xb6   :  { %889 = vst.msk [vmem:[%s2191_s1 + $0x9b] sm:$0x4] %vm8_vm0, %v354_v29   ;;  %890 = vst.msk [vmem:[%s2191_s1 + $0xda] sm:$0x8] %vm8_vm0, %v354_v29  }
  0xb7   :  { %891 = vst.msk [vmem:[%s2191_s1 + $0x1e] sm:$0x1] %vm8_vm0, %v366_v30   ;;  %892 = vst.msk [vmem:[%s2191_s1 + $0x5d] sm:$0x2] %vm8_vm0, %v366_v30  }
  0xb8   :  { %893 = vst.msk [vmem:[%s2191_s1 + $0x9c] sm:$0x4] %vm8_vm0, %v366_v30   ;;  %894 = vst.msk [vmem:[%s2191_s1 + $0xdb] sm:$0x8] %vm8_vm0, %v366_v30   ;;  %v378_v31 = vpop.permute.xlu0 %377  }
  0xb9   :  { %v390_v32 = vpop.permute.xlu1 %389   ;;  %895 = vst.msk [vmem:[%s2191_s1 + $0x1f] sm:$0x1] %vm8_vm0, %v378_v31   ;;  %896 = vst.msk [vmem:[%s2191_s1 + $0x5e] sm:$0x2] %vm8_vm0, %v378_v31  }
  0xba   :  { %897 = vst.msk [vmem:[%s2191_s1 + $0x9d] sm:$0x4] %vm8_vm0, %v378_v31   ;;  %898 = vst.msk [vmem:[%s2191_s1 + $0xdc] sm:$0x8] %vm8_vm0, %v378_v31  }
  0xbb   :  { %899 = vst.msk [vmem:[%s2191_s1 + $0x20] sm:$0x1] %vm8_vm0, %v390_v32   ;;  %900 = vst.msk [vmem:[%s2191_s1 + $0x5f] sm:$0x2] %vm8_vm0, %v390_v32  }
  0xbc   :  { %901 = vst.msk [vmem:[%s2191_s1 + $0x9e] sm:$0x4] %vm8_vm0, %v390_v32   ;;  %902 = vst.msk [vmem:[%s2191_s1 + $0xdd] sm:$0x8] %vm8_vm0, %v390_v32   ;;  %v402_v33 = vpop.permute.xlu0 %401  }
  0xbd   :  { %v414_v34 = vpop.permute.xlu1 %413   ;;  %903 = vst.msk [vmem:[%s2191_s1 + $0x21] sm:$0x1] %vm8_vm0, %v402_v33   ;;  %904 = vst.msk [vmem:[%s2191_s1 + $0x60] sm:$0x2] %vm8_vm0, %v402_v33  }
  0xbe   :  { %905 = vst.msk [vmem:[%s2191_s1 + $0x9f] sm:$0x4] %vm8_vm0, %v402_v33   ;;  %906 = vst.msk [vmem:[%s2191_s1 + $0xde] sm:$0x8] %vm8_vm0, %v402_v33  }
  0xbf   :  { %907 = vst.msk [vmem:[%s2191_s1 + $0x22] sm:$0x1] %vm8_vm0, %v414_v34   ;;  %908 = vst.msk [vmem:[%s2191_s1 + $0x61] sm:$0x2] %vm8_vm0, %v414_v34  }
  0xc0   :  { %909 = vst.msk [vmem:[%s2191_s1 + $0xa0] sm:$0x4] %vm8_vm0, %v414_v34   ;;  %910 = vst.msk [vmem:[%s2191_s1 + $0xdf] sm:$0x8] %vm8_vm0, %v414_v34   ;;  %v426_v35 = vpop.permute.xlu0 %425  }
  0xc1   :  { %v438_v36 = vpop.permute.xlu1 %437   ;;  %911 = vst.msk [vmem:[%s2191_s1 + $0x23] sm:$0x1] %vm8_vm0, %v426_v35   ;;  %912 = vst.msk [vmem:[%s2191_s1 + $0x62] sm:$0x2] %vm8_vm0, %v426_v35  }
  0xc2   :  { %913 = vst.msk [vmem:[%s2191_s1 + $0xa1] sm:$0x4] %vm8_vm0, %v426_v35   ;;  %914 = vst.msk [vmem:[%s2191_s1 + $0xe0] sm:$0x8] %vm8_vm0, %v426_v35  }
  0xc3   :  { %915 = vst.msk [vmem:[%s2191_s1 + $0x24] sm:$0x1] %vm8_vm0, %v438_v36   ;;  %916 = vst.msk [vmem:[%s2191_s1 + $0x63] sm:$0x2] %vm8_vm0, %v438_v36  }
  0xc4   :  { %917 = vst.msk [vmem:[%s2191_s1 + $0xa2] sm:$0x4] %vm8_vm0, %v438_v36   ;;  %918 = vst.msk [vmem:[%s2191_s1 + $0xe1] sm:$0x8] %vm8_vm0, %v438_v36   ;;  %v450_v37 = vpop.permute.xlu0 %449  }
  0xc5   :  { %v462_v38 = vpop.permute.xlu1 %461   ;;  %919 = vst.msk [vmem:[%s2191_s1 + $0x25] sm:$0x1] %vm8_vm0, %v450_v37   ;;  %920 = vst.msk [vmem:[%s2191_s1 + $0x64] sm:$0x2] %vm8_vm0, %v450_v37  }
  0xc6   :  { %921 = vst.msk [vmem:[%s2191_s1 + $0xa3] sm:$0x4] %vm8_vm0, %v450_v37   ;;  %922 = vst.msk [vmem:[%s2191_s1 + $0xe2] sm:$0x8] %vm8_vm0, %v450_v37  }
  0xc7   :  { %923 = vst.msk [vmem:[%s2191_s1 + $0x26] sm:$0x1] %vm8_vm0, %v462_v38   ;;  %924 = vst.msk [vmem:[%s2191_s1 + $0x65] sm:$0x2] %vm8_vm0, %v462_v38  }
  0xc8   :  { %925 = vst.msk [vmem:[%s2191_s1 + $0xa4] sm:$0x4] %vm8_vm0, %v462_v38   ;;  %926 = vst.msk [vmem:[%s2191_s1 + $0xe3] sm:$0x8] %vm8_vm0, %v462_v38   ;;  %v474_v39 = vpop.permute.xlu0 %473  }
  0xc9   :  { %v486_v40 = vpop.permute.xlu1 %485   ;;  %927 = vst.msk [vmem:[%s2191_s1 + $0x27] sm:$0x1] %vm8_vm0, %v474_v39   ;;  %928 = vst.msk [vmem:[%s2191_s1 + $0x66] sm:$0x2] %vm8_vm0, %v474_v39  }
  0xca   :  { %929 = vst.msk [vmem:[%s2191_s1 + $0xa5] sm:$0x4] %vm8_vm0, %v474_v39   ;;  %930 = vst.msk [vmem:[%s2191_s1 + $0xe4] sm:$0x8] %vm8_vm0, %v474_v39  }
  0xcb   :  { %931 = vst.msk [vmem:[%s2191_s1 + $0x28] sm:$0x1] %vm8_vm0, %v486_v40   ;;  %932 = vst.msk [vmem:[%s2191_s1 + $0x67] sm:$0x2] %vm8_vm0, %v486_v40  }
  0xcc   :  { %933 = vst.msk [vmem:[%s2191_s1 + $0xa6] sm:$0x4] %vm8_vm0, %v486_v40   ;;  %934 = vst.msk [vmem:[%s2191_s1 + $0xe5] sm:$0x8] %vm8_vm0, %v486_v40   ;;  %v498_v41 = vpop.permute.xlu0 %497  }
  0xcd   :  { %v510_v42 = vpop.permute.xlu1 %509   ;;  %935 = vst.msk [vmem:[%s2191_s1 + $0x29] sm:$0x1] %vm8_vm0, %v498_v41   ;;  %936 = vst.msk [vmem:[%s2191_s1 + $0x68] sm:$0x2] %vm8_vm0, %v498_v41  }
  0xce   :  { %937 = vst.msk [vmem:[%s2191_s1 + $0xa7] sm:$0x4] %vm8_vm0, %v498_v41   ;;  %938 = vst.msk [vmem:[%s2191_s1 + $0xe6] sm:$0x8] %vm8_vm0, %v498_v41  }
  0xcf   :  { %939 = vst.msk [vmem:[%s2191_s1 + $0x2a] sm:$0x1] %vm8_vm0, %v510_v42   ;;  %940 = vst.msk [vmem:[%s2191_s1 + $0x69] sm:$0x2] %vm8_vm0, %v510_v42  }
  0xd0   :  { %941 = vst.msk [vmem:[%s2191_s1 + $0xa8] sm:$0x4] %vm8_vm0, %v510_v42   ;;  %942 = vst.msk [vmem:[%s2191_s1 + $0xe7] sm:$0x8] %vm8_vm0, %v510_v42   ;;  %v522_v43 = vpop.permute.xlu0 %521  }
  0xd1   :  { %v534_v44 = vpop.permute.xlu1 %533   ;;  %943 = vst.msk [vmem:[%s2191_s1 + $0x2b] sm:$0x1] %vm8_vm0, %v522_v43   ;;  %944 = vst.msk [vmem:[%s2191_s1 + $0x6a] sm:$0x2] %vm8_vm0, %v522_v43  }
  0xd2   :  { %945 = vst.msk [vmem:[%s2191_s1 + $0xa9] sm:$0x4] %vm8_vm0, %v522_v43   ;;  %946 = vst.msk [vmem:[%s2191_s1 + $0xe8] sm:$0x8] %vm8_vm0, %v522_v43  }
  0xd3   :  { %947 = vst.msk [vmem:[%s2191_s1 + $0x2c] sm:$0x1] %vm8_vm0, %v534_v44   ;;  %948 = vst.msk [vmem:[%s2191_s1 + $0x6b] sm:$0x2] %vm8_vm0, %v534_v44  }
  0xd4   :  { %949 = vst.msk [vmem:[%s2191_s1 + $0xaa] sm:$0x4] %vm8_vm0, %v534_v44   ;;  %950 = vst.msk [vmem:[%s2191_s1 + $0xe9] sm:$0x8] %vm8_vm0, %v534_v44   ;;  %v546_v45 = vpop.permute.xlu0 %545  }
  0xd5   :  { %v558_v46 = vpop.permute.xlu1 %557   ;;  %951 = vst.msk [vmem:[%s2191_s1 + $0x2d] sm:$0x1] %vm8_vm0, %v546_v45   ;;  %952 = vst.msk [vmem:[%s2191_s1 + $0x6c] sm:$0x2] %vm8_vm0, %v546_v45  }
  0xd6   :  { %953 = vst.msk [vmem:[%s2191_s1 + $0xab] sm:$0x4] %vm8_vm0, %v546_v45   ;;  %954 = vst.msk [vmem:[%s2191_s1 + $0xea] sm:$0x8] %vm8_vm0, %v546_v45  }
  0xd7   :  { %955 = vst.msk [vmem:[%s2191_s1 + $0x2e] sm:$0x1] %vm8_vm0, %v558_v46   ;;  %956 = vst.msk [vmem:[%s2191_s1 + $0x6d] sm:$0x2] %vm8_vm0, %v558_v46  }
  0xd8   :  { %957 = vst.msk [vmem:[%s2191_s1 + $0xac] sm:$0x4] %vm8_vm0, %v558_v46   ;;  %958 = vst.msk [vmem:[%s2191_s1 + $0xeb] sm:$0x8] %vm8_vm0, %v558_v46   ;;  %v570_v47 = vpop.permute.xlu0 %569  }
  0xd9   :  { %v582_v48 = vpop.permute.xlu1 %581   ;;  %959 = vst.msk [vmem:[%s2191_s1 + $0x2f] sm:$0x1] %vm8_vm0, %v570_v47   ;;  %960 = vst.msk [vmem:[%s2191_s1 + $0x6e] sm:$0x2] %vm8_vm0, %v570_v47  }
  0xda   :  { %961 = vst.msk [vmem:[%s2191_s1 + $0xad] sm:$0x4] %vm8_vm0, %v570_v47   ;;  %962 = vst.msk [vmem:[%s2191_s1 + $0xec] sm:$0x8] %vm8_vm0, %v570_v47  }
  0xdb   :  { %963 = vst.msk [vmem:[%s2191_s1 + $0x30] sm:$0x1] %vm8_vm0, %v582_v48   ;;  %964 = vst.msk [vmem:[%s2191_s1 + $0x6f] sm:$0x2] %vm8_vm0, %v582_v48  }
  0xdc   :  { %965 = vst.msk [vmem:[%s2191_s1 + $0xae] sm:$0x4] %vm8_vm0, %v582_v48   ;;  %966 = vst.msk [vmem:[%s2191_s1 + $0xed] sm:$0x8] %vm8_vm0, %v582_v48   ;;  %v594_v49 = vpop.permute.xlu0 %593  }
  0xdd   :  { %v606_v50 = vpop.permute.xlu1 %605   ;;  %967 = vst.msk [vmem:[%s2191_s1 + $0x31] sm:$0x1] %vm8_vm0, %v594_v49   ;;  %968 = vst.msk [vmem:[%s2191_s1 + $0x70] sm:$0x2] %vm8_vm0, %v594_v49  }
  0xde   :  { %969 = vst.msk [vmem:[%s2191_s1 + $0xaf] sm:$0x4] %vm8_vm0, %v594_v49   ;;  %970 = vst.msk [vmem:[%s2191_s1 + $0xee] sm:$0x8] %vm8_vm0, %v594_v49  }
  0xdf   :  { %971 = vst.msk [vmem:[%s2191_s1 + $0x32] sm:$0x1] %vm8_vm0, %v606_v50   ;;  %972 = vst.msk [vmem:[%s2191_s1 + $0x71] sm:$0x2] %vm8_vm0, %v606_v50  }
  0xe0   :  { %973 = vst.msk [vmem:[%s2191_s1 + $0xb0] sm:$0x4] %vm8_vm0, %v606_v50   ;;  %974 = vst.msk [vmem:[%s2191_s1 + $0xef] sm:$0x8] %vm8_vm0, %v606_v50   ;;  %v618_v51 = vpop.permute.xlu0 %617  }
  0xe1   :  { %v630_v52 = vpop.permute.xlu1 %629   ;;  %975 = vst.msk [vmem:[%s2191_s1 + $0x33] sm:$0x1] %vm8_vm0, %v618_v51   ;;  %976 = vst.msk [vmem:[%s2191_s1 + $0x72] sm:$0x2] %vm8_vm0, %v618_v51  }
  0xe2   :  { %977 = vst.msk [vmem:[%s2191_s1 + $0xb1] sm:$0x4] %vm8_vm0, %v618_v51   ;;  %978 = vst.msk [vmem:[%s2191_s1 + $0xf0] sm:$0x8] %vm8_vm0, %v618_v51  }
  0xe3   :  { %979 = vst.msk [vmem:[%s2191_s1 + $0x34] sm:$0x1] %vm8_vm0, %v630_v52   ;;  %980 = vst.msk [vmem:[%s2191_s1 + $0x73] sm:$0x2] %vm8_vm0, %v630_v52  }
  0xe4   :  { %981 = vst.msk [vmem:[%s2191_s1 + $0xb2] sm:$0x4] %vm8_vm0, %v630_v52   ;;  %982 = vst.msk [vmem:[%s2191_s1 + $0xf1] sm:$0x8] %vm8_vm0, %v630_v52   ;;  %v642_v53 = vpop.permute.xlu0 %641  }
  0xe5   :  { %v654_v54 = vpop.permute.xlu1 %653   ;;  %983 = vst.msk [vmem:[%s2191_s1 + $0x35] sm:$0x1] %vm8_vm0, %v642_v53   ;;  %984 = vst.msk [vmem:[%s2191_s1 + $0x74] sm:$0x2] %vm8_vm0, %v642_v53  }
  0xe6   :  { %985 = vst.msk [vmem:[%s2191_s1 + $0xb3] sm:$0x4] %vm8_vm0, %v642_v53   ;;  %986 = vst.msk [vmem:[%s2191_s1 + $0xf2] sm:$0x8] %vm8_vm0, %v642_v53  }
  0xe7   :  { %987 = vst.msk [vmem:[%s2191_s1 + $0x36] sm:$0x1] %vm8_vm0, %v654_v54   ;;  %988 = vst.msk [vmem:[%s2191_s1 + $0x75] sm:$0x2] %vm8_vm0, %v654_v54  }
  0xe8   :  { %989 = vst.msk [vmem:[%s2191_s1 + $0xb4] sm:$0x4] %vm8_vm0, %v654_v54   ;;  %990 = vst.msk [vmem:[%s2191_s1 + $0xf3] sm:$0x8] %vm8_vm0, %v654_v54   ;;  %v666_v55 = vpop.permute.xlu0 %665  }
  0xe9   :  { %v678_v56 = vpop.permute.xlu1 %677   ;;  %991 = vst.msk [vmem:[%s2191_s1 + $0x37] sm:$0x1] %vm8_vm0, %v666_v55   ;;  %992 = vst.msk [vmem:[%s2191_s1 + $0x76] sm:$0x2] %vm8_vm0, %v666_v55  }
  0xea   :  { %993 = vst.msk [vmem:[%s2191_s1 + $0xb5] sm:$0x4] %vm8_vm0, %v666_v55   ;;  %994 = vst.msk [vmem:[%s2191_s1 + $0xf4] sm:$0x8] %vm8_vm0, %v666_v55  }
  0xeb   :  { %995 = vst.msk [vmem:[%s2191_s1 + $0x38] sm:$0x1] %vm8_vm0, %v678_v56   ;;  %996 = vst.msk [vmem:[%s2191_s1 + $0x77] sm:$0x2] %vm8_vm0, %v678_v56  }
  0xec   :  { %997 = vst.msk [vmem:[%s2191_s1 + $0xb6] sm:$0x4] %vm8_vm0, %v678_v56   ;;  %998 = vst.msk [vmem:[%s2191_s1 + $0xf5] sm:$0x8] %vm8_vm0, %v678_v56   ;;  %v690_v57 = vpop.permute.xlu0 %689  }
  0xed   :  { %v702_v58 = vpop.permute.xlu1 %701   ;;  %999 = vst.msk [vmem:[%s2191_s1 + $0x39] sm:$0x1] %vm8_vm0, %v690_v57   ;;  %1000 = vst.msk [vmem:[%s2191_s1 + $0x78] sm:$0x2] %vm8_vm0, %v690_v57  }
  0xee   :  { %1001 = vst.msk [vmem:[%s2191_s1 + $0xb7] sm:$0x4] %vm8_vm0, %v690_v57   ;;  %1002 = vst.msk [vmem:[%s2191_s1 + $0xf6] sm:$0x8] %vm8_vm0, %v690_v57  }
  0xef   :  { %1003 = vst.msk [vmem:[%s2191_s1 + $0x3a] sm:$0x1] %vm8_vm0, %v702_v58   ;;  %1004 = vst.msk [vmem:[%s2191_s1 + $0x79] sm:$0x2] %vm8_vm0, %v702_v58  }
  0xf0   :  { %1005 = vst.msk [vmem:[%s2191_s1 + $0xb8] sm:$0x4] %vm8_vm0, %v702_v58   ;;  %1006 = vst.msk [vmem:[%s2191_s1 + $0xf7] sm:$0x8] %vm8_vm0, %v702_v58   ;;  %v714_v59 = vpop.permute.xlu0 %713  }
  0xf1   :  { %v726_v60 = vpop.permute.xlu1 %725   ;;  %1007 = vst.msk [vmem:[%s2191_s1 + $0x3b] sm:$0x1] %vm8_vm0, %v714_v59   ;;  %1008 = vst.msk [vmem:[%s2191_s1 + $0x7a] sm:$0x2] %vm8_vm0, %v714_v59  }
  0xf2   :  { %1009 = vst.msk [vmem:[%s2191_s1 + $0xb9] sm:$0x4] %vm8_vm0, %v714_v59   ;;  %1010 = vst.msk [vmem:[%s2191_s1 + $0xf8] sm:$0x8] %vm8_vm0, %v714_v59  }
  0xf3   :  { %1011 = vst.msk [vmem:[%s2191_s1 + $0x3c] sm:$0x1] %vm8_vm0, %v726_v60   ;;  %1012 = vst.msk [vmem:[%s2191_s1 + $0x7b] sm:$0x2] %vm8_vm0, %v726_v60  }
  0xf4   :  { %1013 = vst.msk [vmem:[%s2191_s1 + $0xba] sm:$0x4] %vm8_vm0, %v726_v60   ;;  %1014 = vst.msk [vmem:[%s2191_s1 + $0xf9] sm:$0x8] %vm8_vm0, %v726_v60   ;;  %v738_v61 = vpop.permute.xlu0 %737  }
  0xf5   :  { %v750_v62 = vpop.permute.xlu1 %749   ;;  %1015 = vst.msk [vmem:[%s2191_s1 + $0x3d] sm:$0x1] %vm8_vm0, %v738_v61   ;;  %1016 = vst.msk [vmem:[%s2191_s1 + $0x7c] sm:$0x2] %vm8_vm0, %v738_v61  }
  0xf6   :  { %1017 = vst.msk [vmem:[%s2191_s1 + $0xbb] sm:$0x4] %vm8_vm0, %v738_v61   ;;  %1018 = vst.msk [vmem:[%s2191_s1 + $0xfa] sm:$0x8] %vm8_vm0, %v738_v61  }
  0xf7   :  { %1019 = vst.msk [vmem:[%s2191_s1 + $0x3e] sm:$0x1] %vm8_vm0, %v750_v62   ;;  %1020 = vst.msk [vmem:[%s2191_s1 + $0x7d] sm:$0x2] %vm8_vm0, %v750_v62  }
  0xf8   :  { %1021 = vst.msk [vmem:[%s2191_s1 + $0xbc] sm:$0x4] %vm8_vm0, %v750_v62   ;;  %1022 = vst.msk [vmem:[%s2191_s1 + $0xfb] sm:$0x8] %vm8_vm0, %v750_v62   ;;  %v762_v63 = vpop.permute.xlu0 %761  }
  0xf9   :  { %1023 = vst.msk [vmem:[%s2191_s1 + $0x3f] sm:$0x1] %vm8_vm0, %v762_v63   ;;  %1024 = vst.msk [vmem:[%s2191_s1 + $0x7e] sm:$0x2] %vm8_vm0, %v762_v63  }
  0xfa   :  { %1025 = vst.msk [vmem:[%s2191_s1 + $0xbd] sm:$0x4] %vm8_vm0, %v762_v63   ;;  %1026 = vst.msk [vmem:[%s2191_s1 + $0xfc] sm:$0x8] %vm8_vm0, %v762_v63  }

// kernel: tile.18
= control target key start
LH: loop header
LB: loop body
LE: loop exit
PB: predicated region body
PF: predicated region fallthrough
CT: control target
= control target key end

     0   :  { %s22_s0 = inlined_call_operand.vmem [shape: f32[3], index: 0, kind: input, shape index: {}]   ;;  %s23_s1 = inlined_call_operand.vmem [shape: f32[4,3], index: 1, kind: output, shape index: {}]  }
   0x1   :  { %v4_v0 = vld [vmem:[%s22_s0] ss:$0 sm:$0xff] }
   0x2   :  { %5 = vst [vmem:[%s23_s1] sm:$0xf] %v4_v0 }

// kernel: tile.1
= control target key start
LH: loop header
LB: loop body
LE: loop exit
PB: predicated region body
PF: predicated region fallthrough
CT: control target
= control target key end

     0   :  { %vm8_vm0 = vcmask 7168   ;;  %s27_s10 = smov 126   ;;  %s50_s0 = inlined_call_operand.vmem [shape: f32[4,3], index: 0, kind: input, shape index: {}]   ;;  %s51_s1 = inlined_call_operand.vmem [shape: f32[12,1], index: 1, kind: output, shape index: {}]  }
   0x1   :  { %v5_v0 = vld [vmem:[%s50_s0] sm:$0xf]  ;;  %s26_s0 = smov 127  }
   0x2   :  { %6 = vst [vmem:[#allocation0] sm:$0xf] %v5_v0 }
   0x9   :  { %v10_v1 = vld [vmem:[#allocation0] sm:$0xf]  }
   0xa   :  { %v7_v2 = vld [vmem:[#allocation0] sm:$0xf]   ;;  %11 = vrot.lane.b32.xlu0 %v10_v1, %s26_s0 }
   0xb   :  { %9 = vst.msk [vmem:[%s51_s1] ss:$3 sm:$0xf] %vm8_vm0, %v7_v2   ;;  %v16_v3 = vld [vmem:[#allocation0] sm:$0xf]  }
   0xe   :  { %17 = vrot.lane.b32.xlu0 %v16_v3, %s27_s10 }
  0x7c   :  { %v12_v4 = vpop.permute.xlu0 %11  }
  0x7d   :  { %22 = vst.msk [vmem:[%s51_s1 + $0x1] ss:$3 sm:$0xf] %vm8_vm0, %v12_v4  }
  0x80   :  { %v18_v5 = vpop.permute.xlu0 %17  }
  0x81   :  { %23 = vst.msk [vmem:[%s51_s1 + $0x2] ss:$3 sm:$0xf] %vm8_vm0, %v18_v5  }

// kernel: qnetwork_forward.1
= control target key start
LH: loop header
LB: loop body
LE: loop exit
PB: predicated region body
PF: predicated region fallthrough
CT: control target
= control target key end

     0   :  { %v2796_v0 = vmov 2   ;;  %v2792_v1 = vmov 1   ;;  %v2794_v7 = vmov 0   ;;  %v85_v50 = vlaneseq  ;;  %s2784_s1 = inlined_call_operand.vmem [shape: f32[64,3], index: 1, kind: input, shape index: {}]   ;;  %s2785_s2 = inlined_call_operand.vmem [shape: f32[64,1], index: 2, kind: input, shape index: {}]   ;;  %s2786_s5 = inlined_call_operand.vmem [shape: f32[64,3], index: 5, kind: input, shape index: {}]   ;;  %s2787_s4 = inlined_call_operand.vmem [shape: f32[256,1], index: 4, kind: input, shape index: {}]   ;;  %s2788_s3 = inlined_call_operand.vmem [shape: bf16[256,256], index: 3, kind: input, shape index: {}]   ;;  %s2789_s0 = inlined_call_operand.vmem [shape: f32[12,128], index: 0, kind: input, shape index: {}]   ;;  %s2790_s6 = inlined_call_operand.vmem [shape: f32[12,1], index: 6, kind: input, shape index: {}]   ;;  %s2791_s7 = inlined_call_operand.vmem [shape: f32[12,128], index: 7, kind: output, shape index: {}]  }
   0x1   :  { %1622 = vset.pattern.permute.xlu0 %v2796_v0  ;;  %1621 = vset.pattern.permute.xlu1 %v2792_v1  ;;  %v35_v2 = vld [vmem:[%s2784_s1 + $0x30] sm:$0xff]  ;;  %v36_v3 = vld [vmem:[%s2784_s1 + $0x38] sm:$0xff]  ;;  %v33_v4 = vld [vmem:[%s2784_s1 + $0x20] sm:$0xff] }
   0x2   :  { %174 = vperm.xlu0 %1622, %v35_v2   ;;  %122 = vperm.xlu1 %1621, %v35_v2   ;;  %v32_v5 = vld [vmem:[%s2784_s1 + $0x18] sm:$0xff]  ;;  %v31_v6 = vld [vmem:[%s2784_s1 + $0x10] sm:$0xff]  ;;  %v30_v8 = vld [vmem:[%s2784_s1 + $0x8] sm:$0xff]  ;;  %v86_v55 = vshrl.u32 %v85_v50, 7 }
   0x3   :  { %v34_v9 = vld [vmem:[%s2784_s1 + $0x28] sm:$0xff]  ;;  %v43_v10 = vld [vmem:[%s2785_s2 + $0x30] sm:$0xff]  ;;  %v44_v11 = vld [vmem:[%s2785_s2 + $0x38] sm:$0xff] }
   0x4   :  { %v29_v12 = vld [vmem:[%s2784_s1] sm:$0xff]  ;;  %v39_v13 = vld [vmem:[%s2785_s2 + $0x10] sm:$0xff]  ;;  %v38_v14 = vld [vmem:[%s2785_s2 + $0x8] sm:$0xff]  ;;  %v327_v57 = vsub.s32 6, %v86_v55  ;;  %v131_v60 = vsub.s32 1, %v86_v55  ;;  %v339_v61 = vsub.s32 7, %v86_v55 }
   0x5   :  { %v1796_v15 = vld [vmem:[%s2786_s5] sm:$0xff]  ;;  %v42_v17 = vld [vmem:[%s2785_s2 + $0x28] sm:$0xff]  ;;  %v40_v19 = vld [vmem:[%s2785_s2 + $0x18] sm:$0xff]  ;;  %v87_v62 = vsub.s32 0, %v86_v55 }
   0x6   :  { %126 = vperm.xlu1 %1621, %v36_v3   ;;  %166 = vperm.xlu0 %1622, %v33_v4   ;;  %v41_v16 = vld [vmem:[%s2785_s2 + $0x20] sm:$0xff]  ;;  %v510_v18 = vld [vmem:[%s2787_s4 + $0x8] sm:$0xff]  ;;  %v512_v20 = vld [vmem:[%s2787_s4 + $0x18] sm:$0xff] }
   0x7   :  { %v37_v21 = vld [vmem:[%s2785_s2] sm:$0xff]  ;;  %v514_v22 = vld [vmem:[%s2787_s4 + $0x28] sm:$0xff]  ;;  %v511_v24 = vld [vmem:[%s2787_s4 + $0x10] sm:$0xff] }
   0x8   :  { %v509_v23 = vld [vmem:[%s2787_s4] sm:$0xff]  ;;  %v516_v25 = vld [vmem:[%s2787_s4 + $0x38] sm:$0xff]  ;;  %v518_v27 = vld [vmem:[%s2787_s4 + $0x48] sm:$0xff] }
   0x9   :  { %v513_v26 = vld [vmem:[%s2787_s4 + $0x20] sm:$0xff]  ;;  %v515_v28 = vld [vmem:[%s2787_s4 + $0x30] sm:$0xff]  ;;  %v520_v29 = vld [vmem:[%s2787_s4 + $0x58] sm:$0xff] }
   0xa   :  { %1623 = vset.pattern.permute.xlu1 %v2796_v0  ;;  %162 = vperm.xlu0 %1622, %v32_v5   ;;  %v517_v30 = vld [vmem:[%s2787_s4 + $0x40] sm:$0xff]  ;;  %v522_v31 = vld [vmem:[%s2787_s4 + $0x68] sm:$0xff]  ;;  %v524_v32 = vld [vmem:[%s2787_s4 + $0x78] sm:$0xff] }
   0xb   :  { %178 = vperm.xlu1 %1623, %v36_v3   ;;  %v519_v33 = vld [vmem:[%s2787_s4 + $0x50] sm:$0xff]  ;;  %v1657_v34 = vld [vmem:[%s2788_s3 + $0x4] ss:$8 sps:$4 sm:$0xff]   ;;  %v528_v38 = vld [vmem:[%s2787_s4 + $0x98] sm:$0xff] }
   0xc   :  { %v521_v35 = vld [vmem:[%s2787_s4 + $0x60] sm:$0xff]  ;;  %v526_v37 = vld [vmem:[%s2787_s4 + $0x88] sm:$0xff]  ;;  %893 = vmatprep.mubr.bf16.mxu0 %v1657_v34  ;;  %v523_v39 = vld [vmem:[%s2787_s4 + $0x70] sm:$0xff] }
   0xd   :  { %v1660_v36 = vld [vmem:[%s2788_s3 + $0x84] ss:$8 sps:$4 sm:$0xff]   ;;  %v532_v42 = vld [vmem:[%s2787_s4 + $0xb8] sm:$0xff]  ;;  %v527_v45 = vld [vmem:[%s2787_s4 + $0x90] sm:$0xff] }
   0xe   :  { %1630 = vset.pattern.permute.xlu0 %v2792_v1  ;;  %957 = vmatprep.mubr.bf16.mxu1 %v1660_v36  ;;  %v525_v40 = vld [vmem:[%s2787_s4 + $0x80] sm:$0xff]  ;;  %v530_v41 = vld [vmem:[%s2787_s4 + $0xa8] sm:$0xff]  ;;  %v536_v51 = vld [vmem:[%s2787_s4 + $0xd8] sm:$0xff] }
   0xf   :  { %1624 = vset.pattern.permute.xlu1 %v2794_v7  ;;  %106 = vperm.xlu0 %1630, %v31_v6   ;;  %v534_v46 = vld [vmem:[%s2787_s4 + $0xc8] sm:$0xff]  ;;  %v529_v49 = vld [vmem:[%s2787_s4 + $0xa0] sm:$0xff]  ;;  %v531_v54 = vld [vmem:[%s2787_s4 + $0xb0] sm:$0xff] }
  0x10   :  { %67 = vperm.xlu1 %1624, %v33_v4   ;;  %v538_v56 = vld [vmem:[%s2787_s4 + $0xe8] sm:$0xff]  ;;  %v533_v59 = vld [vmem:[%s2787_s4 + $0xc0] sm:$0xff]  ;;  %v539_v50 = vld [vmem:[%s2787_s4 + $0xf0] sm:$0xff] }
  0x13   :  { %102 = vperm.xlu0 %1630, %v30_v8  }
  0x14   :  { %1625 = vset.pattern.permute.xlu1 %v2792_v1 }
  0x15   :  { %114 = vperm.xlu1 %1625, %v33_v4  }
  0x17   :  { %1633 = vset.pattern.permute.xlu0 %v2794_v7 }
  0x18   :  { %77 = vperm.xlu0 %1633, %v35_v2   ;;  %v27_v2 = vld [vmem:[%s2789_s0] sm:$0xff] }
  0x19   :  { %118 = vperm.xlu1 %1625, %v34_v9   ;;  %v1929_v4 = vrot.slane %v27_v2, %v87_v62 }
  0x1b   :  { %2824 = vst [vmem:[#allocation2_spill] sm:$0xff] %v1929_v4 }
  0x1c   :  { %82 = vperm.xlu0 %1633, %v36_v3   ;;  %v540_v3 = vld [vmem:[%s2787_s4 + $0xf8] sm:$0xff] }
  0x1d   :  { %1626 = vset.pattern.permute.xlu1 %v2796_v0 }
  0x1e   :  { %170 = vperm.xlu1 %1626, %v34_v9  }
  0x20   :  { %72 = vperm.xlu0 %1633, %v34_v9  }
  0x22   :  { %1627 = vset.pattern.permute.xlu1 %v2794_v7 }
  0x23   :  { %233 = vperm.xlu1 %1627, %v43_v10   ;;  %v535_v10 = vld [vmem:[%s2787_s4 + $0xd0] sm:$0xff] }
  0x24   :  { %238 = vperm.xlu0 %1633, %v44_v11   ;;  %v28_v11 = vld [vmem:[%s2789_s0 + $0x8] sm:$0xf] }
  0x27   :  { %57 = vperm.xlu1 %1627, %v31_v6  }
  0x28   :  { %47 = vperm.xlu0 %1633, %v29_v12  }
  0x2b   :  { %62 = vperm.xlu1 %1627, %v32_v5  }
  0x2c   :  { %213 = vperm.xlu0 %1633, %v39_v13   ;;  %v1943_v13 = vrot.slane %v27_v2, %v339_v61 }
  0x2f   :  { %1628 = vset.pattern.permute.xlu1 %v2792_v1 }
  0x30   :  { %110 = vperm.xlu1 %1628, %v32_v5   ;;  %208 = vperm.xlu0 %1633, %v38_v14   ;;  %v1931_v5 = vrot.slane %v27_v2, %v327_v57  ;;  %v259_v14 = vsub.s32 3, %v86_v55 }
  0x34   :  { %1629 = vset.pattern.permute.xlu1 %v2796_v0  ;;  %1636 = vset.pattern.permute.xlu0 %v2792_v1 }
  0x35   :  { %158 = vperm.xlu1 %1629, %v31_v6   ;;  %1133 = vperm.xlu0 %1636, %v1796_v15   ;;  %v183_v6 = vsub.s32 2, %v86_v55 }
  0x39   :  { %1631 = vset.pattern.permute.xlu1 %v2794_v7  ;;  %1637 = vset.pattern.permute.xlu0 %v2794_v7 }
  0x3a   :  { %223 = vperm.xlu1 %1631, %v41_v16   ;;  %548 = vperm.xlu0 %1637, %v510_v18   ;;  %v291_v16 = vsub.s32 5, %v86_v55  ;;  %v1947_v18 = vrot.slane %v28_v11, %v87_v62 }
  0x3c   :  { %2827 = vst [vmem:[#allocation5_spill] sm:$0xff] %v1947_v18 }
  0x3e   :  { %228 = vperm.xlu1 %1631, %v42_v17   ;;  %558 = vperm.xlu0 %1637, %v512_v20   ;;  %v1945_v17 = vrot.slane %v27_v2, %v183_v6  ;;  %v1954_v20 = vld [vmem:[%s2786_s5 + $0x8] sm:$0xff] }
  0x40   :  { %2826 = vst [vmem:[#allocation4_spill] sm:$0xff] %v1945_v17 }
  0x42   :  { %52 = vperm.xlu1 %1631, %v30_v8   ;;  %568 = vperm.xlu0 %1637, %v514_v22  }
  0x46   :  { %1632 = vset.pattern.permute.xlu1 %v2792_v1  ;;  %578 = vperm.xlu0 %1637, %v516_v25  }
  0x47   :  { %98 = vperm.xlu1 %1632, %v29_v12  }
  0x4a   :  { %588 = vperm.xlu0 %1637, %v518_v27   ;;  %v1968_v27 = vrot.slane %v27_v2, %v259_v14 }
  0x4b   :  { %1634 = vset.pattern.permute.xlu1 %v2796_v0 }
  0x4c   :  { %150 = vperm.xlu1 %1634, %v29_v12   ;;  %v1941_v12 = vrot.slane %v27_v2, %v131_v60 }
  0x4e   :  { %598 = vperm.xlu0 %1637, %v520_v29   ;;  %2825 = vst [vmem:[#allocation3_spill] sm:$0xff] %v1941_v12  ;;  %v537_v29 = vld [vmem:[%s2787_s4 + $0xe0] sm:$0xff] }
  0x50   :  { %154 = vperm.xlu1 %1634, %v30_v8   ;;  %v271_v8 = vsub.s32 4, %v86_v55 }
  0x52   :  { %608 = vperm.xlu0 %1637, %v522_v31   ;;  %v1964_v25 = vrot.slane %v27_v2, %v271_v8 }
  0x54   :  { %1635 = vset.pattern.permute.xlu1 %v2794_v7 }
  0x55   :  { %218 = vperm.xlu1 %1635, %v40_v19  }
  0x56   :  { %618 = vperm.xlu0 %1637, %v524_v32  }
  0x59   :  { %203 = vperm.xlu1 %1635, %v37_v21  }
  0x5a   :  { %628 = vperm.xlu0 %1637, %v526_v37  }
  0x5d   :  { %543 = vperm.xlu1 %1635, %v509_v23  }
  0x5e   :  { %638 = vperm.xlu0 %1637, %v528_v38   ;;  %v1991_v38 = vld [vmem:[%s2786_s5 + $0x18] sm:$0xff] }
  0x61   :  { %553 = vperm.xlu1 %1635, %v511_v24  }
  0x62   :  { %648 = vperm.xlu0 %1637, %v530_v41  }
  0x65   :  { %563 = vperm.xlu1 %1635, %v513_v26   ;;  %v1966_v26 = vrot.slane %v28_v11, %v183_v6 }
  0x66   :  { %658 = vperm.xlu0 %1637, %v532_v42  }
  0x69   :  { %573 = vperm.xlu1 %1635, %v515_v28   ;;  %v1970_v28 = vrot.slane %v28_v11, %v131_v60 }
  0x6a   :  { %668 = vperm.xlu0 %1637, %v534_v46   ;;  %v2003_v46 = vrot.slane %v28_v11, %v259_v14 }
  0x6d   :  { %583 = vperm.xlu1 %1635, %v517_v30  }
  0x6e   :  { %678 = vperm.xlu0 %1637, %v536_v51  }
  0x71   :  { %593 = vperm.xlu1 %1635, %v519_v33  }
  0x72   :  { %688 = vperm.xlu0 %1637, %v538_v56  }
  0x75   :  { %603 = vperm.xlu1 %1635, %v521_v35  }
  0x76   :  { %698 = vperm.xlu0 %1637, %v540_v3  }
  0x79   :  { %613 = vperm.xlu1 %1635, %v523_v39  }
  0x7a   :  { %1071 = vperm.xlu0 %1637, %v1954_v20  }
  0x7d   :  { %v1886_v43 = vpop.permute.xlu1 %122  ;;  %623 = vperm.xlu1 %1635, %v525_v40   ;;  %v1888_v44 = vpop.permute.xlu0 %174  ;;  %v1995_v40 = vrot.slane %v27_v2, %v291_v16  ;;  %v2030_v2 = vld [vmem:[%s2786_s5 + $0x20] sm:$0xff] }
  0x7e   :  { %v139_v35 = vmul.f32 %v1941_v12, %v1886_v43  ;;  %v191_v39 = vmul.f32 %v1945_v17, %v1888_v44  ;;  %v415_v51 = vmul.f32 %v1966_v26, %v1886_v43  ;;  %1081 = vperm.xlu0 %1637, %v1991_v38   ;;  %v435_v3 = vmul.f32 %v2003_v46, %v1888_v44 }
  0x81   :  { %v1896_v47 = vpop.permute.xlu1 %126  ;;  %633 = vperm.xlu1 %1635, %v527_v45   ;;  %v1898_v48 = vpop.permute.xlu0 %166  ;;  %v279_v45 = vmul.f32 %v1964_v25, %v1886_v43 }
  0x82   :  { %v189_v30 = vmul.f32 %v1945_v17, %v1898_v48  ;;  %v365_v31 = vmul.f32 %v1947_v18, %v1898_v48  ;;  %v416_v60 = vmul.f32 %v1966_v26, %v1896_v47  ;;  %1086 = vperm.xlu0 %1637, %v2030_v2  }
  0x85   :  { %643 = vperm.xlu1 %1635, %v529_v49   ;;  %v1906_v52 = vpop.permute.xlu0 %162 }
  0x86   :  { %v1908_v53 = vpop.permute.xlu1 %178  ;;  %1644 = vset.pattern.permute.xlu0 %v2796_v0 }
  0x87   :  { %1192 = vperm.xlu0 %1644, %v1954_v20  }
  0x89   :  { %653 = vperm.xlu1 %1635, %v531_v54   ;;  %v299_v54 = vmul.f32 %v1995_v40, %v1888_v44 }
  0x8a   :  { %v1916_v58 = vpop.permute.xlu0 %106 }
  0x8b   :  { %v1921_v63 = vpop.permute.xlu1 %67  ;;  %1204 = vperm.xlu0 %1644, %v2030_v2  }
  0x8c   :  { %v93_v21 = vmul.f32 %v1929_v4, %v1921_v63  ;;  %v333_v22 = vmul.f32 %v1931_v5, %v1921_v63 }
  0x8d   :  { %663 = vperm.xlu1 %1635, %v533_v59   ;;  %v280_v59 = vmul.f32 %v1964_v25, %v1896_v47 }
  0x8e   :  { %v1933_v9 = vpop.permute.xlu0 %102 }
  0x90   :  { %v1949_v19 = vpop.permute.xlu1 %114 }
  0x91   :  { %v137_v23 = vmul.f32 %v1941_v12, %v1949_v19  ;;  %v345_v24 = vmul.f32 %v1943_v13, %v1949_v19  ;;  %673 = vperm.xlu1 %1635, %v535_v10  }
  0x93   :  { %v145_v32 = vadd.f32 %v137_v23, %v93_v21  ;;  %v353_v33 = vadd.f32 %v345_v24, %v333_v22  ;;  %v1979_v34 = vpop.permute.xlu0 %77  ;;  %v436_v22 = vmul.f32 %v2003_v46, %v1908_v53  ;;  %v300_v23 = vmul.f32 %v1995_v40, %v1908_v53 }
  0x94   :  { %v95_v36 = vmul.f32 %v1929_v4, %v1979_v34  ;;  %v1986_v37 = vpop.permute.xlu1 %118  ;;  %v267_v41 = vmul.f32 %v1968_v27, %v1979_v34  ;;  %v403_v42 = vmul.f32 %v1970_v28, %v1979_v34 }
  0x95   :  { %683 = vperm.xlu1 %1635, %v537_v29   ;;  %v2014_v56 = vadd.f32 %v189_v30, %v145_v32  ;;  %v2016_v57 = vadd.f32 %v365_v31, %v353_v33  ;;  %v2051_v31 = vld [vmem:[%s2786_s5 + $0x10] sm:$0xff] }
  0x96   :  { %v147_v49 = vadd.f32 %v139_v35, %v95_v36  ;;  %v287_v6 = vadd.f32 %v279_v45, %v267_v41  ;;  %v423_v8 = vadd.f32 %v415_v51, %v403_v42 }
  0x97   :  { %v2012_v55 = vpop.permute.xlu0 %82  ;;  %2828 = vst [vmem:[#allocation6_spill] sm:$0xff] %v2016_v57 }
  0x98   :  { %v268_v61 = vmul.f32 %v1968_v27, %v2012_v55  ;;  %v404_v62 = vmul.f32 %v1970_v28, %v2012_v55  ;;  %v2036_v11 = vadd.f32 %v191_v39, %v147_v49  ;;  %v443_v24 = vadd.f32 %v435_v3, %v423_v8 }
  0x99   :  { %v2034_v10 = vpop.permute.xlu1 %170  ;;  %693 = vperm.xlu1 %1635, %v539_v50   ;;  %v307_v29 = vadd.f32 %v299_v54, %v287_v6  ;;  %v2082_v6 = vld [vmem:[%s2786_s5 + $0x30] sm:$0xff]  ;;  %v413_v8 = vmul.f32 %v1966_v26, %v1949_v19 }
  0x9a   :  { %v288_v14 = vadd.f32 %v280_v59, %v268_v61  ;;  %v424_v16 = vadd.f32 %v416_v60, %v404_v62  ;;  %v2072_v62 = vld [vmem:[%s2786_s5 + $0x28] sm:$0xff] }
  0x9b   :  { %v2038_v21 = vpop.permute.xlu0 %72  ;;  %1208 = vperm.xlu0 %1644, %v2072_v62  }
  0x9c   :  { %v444_v32 = vadd.f32 %v436_v22, %v424_v16  ;;  %v308_v33 = vadd.f32 %v300_v23, %v288_v14  ;;  %v94_v14 = vmul.f32 %v1929_v4, %v2038_v21  ;;  %v402_v16 = vmul.f32 %v1970_v28, %v2038_v21 }
  0x9d   :  { %1066 = vperm.xlu1 %1635, %v1796_v15   ;;  %v265_v23 = vmul.f32 %v1968_v27, %v1921_v63 }
  0x9e   :  { %v2046_v30 = vpop.permute.xlu1 %233 }
  0x9f   :  { %v2053_v35 = vpop.permute.xlu0 %238  ;;  %v451_v36 = vadd.f32 %v443_v24, %v2046_v30  ;;  %v315_v39 = vadd.f32 %v307_v29, %v2046_v30  ;;  %1649 = vset.pattern.permute.xlu0 %v2792_v1  ;;  %v401_v24 = vmul.f32 %v1970_v28, %v1921_v63  ;;  %v138_v29 = vmul.f32 %v1941_v12, %v1986_v37 }
  0xa0   :  { %v452_v41 = vadd.f32 %v444_v32, %v2053_v35  ;;  %v316_v42 = vadd.f32 %v308_v33, %v2053_v35  ;;  %1157 = vperm.xlu0 %1649, %v2082_v6   ;;  %v278_v32 = vmul.f32 %v1964_v25, %v1986_v37  ;;  %v414_v33 = vmul.f32 %v1966_v26, %v1986_v37 }
  0xa1   :  { %1076 = vperm.xlu1 %1635, %v2051_v31   ;;  %v459_v45 = vmax.f32 %v451_v36, 0.0  ;;  %v323_v49 = vmax.f32 %v315_v39, 0.0  ;;  %v297_v63 = vmul.f32 %v1995_v40, %v1898_v48  ;;  %v433_v36 = vmul.f32 %v2003_v46, %v1898_v48  ;;  %v1062_v48 = vld [vmem:[%s2790_s6] sm:$0xff] }
  0xa2   :  { %v2062_v50 = vpop.permute.xlu1 %57  ;;  %v460_v51 = vmax.f32 %v452_v41, 0.0  ;;  %v324_v54 = vmax.f32 %v316_v42, 0.0  ;;  %v421_v41 = vadd.f32 %v413_v8, %v401_v24  ;;  %v146_v42 = vadd.f32 %v138_v29, %v94_v14 }
  0xa3   :  { %v434_v8 = vmul.f32 %v2003_v46, %v2034_v10 }
  0xa4   :  { %v508_v59 = vpack.c.bf16 %v460_v51, %v459_v45  ;;  %v500_v60 = vpack.c.bf16 %v324_v54, %v323_v49  ;;  %v422_v49 = vadd.f32 %v414_v33, %v402_v16  ;;  %v347_v51 = vmul.f32 %v1943_v13, %v1886_v43 }
  0xa5   :  { %1638 = vset.pattern.permute.xlu1 %v2792_v1  ;;  %v367_v54 = vmul.f32 %v1947_v18, %v1888_v44  ;;  %v190_v43 = vmul.f32 %v1945_v17, %v2034_v10  ;;  %v298_v44 = vmul.f32 %v1995_v40, %v2034_v10  ;;  %v96_v16 = vmul.f32 %v1929_v4, %v2012_v55 }
  0xa6   :  { %v2066_v61 = vpop.permute.xlu1 %62  ;;  %1490 = vmatprep.subr.bf16.mxu0 %v508_v59  ;;  %1602 = vmatprep.subr.bf16.mxu1 %v508_v59  ;;  %v140_v59 = vmul.f32 %v1941_v12, %v1896_v47  ;;  %v442_v29 = vadd.f32 %v434_v8, %v422_v49 }
  0xa7   :  { %1491 = vmatpush3.bf16.msra.mxu0 %v500_v60  ;;  %1610 = vmatpush3.bf16.msra.mxu1 %v500_v60  ;;  %v348_v60 = vmul.f32 %v1943_v13, %v1896_v47  ;;  %v335_v47 = vmul.f32 %v1931_v5, %v1979_v34 }
  0xa8   :  { %1137 = vperm.xlu1 %1638, %v1954_v20   ;;  %v277_v20 = vmul.f32 %v1964_v25, %v1949_v19  ;;  %v2106_v19 = vld [vmem:[%s2786_s5 + $0x38] sm:$0xff] }
  0xa9   :  { %2829 = vst [vmem:[#allocation7_spill] sm:$0xff] %v2106_v19  ;;  %1161 = vperm.xlu0 %1649, %v2106_v19   ;;  %v355_v49 = vadd.f32 %v347_v51, %v335_v47  ;;  %v275_v51 = vmul.f32 %v1964_v25, %v1916_v58  ;;  %v400_v19 = vmul.f32 %v1970_v28, %v2066_v61 }
  0xaa   :  { %v285_v39 = vadd.f32 %v277_v20, %v265_v23  ;;  %v2135_v20 = vmul.f32 %v1945_v17, %v1906_v52  ;;  %v198_v23 = vadd.f32 %v190_v43, %v146_v42  ;;  %v148_v43 = vadd.f32 %v140_v59, %v96_v16 }
  0xab   :  { %v2075_v3 = vpop.permute.xlu1 %110  ;;  %v334_v59 = vmul.f32 %v1931_v5, %v2038_v21 }
  0xac   :  { %1639 = vset.pattern.permute.xlu1 %v2796_v0  ;;  %v305_v14 = vadd.f32 %v297_v63, %v285_v39 }
  0xad   :  { %1188 = vperm.xlu1 %1639, %v1796_v15   ;;  %v266_v15 = vmul.f32 %v1968_v27, %v2038_v21  ;;  %1653 = vset.pattern.permute.xlu0 %v2794_v7  ;;  %v346_v21 = vmul.f32 %v1943_v13, %v1986_v37  ;;  %v2214_v37 = vadd.f32 %v2046_v30, %v2036_v11 }
  0xae   :  { %1127 = vperm.xlu0 %1653, %v1062_v48   ;;  %v2830_v48 = vmov 1   ;;  %v331_v11 = vmul.f32 %v1931_v5, %v2062_v50 }
  0xaf   :  { %v286_v45 = vadd.f32 %v278_v32, %v266_v15  ;;  %v441_v15 = vadd.f32 %v433_v36, %v421_v41  ;;  %v336_v32 = vmul.f32 %v1931_v5, %v2012_v55  ;;  %v2160_v36 = vmul.f32 %v1995_v40, %v1906_v52  ;;  %2834 = vst [vmem:[#allocation10_spill] sm:$0xff] %v2214_v37 }
  0xb0   :  { %v2096_v22 = vpop.permute.xlu1 %158  ;;  %v192_v55 = vmul.f32 %v1945_v17, %v1908_v53 }
  0xb1   :  { %1640 = vset.pattern.permute.xlu1 %v2792_v1  ;;  %v306_v24 = vadd.f32 %v298_v44, %v286_v45  ;;  %v2173_v45 = vmul.f32 %v2003_v46, %v1906_v52 }
  0xb2   :  { %1141 = vperm.xlu1 %1640, %v2051_v31  }
  0xb5   :  { %v2128_v1 = vpop.permute.xlu1 %223 }
  0xb6   :  { %1641 = vset.pattern.permute.xlu1 %v2796_v0  ;;  %v245_v33 = vadd.f32 %v2128_v1, %v2014_v56  ;;  %v313_v34 = vadd.f32 %v305_v14, %v2128_v1  ;;  %v449_v63 = vadd.f32 %v441_v15, %v2128_v1  ;;  %v2169_v56 = vmul.f32 %v1947_v18, %v1906_v52 }
  0xb7   :  { %1196 = vperm.xlu1 %1641, %v2051_v31   ;;  %v356_v15 = vadd.f32 %v348_v60, %v336_v32  ;;  %v368_v0 = vmul.f32 %v1947_v18, %v1908_v53  ;;  %v135_v52 = vmul.f32 %v1941_v12, %v1916_v58  ;;  %v343_v60 = vmul.f32 %v1943_v13, %v1916_v58 }
  0xb8   :  { %v253_v7 = vmax.f32 %v245_v33, 0.0  ;;  %v411_v33 = vmul.f32 %v1966_v26, %v1916_v58  ;;  %v2195_v53 = vmul.f32 %v1941_v12, %v1933_v9  ;;  %v2206_v58 = vmul.f32 %v1947_v18, %v2034_v10 }
  0xb9   :  { %v2156_v31 = vpop.permute.xlu1 %228  ;;  %v91_v10 = vmul.f32 %v1929_v4, %v2062_v50 }
  0xba   :  { %v246_v39 = vadd.f32 %v2156_v31, %v198_v23  ;;  %v314_v41 = vadd.f32 %v306_v24, %v2156_v31  ;;  %v450_v42 = vadd.f32 %v442_v29, %v2156_v31  ;;  %v457_v24 = vmax.f32 %v449_v63, 0.0  ;;  %2832 = vst [vmem:[#allocation9_spill] sm:$0xff] %v2195_v53 }
  0xbb   :  { %1642 = vset.pattern.permute.xlu1 %v2830_v48  ;;  %v321_v29 = vmax.f32 %v313_v34, 0.0  ;;  %v274_v34 = vmul.f32 %v1964_v25, %v1933_v9  ;;  %v2833_v63 = vmov 2  }
  0xbc   :  { %v458_v44 = vmax.f32 %v450_v42, 0.0  ;;  %v322_v8 = vmax.f32 %v314_v41, 0.0  ;;  %v254_v14 = vmax.f32 %v246_v39, 0.0  ;;  %1145 = vperm.xlu1 %1642, %v1991_v38   ;;  %v375_v39 = vadd.f32 %v367_v54, %v355_v49 }
  0xbd   :  { %v2177_v23 = vpop.permute.xlu1 %52  ;;  %v200_v41 = vadd.f32 %v192_v55, %v148_v43  ;;  %v376_v42 = vadd.f32 %v368_v0, %v356_v15  ;;  %v263_v49 = vmul.f32 %v1968_v27, %v2062_v50  ;;  %v92_v43 = vmul.f32 %v1929_v4, %v2066_v61 }
  0xbe   :  { %v507_v47 = vpack.c.bf16 %v458_v44, %v457_v24  ;;  %v499_v16 = vpack.c.bf16 %v322_v8, %v321_v29  ;;  %v2189_v32 = vpack.c.bf16 %v254_v14, %v253_v7  ;;  %v410_v7 = vmul.f32 %v1966_v26, %v1933_v9 }
  0xbf   :  { %v2208_v44 = vadd.f32 %v346_v21, %v334_v59  ;;  %v2217_v0 = vadd.f32 %v375_v39, %v2046_v30  ;;  %v2220_v54 = vadd.f32 %v2053_v35, %v200_v41  ;;  %v2223_v55 = vadd.f32 %v376_v42, %v2053_v35  ;;  %v2250_v59 = vpop.permute.xlu0 %47 }
  0xc0   :  { %2831 = vst [vmem:[#allocation8_spill] sm:$0xff] %v2189_v32  ;;  %1643 = vset.pattern.permute.xlu1 %v2833_v63  ;;  %1492 = vmatprep.subr.bf16.mxu0 %v507_v47  ;;  %v399_v30 = vmul.f32 %v1970_v28, %v2062_v50  ;;  %v264_v35 = vmul.f32 %v1968_v27, %v2066_v61 }
  0xc1   :  { %1603 = vmatprep.subr.bf16.mxu1 %v507_v47  ;;  %1493 = vmatpush3.bf16.msra.mxu0 %v499_v16  ;;  %2835 = vst [vmem:[#allocation11_spill] sm:$0xff] %v2220_v54  ;;  %v276_v14 = vmul.f32 %v1964_v25, %v2075_v3  ;;  %v344_v15 = vmul.f32 %v1943_v13, %v2075_v3 }
  0xc2   :  { %1611 = vmatpush3.bf16.msra.mxu1 %v499_v16  ;;  %v2210_v8 = vpop.permute.xlu1 %98  ;;  %1200 = vperm.xlu1 %1643, %v1991_v38   ;;  %v136_v38 = vmul.f32 %v1941_v12, %v2075_v3  ;;  %v412_v24 = vmul.f32 %v1966_v26, %v2075_v3  ;;  %v187_v50 = vmul.f32 %v1945_v17, %v2096_v22 }
  0xc3   :  { %v295_v29 = vmul.f32 %v1995_v40, %v2096_v22  ;;  %v363_v47 = vmul.f32 %v1947_v18, %v2096_v22  ;;  %v431_v16 = vmul.f32 %v2003_v46, %v2096_v22  ;;  %v262_v21 = vmul.f32 %v1968_v27, %v2177_v23 }
  0xc4   :  { %v398_v3 = vmul.f32 %v1970_v28, %v2177_v23  ;;  %v143_v41 = vadd.f32 %v135_v52, %v91_v10  ;;  %v283_v42 = vadd.f32 %v275_v51, %v263_v49  ;;  %v332_v32 = vmul.f32 %v1931_v5, %v2066_v61  ;;  %v214_v49 = vpop.permute.xlu0 %213 }
  0xc5   :  { %v351_v22 = vadd.f32 %v343_v60, %v331_v11  ;;  %v419_v53 = vadd.f32 %v411_v33, %v399_v30  ;;  %v144_v17 = vadd.f32 %v136_v38, %v92_v43  ;;  %v284_v63 = vadd.f32 %v276_v14, %v264_v35 }
  0xc6   :  { %1645 = vset.pattern.permute.xlu1 %v2830_v48  ;;  %v352_v54 = vadd.f32 %v344_v15, %v332_v32  ;;  %v420_v37 = vadd.f32 %v412_v24, %v400_v19  ;;  %v195_v12 = vadd.f32 %v187_v50, %v143_v41  ;;  %v303_v4 = vadd.f32 %v295_v29, %v283_v42 }
  0xc7   :  { %v2260_v39 = vpop.permute.xlu1 %150  ;;  %1149 = vperm.xlu1 %1645, %v2030_v2   ;;  %v371_v18 = vadd.f32 %v363_v47, %v351_v22  ;;  %v439_v57 = vadd.f32 %v431_v16, %v419_v53  ;;  %v282_v52 = vadd.f32 %v274_v34, %v262_v21  ;;  %v418_v51 = vadd.f32 %v410_v7, %v398_v3 }
  0xc8   :  { %v273_v61 = vmul.f32 %v1964_v25, %v2210_v8  ;;  %v409_v2 = vmul.f32 %v1966_v26, %v2210_v8  ;;  %v2836_v32 = vmov 0   ;;  %v261_v33 = vmul.f32 %v1968_v27, %v2250_v59  ;;  %v2292_v14 = vpop.permute.xlu0 %208 }
  0xc9   :  { %v397_v53 = vmul.f32 %v1970_v28, %v2250_v59  ;;  %v196_v34 = vadd.f32 %v2135_v20, %v144_v17  ;;  %v304_v25 = vadd.f32 %v2160_v36, %v284_v63  ;;  %v293_v26 = vmul.f32 %v1995_v40, %v2260_v39 }
  0xca   :  { %v429_v7 = vmul.f32 %v2003_v46, %v2260_v39  ;;  %v243_v43 = vadd.f32 %v214_v49, %v195_v12  ;;  %v311_v35 = vadd.f32 %v303_v4, %v214_v49  ;;  %v372_v27 = vadd.f32 %v2169_v56, %v352_v54 }
  0xcb   :  { %v2268_v10 = vpop.permute.xlu1 %154  ;;  %1646 = vset.pattern.permute.xlu1 %v2836_v32  ;;  %v440_v28 = vadd.f32 %v2173_v45, %v420_v37  ;;  %v379_v38 = vadd.f32 %v371_v18, %v214_v49  ;;  %v447_v17 = vadd.f32 %v439_v57, %v214_v49  ;;  %v281_v20 = vadd.f32 %v273_v61, %v261_v33 }
  0xcc   :  { %v294_v60 = vmul.f32 %v1995_v40, %v2268_v10  ;;  %v430_v19 = vmul.f32 %v2003_v46, %v2268_v10  ;;  %1091 = vperm.xlu1 %1646, %v2072_v62   ;;  %v417_v36 = vadd.f32 %v409_v2, %v397_v53  ;;  %v319_v47 = vmax.f32 %v311_v35, 0.0  ;;  %v2841_v35 = vld [vmem:[#allocation10_spill] sm:$0xff] }
  0xcd   :  { %v301_v46 = vadd.f32 %v293_v26, %v281_v20  ;;  %v455_v29 = vmax.f32 %v447_v17, 0.0  ;;  %v387_v16 = vmax.f32 %v379_v38, 0.0  ;;  %v251_v21 = vmax.f32 %v243_v43, 0.0 }
  0xce   :  { %v302_v11 = vadd.f32 %v294_v60, %v282_v52  ;;  %v438_v30 = vadd.f32 %v430_v19, %v418_v51  ;;  %v437_v12 = vadd.f32 %v429_v7, %v417_v36  ;;  %v391_v42 = vmax.f32 %v2217_v0, 0.0  ;;  %v2838_v7 = vld [vmem:[#allocation5_spill] sm:$0xff] }
  0xcf   :  { %v341_v0 = vmul.f32 %v1943_v13, %v2210_v8  ;;  %v392_v19 = vmax.f32 %v2223_v55, 0.0  ;;  %v342_v33 = vmul.f32 %v1943_v13, %v1933_v9  ;;  %v2839_v55 = vld [vmem:[#allocation2_spill] sm:$0xff]  ;;  %v2840_v9 = vld [vmem:[#allocation3_spill] sm:$0xff]  ;;  %v2843_v36 = vmov 2  }
  0xd0   :  { %v219_v63 = vpop.permute.xlu1 %218  ;;  %1647 = vset.pattern.permute.xlu1 %v2830_v48  ;;  %v446_v4 = vadd.f32 %v438_v30, %v2292_v14  ;;  %v310_v56 = vadd.f32 %v302_v11, %v2292_v14  ;;  %v374_v48 = vadd.f32 %v2206_v58, %v2208_v44  ;;  %v330_v44 = vmul.f32 %v1931_v5, %v2177_v23 }
  0xd1   :  { %v244_v15 = vadd.f32 %v219_v63, %v196_v34  ;;  %v312_v40 = vadd.f32 %v304_v25, %v219_v63  ;;  %v380_v24 = vadd.f32 %v372_v27, %v219_v63  ;;  %v448_v50 = vadd.f32 %v440_v28, %v219_v63  ;;  %1153 = vperm.xlu1 %1647, %v2072_v62   ;;  %v2837_v25 = vld [vmem:[#allocation6_spill] sm:$0xff] }
  0xd2   :  { %v454_v61 = vmax.f32 %v446_v4, 0.0  ;;  %v318_v60 = vmax.f32 %v310_v56, 0.0  ;;  %v382_v58 = vadd.f32 %v374_v48, %v2156_v31  ;;  %v329_v31 = vmul.f32 %v1931_v5, %v2250_v59  ;;  %v2842_v5 = vld [vmem:[#allocation11_spill] sm:$0xff] }
  0xd3   :  { %v456_v18 = vmax.f32 %v448_v50, 0.0  ;;  %v320_v57 = vmax.f32 %v312_v40, 0.0  ;;  %v388_v45 = vmax.f32 %v380_v24, 0.0  ;;  %v252_v37 = vmax.f32 %v244_v15, 0.0 }
  0xd4   :  { %v2298_v54 = vpop.permute.xlu1 %203  ;;  %v381_v26 = vadd.f32 %v2837_v25, %v2128_v1  ;;  %v361_v11 = vmul.f32 %v2838_v7, %v2260_v39  ;;  %v362_v30 = vmul.f32 %v2838_v7, %v2268_v10  ;;  %v90_v43 = vmul.f32 %v2839_v55, %v2177_v23  ;;  %v2844_v23 = vld [vmem:[#allocation4_spill] sm:$0xff] }
  0xd5   :  { %v309_v3 = vadd.f32 %v301_v46, %v2298_v54  ;;  %v445_v41 = vadd.f32 %v437_v12, %v2298_v54  ;;  %v506_v62 = vpack.c.bf16 %v456_v18, %v455_v29  ;;  %v498_v22 = vpack.c.bf16 %v320_v57, %v319_v47  ;;  %1648 = vset.pattern.permute.xlu1 %v2836_v32  ;;  %v2845_v46 = vld [vmem:[#allocation9_spill] sm:$0xff]  ;;  %v2846_v29 = vld [vmem:[#allocation7_spill] sm:$0xff]  ;;  %v2847_v47 = vld [vmem:[#allocation8_spill] sm:$0xff] }
  0xd6   :  { %v2305_v52 = vpack.c.bf16 %v388_v45, %v387_v16  ;;  %v2307_v51 = vpack.c.bf16 %v252_v37, %v251_v21  ;;  %1096 = vperm.xlu1 %1648, %v2082_v6   ;;  %v133_v13 = vmul.f32 %v2840_v9, %v2210_v8  ;;  %v255_v27 = vmax.f32 %v2841_v35, 0.0  ;;  %v1687_v25 = vld [vmem:[%s2788_s3 + $0xd4] ss:$8 sps:$4 sm:$0xff]   ;;  %v1690_v7 = vld [vmem:[%s2788_s3 + $0xd0] ss:$8 sps:$4 sm:$0xff]  }
  0xd7   :  { %v453_v49 = vmax.f32 %v445_v41, 0.0  ;;  %v317_v2 = vmax.f32 %v309_v3, 0.0  ;;  %1494 = vmatprep.subr.bf16.mxu0 %v506_v62  ;;  %1604 = vmatprep.subr.bf16.mxu1 %v506_v62  ;;  %v256_v28 = vmax.f32 %v2842_v5, 0.0  ;;  %v350_v38 = vadd.f32 %v342_v33, %v330_v44  ;;  %v1658_v41 = vld [vmem:[%s2788_s3 + $0x80] ss:$8 sps:$4 sm:$0xff]  }
  0xd8   :  { %1495 = vmatpush3.bf16.msra.mxu0 %v498_v22  ;;  %1612 = vmatpush3.bf16.msra.mxu1 %v498_v22  ;;  %v349_v1 = vadd.f32 %v341_v0, %v329_v31  ;;  %v504_v17 = vpack.c.bf16 %v392_v19, %v391_v42  ;;  %v390_v20 = vmax.f32 %v382_v58, 0.0  ;;  %v89_v63 = vmul.f32 %v2839_v55, %v2250_v59  ;;  %v1661_v42 = vld [vmem:[%s2788_s3 + $0x14] ss:$8 sps:$4 sm:$0xff]   ;;  %v1063_v22 = vld [vmem:[%s2790_s6 + $0x8] sm:$0xf]  ;;  %v544_v5 = vpop.permute.xlu1 %543 }
  0xd9   :  { %v505_v53 = vpack.c.bf16 %v454_v61, %v453_v49  ;;  %v497_v34 = vpack.c.bf16 %v318_v60, %v317_v2  ;;  %v185_v15 = vmul.f32 %v2844_v23, %v2260_v39  ;;  %v186_v8 = vmul.f32 %v2844_v23, %v2268_v10  ;;  %v1663_v62 = vld [vmem:[%s2788_s3 + $0x94] ss:$8 sps:$4 sm:$0xff]   ;;  %v1669_v49 = vld [vmem:[%s2788_s3 + $0xa4] ss:$8 sps:$4 sm:$0xff]   ;;  %v1671_v61 = vld [vmem:[%s2788_s3 + $0x20] ss:$8 sps:$4 sm:$0xff]  }
  0xda   :  { %1650 = vset.pattern.permute.xlu1 %v2843_v36  ;;  %v370_v40 = vadd.f32 %v362_v30, %v350_v38  ;;  %v369_v24 = vadd.f32 %v361_v11, %v349_v1  ;;  %v389_v50 = vmax.f32 %v381_v26, 0.0  ;;  %v142_v12 = vadd.f32 %v2845_v46, %v90_v43  ;;  %v1672_v2 = vld [vmem:[%s2788_s3 + $0xa0] ss:$8 sps:$4 sm:$0xff]   ;;  %v1673_v60 = vld [vmem:[%s2788_s3 + $0x34] ss:$8 sps:$4 sm:$0xff]  }
  0xdb   :  { %1496 = vmatprep.subr.bf16.mxu0 %v505_v53  ;;  %1605 = vmatprep.subr.bf16.mxu1 %v505_v53  ;;  %v141_v4 = vadd.f32 %v133_v13, %v89_v63  ;;  %v496_v56 = vpack.c.bf16 %v256_v28, %v255_v27  ;;  %v1675_v58 = vld [vmem:[%s2788_s3 + $0xb4] ss:$8 sps:$4 sm:$0xff]   ;;  %v1677_v44 = vld [vmem:[%s2788_s3 + $0x30] ss:$8 sps:$4 sm:$0xff]   ;;  %v1679_v19 = vld [vmem:[%s2788_s3 + $0x44] ss:$8 sps:$4 sm:$0xff]  }
  0xdc   :  { %1497 = vmatpush3.bf16.msra.mxu0 %v497_v34  ;;  %1613 = vmatpush3.bf16.msra.mxu1 %v497_v34  ;;  %v377_v59 = vadd.f32 %v369_v24, %v2298_v54  ;;  %v503_v18 = vpack.c.bf16 %v390_v20, %v389_v50  ;;  %v194_v39 = vadd.f32 %v186_v8, %v142_v12  ;;  %v1678_v0 = vld [vmem:[%s2788_s3 + $0xb0] ss:$8 sps:$4 sm:$0xff]   ;;  %v1681_v33 = vld [vmem:[%s2788_s3 + $0xc4] ss:$8 sps:$4 sm:$0xff]   ;;  %v1683_v53 = vld [vmem:[%s2788_s3 + $0x40] ss:$8 sps:$4 sm:$0xff]   ;;  %v2450_v28 = vpop.permute.xlu1 %553 }
  0xdd   :  { %1498 = vmatprep.subr.bf16.mxu0 %v504_v17  ;;  %1606 = vmatprep.subr.bf16.mxu1 %v504_v17  ;;  %v193_v57 = vadd.f32 %v185_v15, %v141_v4  ;;  %v378_v10 = vadd.f32 %v370_v40, %v2292_v14  ;;  %v1684_v34 = vld [vmem:[%s2788_s3 + $0xc0] ss:$8 sps:$4 sm:$0xff]   ;;  %v1685_v31 = vld [vmem:[%s2788_s3 + $0x54] ss:$8 sps:$4 sm:$0xff]   ;;  %v1689_v26 = vld [vmem:[%s2788_s3 + $0x50] ss:$8 sps:$4 sm:$0xff]  }
  0xde   :  { %1212 = vperm.xlu1 %1650, %v2082_v6   ;;  %v385_v37 = vmax.f32 %v377_v59, 0.0  ;;  %v242_v6 = vadd.f32 %v2292_v14, %v194_v39  ;;  %v1655_v14 = vld [vmem:[%s2788_s3] ss:$8 sps:$4 sm:$0xff]   ;;  %v1691_v11 = vld [vmem:[%s2788_s3 + $0x64] ss:$8 sps:$4 sm:$0xff]  }
  0xdf   :  { %v241_v45 = vadd.f32 %v2298_v54, %v193_v57  ;;  %v386_v16 = vmax.f32 %v378_v10, 0.0  ;;  %v1693_v30 = vld [vmem:[%s2788_s3 + $0xe4] ss:$8 sps:$4 sm:$0xff]   ;;  %v1695_v55 = vld [vmem:[%s2788_s3 + $0x60] ss:$8 sps:$4 sm:$0xff]  }
  0xe0   :  { %1499 = vmatpush3.bf16.msra.mxu0 %v496_v56  ;;  %1614 = vmatpush3.bf16.msra.mxu1 %v496_v56  ;;  %v250_v54 = vmax.f32 %v242_v6, 0.0  ;;  %v1696_v43 = vld [vmem:[%s2788_s3 + $0xe0] ss:$8 sps:$4 sm:$0xff]   ;;  %v1697_v9 = vld [vmem:[%s2788_s3 + $0x74] ss:$8 sps:$4 sm:$0xff]   ;;  %v2452_v38 = vpop.permute.xlu1 %563 }
  0xe1   :  { %1500 = vmatprep.subr.bf16.mxu0 %v503_v18  ;;  %1607 = vmatprep.subr.bf16.mxu1 %v503_v18  ;;  %v249_v21 = vmax.f32 %v241_v45, 0.0  ;;  %v501_v48 = vpack.c.bf16 %v386_v16, %v385_v37  ;;  %v1699_v13 = vld [vmem:[%s2788_s3 + $0xf4] ss:$8 sps:$4 sm:$0xff]   ;;  %v1701_v35 = vld [vmem:[%s2788_s3 + $0x70] ss:$8 sps:$4 sm:$0xff]  }
  0xe2   :  { %1651 = vset.pattern.permute.xlu1 %v2836_v32  ;;  %v1702_v27 = vld [vmem:[%s2788_s3 + $0xf0] ss:$8 sps:$4 sm:$0xff]  }
  0xe3   :  { %1101 = vperm.xlu1 %1651, %v2846_v29   ;;  %v493_v3 = vpack.c.bf16 %v250_v54, %v249_v21 }
  0xe4   :  { %1501 = vmatpush3.bf16.msra.mxu0 %v2847_v47  ;;  %1615 = vmatpush3.bf16.msra.mxu1 %v2847_v47  ;;  %v2454_v1 = vpop.permute.xlu1 %573 }
  0xe5   :  { %1502 = vmatprep.subr.bf16.mxu0 %v2305_v52  ;;  %1608 = vmatprep.subr.bf16.mxu1 %v2305_v52  ;;  %v1665_v52 = vld [vmem:[%s2788_s3 + $0x10] ss:$8 sps:$4 sm:$0xff]  }
  0xe7   :  { %1652 = vset.pattern.permute.xlu1 %v2843_v36  ;;  %v2460_v36 = vpop.permute.xlu0 %1133 }
  0xe8   :  { %1503 = vmatpush3.bf16.msra.mxu0 %v2307_v51  ;;  %1616 = vmatpush3.bf16.msra.mxu1 %v2307_v51  ;;  %v1666_v51 = vld [vmem:[%s2788_s3 + $0x90] ss:$8 sps:$4 sm:$0xff]   ;;  %v2456_v17 = vpop.permute.xlu1 %583 }
  0xe9   :  { %1504 = vmatprep.subr.bf16.mxu0 %v501_v48  ;;  %1609 = vmatprep.subr.bf16.mxu1 %v501_v48 }
  0xea   :  { %1216 = vperm.xlu1 %1652, %v2846_v29  }
  0xeb   :  { %v549_v23 = vpop.permute.xlu0 %548 }
  0xec   :  { %1505 = vmatpush3.bf16.msra.mxu0 %v493_v3  ;;  %1617 = vmatpush3.bf16.msra.mxu1 %v493_v3  ;;  %v2458_v20 = vpop.permute.xlu1 %593 }
  0xed   :  { %2848 = vst [vmem:[#allocation6_spill] sm:$0xff] %v2458_v20 }
  0xee   :  { %1654 = vset.pattern.permute.xlu1 %v2836_v32  ;;  %v1667_v32 = vld [vmem:[%s2788_s3 + $0x24] ss:$8 sps:$4 sm:$0xff]  }
  0xef   :  { %894 = vmatmul.mubr.bf16.vlgmr.msra.gmra.mxu0 %v1655_v14  ;;  %958 = vmatmul.mubr.bf16.vlgmr.msra.gmra.mxu1 %v1658_v41  ;;  %v2466_v8 = vpop.permute.xlu0 %558 }
  0xf0   :  { %901 = vmatprep.mubr.bf16.mxu0 %v1661_v42  ;;  %965 = vmatprep.mubr.bf16.mxu1 %v1663_v62  ;;  %v2462_v63 = vpop.permute.xlu1 %603 }
  0xf1   :  { %1380 = vperm.xlu1 %1654, %v1063_v22   ;;  %2849 = vst [vmem:[#allocation5_spill] sm:$0xff] %v2462_v63 }
  0xf3   :  { %v2468_v24 = vpop.permute.xlu0 %568 }
  0xf4   :  { %v2464_v15 = vpop.permute.xlu1 %613 }
  0xf5   :  { %2850 = vst [vmem:[#allocation2_spill] sm:$0xff] %v2464_v15 }
  0xf7   :  { %902 = vmatmul.mubr.bf16.gmra.mxu0 %v1665_v52  ;;  %966 = vmatmul.mubr.bf16.gmra.mxu1 %v1666_v51  ;;  %v2470_v46 = vpop.permute.xlu0 %578 }
  0xf8   :  { %909 = vmatprep.mubr.bf16.mxu0 %v1667_v32  ;;  %973 = vmatprep.mubr.bf16.mxu1 %v1669_v49  ;;  %v624_v40 = vpop.permute.xlu1 %623 }
  0xfb   :  { %v2474_v4 = vpop.permute.xlu0 %588 }
  0xfc   :  { %v634_v50 = vpop.permute.xlu1 %633 }
  0xff   :  { %910 = vmatmul.mubr.bf16.gmra.mxu0 %v1671_v61  ;;  %974 = vmatmul.mubr.bf16.gmra.mxu1 %v1672_v2  ;;  %v2478_v59 = vpop.permute.xlu0 %598 }
 0x100   :  { %917 = vmatprep.mubr.bf16.mxu0 %v1673_v60  ;;  %981 = vmatprep.mubr.bf16.mxu1 %v1675_v58  ;;  %v2472_v12 = vpop.permute.xlu1 %643  ;;  %2851 = vst [vmem:[#allocation3_spill] sm:$0xff] %v2478_v59 }
 0x103   :  { %v2482_v39 = vpop.permute.xlu0 %608 }
 0x104   :  { %v2476_v56 = vpop.permute.xlu1 %653  ;;  %2852 = vst [vmem:[#allocation10_spill] sm:$0xff] %v2482_v39 }
 0x107   :  { %918 = vmatmul.mubr.bf16.gmra.mxu0 %v1677_v44  ;;  %982 = vmatmul.mubr.bf16.gmra.mxu1 %v1678_v0  ;;  %v2486_v10 = vpop.permute.xlu0 %618 }
 0x108   :  { %925 = vmatprep.mubr.bf16.mxu0 %v1679_v19  ;;  %989 = vmatprep.mubr.bf16.mxu1 %v1681_v33  ;;  %v2480_v18 = vpop.permute.xlu1 %663  ;;  %2854 = vst [vmem:[#allocation4_spill] sm:$0xff] %v2486_v10 }
 0x10b   :  { %v629_v37 = vpop.permute.xlu0 %628 }
 0x10c   :  { %v2484_v57 = vpop.permute.xlu1 %673 }
 0x10d   :  { %2853 = vst [vmem:[#allocation11_spill] sm:$0xff] %v2484_v57 }
 0x10f   :  { %926 = vmatmul.mubr.bf16.gmra.mxu0 %v1683_v53  ;;  %990 = vmatmul.mubr.bf16.gmra.mxu1 %v1684_v34  ;;  %v2492_v47 = vpop.permute.xlu0 %638 }
 0x110   :  { %933 = vmatprep.mubr.bf16.mxu0 %v1685_v31  ;;  %997 = vmatprep.mubr.bf16.mxu1 %v1687_v25  ;;  %v2488_v45 = vpop.permute.xlu1 %683 }
 0x111   :  { %2855 = vst [vmem:[#allocation9_spill] sm:$0xff] %v2488_v45 }
 0x113   :  { %v2496_v16 = vpop.permute.xlu0 %648 }
 0x114   :  { %v2490_v29 = vpop.permute.xlu1 %693 }
 0x115   :  { %2856 = vst [vmem:[#allocation7_spill] sm:$0xff] %v2490_v29 }
 0x117   :  { %934 = vmatmul.mubr.bf16.gmra.mxu0 %v1689_v26  ;;  %998 = vmatmul.mubr.bf16.gmra.mxu1 %v1690_v7  ;;  %v2500_v48 = vpop.permute.xlu0 %658 }
 0x118   :  { %941 = vmatprep.mubr.bf16.mxu0 %v1691_v11  ;;  %1005 = vmatprep.mubr.bf16.mxu1 %v1693_v30  ;;  %v2494_v6 = vpop.permute.xlu1 %1066 }
 0x11b   :  { %v2504_v3 = vpop.permute.xlu0 %668 }
 0x11c   :  { %v2498_v21 = vpop.permute.xlu1 %1076 }
 0x11d   :  { %2857 = vst [vmem:[#allocation8_spill] sm:$0xff] %v2498_v21 }
 0x11f   :  { %942 = vmatmul.mubr.bf16.gmra.mxu0 %v1695_v55  ;;  %1006 = vmatmul.mubr.bf16.gmra.mxu1 %v1696_v43  ;;  %v2508_v41 = vpop.permute.xlu0 %678 }
 0x120   :  { %949 = vmatprep.mubr.bf16.mxu0 %v1697_v9  ;;  %1013 = vmatprep.mubr.bf16.mxu1 %v1699_v13  ;;  %2858 = vst [vmem:[#allocation12_spill] sm:$0xff] %v2508_v41 }
 0x123   :  { %v2502_v54 = vpop.permute.xlu1 %1137  ;;  %v2512_v62 = vpop.permute.xlu0 %688 }
 0x124   :  { %2860 = vst [vmem:[#allocation14_spill] sm:$0xff] %v2512_v62 }
 0x127   :  { %950 = vmatmul.mubr.bf16.gmra.mxu0 %v1701_v35  ;;  %1014 = vmatmul.mubr.bf16.gmra.mxu1 %v1702_v27  ;;  %v2516_v52 = vpop.permute.xlu0 %698 }
 0x128   :  { %v2506_v14 = vpop.permute.xlu1 %1188  ;;  %2861 = vst [vmem:[#allocation15_spill] sm:$0xff] %v2516_v52 }
 0x12b   :  { %v2520_v32 = vpop.permute.xlu0 %1071 }
 0x12d   :  { %v2510_v42 = vpop.permute.xlu1 %1141 }
 0x12e   :  { %2859 = vst [vmem:[#allocation13_spill] sm:$0xff] %v2510_v42 }
 0x12f   :  { %v2524_v44 = vpop.permute.xlu0 %1081 }
 0x132   :  { %v2514_v22 = vpop.permute.xlu1 %1196 }
 0x133   :  { %v2528_v43 = vpop.permute.xlu0 %1086 }
 0x137   :  { %v2518_v51 = vpop.permute.xlu1 %1145 }
 0x13d   :  { %v2522_v49 = vpop.permute.xlu1 %1200 }
 0x142   :  { %v2526_v34 = vpop.permute.xlu1 %1149 }
 0x143   :  { %2862 = vst [vmem:[#allocation16_spill] sm:$0xff] %v2526_v34 }
 0x147   :  { %v2530_v10 = vpop.permute.xlu1 %1091 }
 0x1af   :  { %v1506_v61 = vpop.f32.mrf.mxu0  ;;  %v1554_v2 = vpop.f32.mrf.mxu1 }
 0x1b1   :  { %v1507_v60 = vpop.f32.mrf.mxu0  ;;  %v1555_v58 = vpop.f32.mrf.mxu1 }
 0x1b2   :  { %v1508_v0 = vadd.f32 %v1507_v60, %v1506_v61  ;;  %v1556_v53 = vadd.f32 %v1555_v58, %v1554_v2 }
 0x1b3   :  { %v1509_v19 = vpop.f32.mrf.mxu0  ;;  %v1557_v33 = vpop.f32.mrf.mxu1 }
 0x1b4   :  { %v896_v11 = vadd.f32 %v1508_v0, %v544_v5  ;;  %v960_v9 = vadd.f32 %v1556_v53, %v624_v40 }
 0x1b5   :  { %v1510_v31 = vpop.f32.mrf.mxu0  ;;  %v1558_v25 = vpop.f32.mrf.mxu1 }
 0x1b6   :  { %v1511_v26 = vadd.f32 %v1510_v31, %v1509_v19  ;;  %v1559_v7 = vadd.f32 %v1558_v25, %v1557_v33  ;;  %v1022_v2 = vmax.f32 %v896_v11, 0.0  ;;  %v1038_v33 = vmax.f32 %v960_v9, 0.0  ;;  %v2533_v31 = vpop.permute.xlu0 %1192 }
 0x1b7   :  { %v1512_v30 = vpop.f32.mrf.mxu0  ;;  %v1560_v55 = vpop.f32.mrf.mxu1  ;;  %2863 = vst [vmem:[#allocation17_spill] sm:$0xff] %v2533_v31 }
 0x1b8   :  { %v899_v13 = vadd.f32 %v1511_v26, %v549_v23  ;;  %v963_v35 = vadd.f32 %v1559_v7, %v629_v37  ;;  %v1104_v7 = vmul.f32 %v2494_v6, %v1022_v2  ;;  %v1164_v11 = vmul.f32 %v2460_v36, %v1022_v2 }
 0x1b9   :  { %v1513_v27 = vpop.f32.mrf.mxu0  ;;  %v1561_v52 = vpop.f32.mrf.mxu1  ;;  %v1311_v9 = vmul.f32 %v2494_v6, %v1038_v33 }
 0x1ba   :  { %v1514_v61 = vadd.f32 %v1513_v27, %v1512_v30  ;;  %v1562_v60 = vadd.f32 %v1561_v52, %v1560_v55  ;;  %v1023_v58 = vmax.f32 %v899_v13, 0.0  ;;  %v1039_v29 = vmax.f32 %v963_v35, 0.0 }
 0x1bb   :  { %v1515_v15 = vpop.f32.mrf.mxu0  ;;  %v1563_v19 = vpop.f32.mrf.mxu1  ;;  %v1334_v13 = vmul.f32 %v2460_v36, %v1038_v33  ;;  %v1357_v35 = vmul.f32 %v2506_v14, %v1038_v33 }
 0x1bc   :  { %v904_v5 = vadd.f32 %v1514_v61, %v2450_v28  ;;  %v968_v0 = vadd.f32 %v1562_v60, %v634_v50  ;;  %v1105_v23 = vmul.f32 %v2520_v32, %v1023_v58  ;;  %v1165_v40 = vmul.f32 %v2502_v54, %v1023_v58  ;;  %v2546_v61 = vpop.permute.xlu1 %1153 }
 0x1bd   :  { %v1516_v37 = vpop.f32.mrf.mxu0  ;;  %v1564_v53 = vpop.f32.mrf.mxu1  ;;  %v1312_v52 = vmul.f32 %v2520_v32, %v1039_v29  ;;  %v1335_v25 = vmul.f32 %v2502_v54, %v1039_v29  ;;  %v1219_v28 = vmul.f32 %v2506_v14, %v1022_v2  ;;  %v1220_v27 = vmul.f32 %v2533_v31, %v1023_v58 }
 0x1be   :  { %v1024_v26 = vmax.f32 %v904_v5, 0.0  ;;  %v1040_v50 = vmax.f32 %v968_v0, 0.0  ;;  %v1112_v60 = vadd.f32 %v1105_v23, %v1104_v7  ;;  %v1172_v5 = vadd.f32 %v1165_v40, %v1164_v11 }
 0x1bf   :  { %v1518_v30 = vpop.f32.mrf.mxu0  ;;  %v1566_v55 = vpop.f32.mrf.mxu1  ;;  %v1358_v39 = vmul.f32 %v2533_v31, %v1039_v29  ;;  %v1319_v45 = vadd.f32 %v1312_v52, %v1311_v9  ;;  %v1342_v63 = vadd.f32 %v1335_v25, %v1334_v13  ;;  %v1517_v59 = vadd.f32 %v1516_v37, %v1515_v15 }
 0x1c0   :  { %v1106_v62 = vmul.f32 %v2498_v21, %v1024_v26  ;;  %v1166_v41 = vmul.f32 %v2510_v42, %v1024_v26  ;;  %v1221_v57 = vmul.f32 %v2514_v22, %v1024_v26  ;;  %v1313_v33 = vmul.f32 %v2498_v21, %v1040_v50 }
 0x1c1   :  { %v1519_v2 = vpop.f32.mrf.mxu0  ;;  %v1567_v0 = vpop.f32.mrf.mxu1  ;;  %v1336_v58 = vmul.f32 %v2510_v42, %v1040_v50  ;;  %v1565_v20 = vadd.f32 %v1564_v53, %v1563_v19  ;;  %v1359_v7 = vmul.f32 %v2514_v22, %v1040_v50  ;;  %v907_v29 = vadd.f32 %v1517_v59, %v2466_v8 }
 0x1c2   :  { %v1520_v11 = vadd.f32 %v1519_v2, %v1518_v30  ;;  %v1568_v31 = vadd.f32 %v1567_v0, %v1566_v55  ;;  %v1113_v52 = vadd.f32 %v1112_v60, %v1106_v62  ;;  %v1227_v25 = vadd.f32 %v1220_v27, %v1219_v28  ;;  %v2559_v53 = vpop.permute.xlu0 %1204  ;;  %v2561_v50 = vpop.permute.xlu1 %1096 }
 0x1c3   :  { %v1521_v23 = vpop.f32.mrf.mxu0  ;;  %v1569_v40 = vpop.f32.mrf.mxu1  ;;  %v1365_v9 = vadd.f32 %v1358_v39, %v1357_v35  ;;  %v971_v15 = vadd.f32 %v1565_v20, %v2492_v47  ;;  %v1173_v13 = vadd.f32 %v1172_v5, %v1166_v41  ;;  %v1025_v21 = vmax.f32 %v907_v29, 0.0 }
 0x1c4   :  { %v912_v42 = vadd.f32 %v1520_v11, %v2452_v38  ;;  %v976_v19 = vadd.f32 %v1568_v31, %v2472_v12  ;;  %v1320_v8 = vadd.f32 %v1319_v45, %v1313_v33  ;;  %v1228_v59 = vadd.f32 %v1227_v25, %v1221_v57 }
 0x1c5   :  { %v1522_v37 = vpop.f32.mrf.mxu0  ;;  %v1570_v26 = vpop.f32.mrf.mxu1  ;;  %v1041_v30 = vmax.f32 %v971_v15, 0.0  ;;  %v1107_v20 = vmul.f32 %v2524_v44, %v1025_v21  ;;  %v1167_v47 = vmul.f32 %v2518_v51, %v1025_v21  ;;  %v1222_v41 = vmul.f32 %v2522_v49, %v1025_v21 }
 0x1c6   :  { %v1523_v62 = vadd.f32 %v1522_v37, %v1521_v23  ;;  %v1026_v55 = vmax.f32 %v912_v42, 0.0  ;;  %v1042_v31 = vmax.f32 %v976_v19, 0.0  ;;  %v1571_v35 = vadd.f32 %v1570_v26, %v1569_v40 }
 0x1c7   :  { %v1524_v28 = vpop.f32.mrf.mxu0  ;;  %v1572_v39 = vpop.f32.mrf.mxu1  ;;  %v1314_v38 = vmul.f32 %v2524_v44, %v1041_v30  ;;  %v1337_v12 = vmul.f32 %v2518_v51, %v1041_v30  ;;  %v1343_v57 = vadd.f32 %v1342_v63, %v1336_v58  ;;  %v1366_v60 = vadd.f32 %v1365_v9, %v1359_v7 }
 0x1c8   :  { %v1360_v5 = vmul.f32 %v2522_v49, %v1041_v30  ;;  %v1108_v2 = vmul.f32 %v2528_v43, %v1026_v55  ;;  %v1114_v0 = vadd.f32 %v1113_v52, %v1107_v20  ;;  %v1174_v33 = vadd.f32 %v1173_v13, %v1167_v47  ;;  %v2574_v63 = vpop.permute.xlu0 %1208  ;;  %v2576_v58 = vpop.permute.xlu1 %1212 }
 0x1c9   :  { %v1525_v27 = vpop.f32.mrf.mxu0  ;;  %v1573_v45 = vpop.f32.mrf.mxu1  ;;  %v1229_v23 = vadd.f32 %v1228_v59, %v1222_v41  ;;  %v1168_v21 = vmul.f32 %v2526_v34, %v1026_v55  ;;  %v1321_v11 = vadd.f32 %v1320_v8, %v1314_v38  ;;  %v1315_v25 = vmul.f32 %v2528_v43, %v1042_v31  ;;  %2864 = vst [vmem:[#allocation18_spill] sm:$0xff] %v2576_v58 }
 0x1ca   :  { %v1338_v40 = vmul.f32 %v2526_v34, %v1042_v31  ;;  %v915_v15 = vadd.f32 %v1523_v62, %v2468_v24  ;;  %v1344_v7 = vadd.f32 %v1343_v57, %v1337_v12  ;;  %v979_v52 = vadd.f32 %v1571_v35, %v2496_v16 }
 0x1cb   :  { %v1527_v42 = vpop.f32.mrf.mxu0  ;;  %v1575_v29 = vpop.f32.mrf.mxu1  ;;  %v1223_v9 = vmul.f32 %v2559_v53, %v1026_v55  ;;  %v1361_v37 = vmul.f32 %v2559_v53, %v1042_v31  ;;  %v1367_v19 = vadd.f32 %v1366_v60, %v1360_v5  ;;  %v1115_v8 = vadd.f32 %v1114_v0, %v1108_v2 }
 0x1cc   :  { %v1027_v59 = vmax.f32 %v915_v15, 0.0  ;;  %v1526_v30 = vadd.f32 %v1525_v27, %v1524_v28  ;;  %v1175_v20 = vadd.f32 %v1174_v33, %v1168_v21  ;;  %v1322_v47 = vadd.f32 %v1321_v11, %v1315_v25  ;;  %v2589_v0 = vpop.permute.xlu0 %1157 }
 0x1cd   :  { %v1528_v26 = vpop.f32.mrf.mxu0  ;;  %v1576_v13 = vpop.f32.mrf.mxu1  ;;  %v1043_v24 = vmax.f32 %v979_v52, 0.0  ;;  %v1574_v62 = vadd.f32 %v1573_v45, %v1572_v39  ;;  %v1345_v34 = vadd.f32 %v1344_v7, %v1338_v40  ;;  %v1230_v35 = vadd.f32 %v1229_v23, %v1223_v9 }
 0x1ce   :  { %v1109_v12 = vmul.f32 %v2530_v10, %v1027_v59  ;;  %v920_v16 = vadd.f32 %v1526_v30, %v2454_v1  ;;  %v1224_v55 = vmul.f32 %v2574_v63, %v1027_v59  ;;  %v1368_v57 = vadd.f32 %v1367_v19, %v1361_v37  ;;  %v2591_v1 = vpop.permute.xlu1 %1101 }
 0x1cf   :  { %v1530_v41 = vpop.f32.mrf.mxu0  ;;  %v1578_v38 = vpop.f32.mrf.mxu1  ;;  %v1316_v31 = vmul.f32 %v2530_v10, %v1043_v24  ;;  %v984_v60 = vadd.f32 %v1574_v62, %v2476_v56  ;;  %v1169_v5 = vmul.f32 %v2546_v61, %v1027_v59  ;;  %v1339_v39 = vmul.f32 %v2546_v61, %v1043_v24  ;;  %2865 = vst [vmem:[#allocation19_spill] sm:$0xff] %v2591_v1 }
 0x1d0   :  { %v1028_v45 = vmax.f32 %v920_v16, 0.0  ;;  %v1362_v2 = vmul.f32 %v2574_v63, %v1043_v24  ;;  %v1116_v33 = vadd.f32 %v1115_v8, %v1109_v12  ;;  %v1231_v23 = vadd.f32 %v1230_v35, %v1224_v55 }
 0x1d1   :  { %v1531_v28 = vpop.f32.mrf.mxu0  ;;  %v1579_v27 = vpop.f32.mrf.mxu1  ;;  %v1323_v21 = vadd.f32 %v1322_v47, %v1316_v31  ;;  %v1044_v11 = vmax.f32 %v984_v60, 0.0  ;;  %v1529_v7 = vadd.f32 %v1528_v26, %v1527_v42  ;;  %v1577_v52 = vadd.f32 %v1576_v13, %v1575_v29 }
 0x1d2   :  { %v1110_v56 = vmul.f32 %v2561_v50, %v1028_v45  ;;  %v1225_v15 = vmul.f32 %v2576_v58, %v1028_v45  ;;  %v1170_v19 = vmul.f32 %v2589_v0, %v1028_v45  ;;  %v1176_v47 = vadd.f32 %v1175_v20, %v1169_v5 }
 0x1d3   :  { %v1533_v25 = vpop.f32.mrf.mxu0  ;;  %v1581_v40 = vpop.f32.mrf.mxu1  ;;  %v1317_v9 = vmul.f32 %v2561_v50, %v1044_v11  ;;  %v1363_v37 = vmul.f32 %v2576_v58, %v1044_v11  ;;  %v1340_v59 = vmul.f32 %v2589_v0, %v1044_v11  ;;  %v1346_v24 = vadd.f32 %v1345_v34, %v1339_v39 }
 0x1d4   :  { %v923_v62 = vadd.f32 %v1529_v7, %v2470_v46  ;;  %v987_v12 = vadd.f32 %v1577_v52, %v2500_v48  ;;  %v1117_v16 = vadd.f32 %v1116_v33, %v1110_v56  ;;  %v1369_v42 = vadd.f32 %v1368_v57, %v1362_v2  ;;  %v2603_v11 = vpop.permute.xlu0 %1161  ;;  %v2605_v58 = vpop.permute.xlu1 %1216 }
 0x1d5   :  { %v1534_v8 = vpop.f32.mrf.mxu0  ;;  %v1582_v30 = vpop.f32.mrf.mxu1  ;;  %v1324_v55 = vadd.f32 %v1323_v21, %v1317_v9  ;;  %v1232_v29 = vadd.f32 %v1231_v23, %v1225_v15  ;;  %v1532_v60 = vadd.f32 %v1531_v28, %v1530_v41  ;;  %v1580_v45 = vadd.f32 %v1579_v27, %v1578_v38  ;;  %2866 = vst [vmem:[#allocation20_spill] sm:$0xff] %v2603_v11 }
 0x1d6   :  { %v1029_v31 = vmax.f32 %v923_v62, 0.0  ;;  %v1045_v35 = vmax.f32 %v987_v12, 0.0  ;;  %2867 = vst [vmem:[#allocation21_spill] sm:$0xff] %v2605_v58  ;;  %v1370_v34 = vadd.f32 %v1369_v42, %v1363_v37  ;;  %v1177_v20 = vadd.f32 %v1176_v47, %v1170_v19 }
 0x1d7   :  { %v1536_v26 = vpop.f32.mrf.mxu0  ;;  %v2601_v13 = vpop.f32.mrf.mxu1  ;;  %v1347_v46 = vadd.f32 %v1346_v24, %v1340_v59  ;;  %v1535_v5 = vadd.f32 %v1534_v8, %v1533_v25  ;;  %v928_v33 = vadd.f32 %v1532_v60, %v2456_v17  ;;  %v992_v41 = vadd.f32 %v1580_v45, %v2480_v18 }
 0x1d8   :  { %v1111_v57 = vmul.f32 %v2591_v1, %v1029_v31  ;;  %v1318_v2 = vmul.f32 %v2591_v1, %v1045_v35  ;;  %v1171_v38 = vmul.f32 %v2603_v11, %v1029_v31  ;;  %v1341_v28 = vmul.f32 %v2603_v11, %v1045_v35 }
 0x1d9   :  { %v1537_v48 = vpop.f32.mrf.mxu0  ;;  %v2607_v39 = vpop.f32.mrf.mxu1  ;;  %v1226_v27 = vmul.f32 %v2605_v58, %v1029_v31  ;;  %v1364_v21 = vmul.f32 %v2605_v58, %v1045_v35  ;;  %v1030_v7 = vmax.f32 %v928_v33, 0.0  ;;  %v1046_v52 = vmax.f32 %v992_v41, 0.0 }
 0x1da   :  { %v1118_v56 = vadd.f32 %v1117_v16, %v1111_v57  ;;  %v1325_v15 = vadd.f32 %v1324_v55, %v1318_v2  ;;  %v1178_v9 = vadd.f32 %v1177_v20, %v1171_v38  ;;  %v1348_v17 = vadd.f32 %v1347_v46, %v1341_v28 }
 0x1db   :  { %v2617_v23 = vpop.f32.mrf.mxu0  ;;  %v2619_v25 = vpop.f32.mrf.mxu1  ;;  %v1233_v37 = vadd.f32 %v1232_v29, %v1226_v27  ;;  %v1583_v18 = vadd.f32 %v1582_v30, %v1581_v40  ;;  %v2625_v24 = vadd.f32 %v1370_v34, %v1364_v21  ;;  %v1242_v62 = vmul.f32 %v2494_v6, %v1030_v7 }
 0x1dc   :  { %v1119_v8 = vrot.slane %v1118_v56, 4  ;;  %v1326_v47 = vrot.slane %v1325_v15, 4  ;;  %v1265_v12 = vmul.f32 %v2460_v36, %v1030_v7  ;;  %v1288_v16 = vmul.f32 %v2506_v14, %v1030_v7 }
 0x1dd   :  { %v2621_v19 = vpop.f32.mrf.mxu0  ;;  %v2623_v59 = vpop.f32.mrf.mxu1  ;;  %v1385_v55 = vmul.f32 %v2494_v6, %v1046_v52  ;;  %v1179_v31 = vrot.slane %v1178_v9, 4  ;;  %v1349_v35 = vrot.slane %v1348_v17, 4  ;;  %v2636_v60 = vmul.f32 %v2460_v36, %v1046_v52 }
 0x1de   :  { %v1120_v40 = vadd.f32 %v1119_v8, %v1118_v56  ;;  %v1327_v30 = vadd.f32 %v1326_v47, %v1325_v15  ;;  %v1234_v45 = vrot.slane %v1233_v37, 4  ;;  %v931_v34 = vadd.f32 %v1535_v5, %v2474_v4  ;;  %v2868_v5 = vld [vmem:[#allocation17_spill] sm:$0xff] }
 0x1df   :  { %v2631_v42 = vpop.f32.mrf.mxu0  ;;  %v2633_v29 = vpop.f32.mrf.mxu1  ;;  %v995_v20 = vadd.f32 %v1583_v18, %v2504_v3  ;;  %v1180_v33 = vadd.f32 %v1179_v31, %v1178_v9  ;;  %v1350_v41 = vadd.f32 %v1349_v35, %v1348_v17  ;;  %v1538_v21 = vadd.f32 %v1537_v48, %v1536_v26 }
 0x1e0   :  { %v1121_v2 = vrot.slane %v1120_v40, 2  ;;  %v1328_v6 = vrot.slane %v1327_v30, 2  ;;  %v1235_v38 = vadd.f32 %v1234_v45, %v1233_v37  ;;  %v1031_v28 = vmax.f32 %v931_v34, 0.0 }
 0x1e1   :  { %v1543_v46 = vpop.f32.mrf.mxu0  ;;  %v1591_v57 = vpop.f32.mrf.mxu1  ;;  %v1047_v27 = vmax.f32 %v995_v20, 0.0  ;;  %v1181_v7 = vrot.slane %v1180_v33, 2  ;;  %v1351_v36 = vrot.slane %v1350_v41, 2  ;;  %v1431_v26 = vmul.f32 %v2506_v14, %v1046_v52  ;;  %v2869_v52 = vld [vmem:[#allocation6_spill] sm:$0xff] }
 0x1e2   :  { %v1122_v56 = vadd.f32 %v1121_v2, %v1120_v40  ;;  %v1329_v15 = vadd.f32 %v1328_v6, %v1327_v30  ;;  %v1236_v47 = vrot.slane %v1235_v38, 2  ;;  %v1243_v4 = vmul.f32 %v2520_v32, %v1031_v28 }
 0x1e3   :  { %v2640_v8 = vpop.f32.mrf.mxu0  ;;  %v1266_v3 = vmul.f32 %v2502_v54, %v1031_v28  ;;  %v1289_v18 = vmul.f32 %v2868_v5, %v1031_v28  ;;  %v2645_v58 = vpop.f32.mrf.mxu1  ;;  %v1182_v37 = vadd.f32 %v1181_v7, %v1180_v33  ;;  %v1352_v31 = vadd.f32 %v1351_v36, %v1350_v41 }
 0x1e4   :  { %v1123_v9 = vrot.slane %v1122_v56, 1  ;;  %v1330_v17 = vrot.slane %v1329_v15, 1  ;;  %v1237_v48 = vadd.f32 %v1236_v47, %v1235_v38  ;;  %v1372_v40 = vrot.slane %v2625_v24, 4 }
 0x1e5   :  { %v1250_v30 = vadd.f32 %v1243_v4, %v1242_v62  ;;  %v1183_v35 = vrot.slane %v1182_v37, 1  ;;  %v1353_v45 = vrot.slane %v1352_v31, 1  ;;  %v1273_v34 = vadd.f32 %v1266_v3, %v1265_v12  ;;  %v2649_v2 = vpop.f32.mrf.mxu0  ;;  %v2654_v33 = vpop.f32.mrf.mxu1 }
 0x1e6   :  { %v1296_v20 = vadd.f32 %v1289_v18, %v1288_v16  ;;  %v1124_v6 = vadd.f32 %v1123_v9, %v1122_v56  ;;  %v2651_v28 = vadd.f32 %v1330_v17, %v1329_v15  ;;  %v1238_v11 = vrot.slane %v1237_v48, 1  ;;  %v2660_v12 = vpop.permute.xlu0 %1127  ;;  %v2874_v9 = vld [vmem:[#allocation12_spill] sm:$0xff] }
 0x1e7   :  { %v1386_v1 = vmul.f32 %v2520_v32, %v1047_v27  ;;  %v1184_v41 = vadd.f32 %v1183_v35, %v1182_v37  ;;  %v1409_v14 = vmul.f32 %v2502_v54, %v1047_v27  ;;  %v936_v38 = vadd.f32 %v1538_v21, %v2869_v52  ;;  %v2870_v32 = vld [vmem:[#allocation11_spill] sm:$0xff]  ;;  %v2670_v21 = vpop.f32.mrf.mxu0 }
 0x1e8   :  { %v1586_v62 = vadd.f32 %v2607_v39, %v2601_v13  ;;  %v2662_v16 = vadd.f32 %v1353_v45, %v1352_v31  ;;  %v1239_v56 = vadd.f32 %v1238_v11, %v1237_v48  ;;  %v1432_v7 = vmul.f32 %v2868_v5, %v1047_v27  ;;  %v2871_v27 = vld [vmem:[#allocation8_spill] sm:$0xff]  ;;  %v2872_v5 = vld [vmem:[#allocation13_spill] sm:$0xff] }
 0x1e9   :  { %v1393_v15 = vadd.f32 %v1386_v1, %v1385_v55  ;;  %v1032_v36 = vmax.f32 %v936_v38, 0.0  ;;  %v1541_v4 = vadd.f32 %v2621_v19, %v2617_v23  ;;  %v1589_v54 = vadd.f32 %v2623_v59, %v2619_v25  ;;  %v2676_v55 = vpop.f32.mrf.mxu1  ;;  %v2873_v25 = vld [vmem:[#allocation3_spill] sm:$0xff]  ;;  %v1549_v45 = vpop.f32.mrf.mxu0 }
 0x1ea   :  { %v1000_v47 = vadd.f32 %v1586_v62, %v2870_v32  ;;  %v1544_v13 = vadd.f32 %v1543_v46, %v2631_v42  ;;  %v1592_v39 = vadd.f32 %v1591_v57, %v2633_v29  ;;  %v1130_v11 = vadd.f32 %v2660_v12, %v1124_v6  ;;  %v2875_v42 = vld [vmem:[#allocation5_spill] sm:$0xff] }
 0x1eb   :  { %v1185_v1 = vadd.f32 %v1184_v41, %v2660_v12  ;;  %v1244_v3 = vmul.f32 %v2871_v27, %v1032_v36  ;;  %v1267_v18 = vmul.f32 %v2872_v5, %v1032_v36  ;;  %v1290_v23 = vmul.f32 %v2514_v22, %v1032_v36  ;;  %v2876_v29 = vld [vmem:[#allocation9_spill] sm:$0xff]  ;;  %v1597_v62 = vpop.f32.mrf.mxu1 }
 0x1ec   :  { %v1048_v19 = vmax.f32 %v1000_v47, 0.0  ;;  %v939_v59 = vadd.f32 %v1541_v4, %v2873_v25  ;;  %v1003_v17 = vadd.f32 %v1589_v54, %v2874_v9  ;;  %v944_v46 = vadd.f32 %v1544_v13, %v2875_v42  ;;  %1131 = vst [vmem:[%s2791_s7] sm:$0x1] %v1130_v11 }
 0x1ed   :  { %v1008_v57 = vadd.f32 %v1592_v39, %v2876_v29  ;;  %1186 = vst [vmem:[%s2791_s7] sm:$0x2] %v1185_v1  ;;  %v1416_v37 = vadd.f32 %v1409_v14, %v2636_v60  ;;  %v1439_v31 = vadd.f32 %v1432_v7, %v1431_v26  ;;  %v1251_v48 = vadd.f32 %v1250_v30, %v1244_v3  ;;  %v2877_v39 = vld [vmem:[#allocation16_spill] sm:$0xff]  ;;  %v1599_v1 = vpop.f32.mrf.mxu1 }
 0x1ee   :  { %v1387_v35 = vmul.f32 %v2871_v27, %v1048_v19  ;;  %v1410_v6 = vmul.f32 %v2872_v5, %v1048_v19  ;;  %v1433_v41 = vmul.f32 %v2514_v22, %v1048_v19  ;;  %v1033_v52 = vmax.f32 %v939_v59, 0.0 }
 0x1ef   :  { %v1049_v38 = vmax.f32 %v1003_v17, 0.0  ;;  %v1274_v36 = vadd.f32 %v1273_v34, %v1267_v18  ;;  %v1297_v32 = vadd.f32 %v1296_v20, %v1290_v23  ;;  %v1034_v47 = vmax.f32 %v944_v46, 0.0  ;;  %v1551_v34 = vpop.f32.mrf.mxu0 }
 0x1f0   :  { %v1240_v4 = vadd.f32 %v1239_v56, %v2660_v12  ;;  %v1394_v54 = vadd.f32 %v1393_v15, %v1387_v35  ;;  %v1245_v60 = vmul.f32 %v2524_v44, %v1033_v52  ;;  %v1268_v26 = vmul.f32 %v2518_v51, %v1033_v52 }
 0x1f1   :  { %v1050_v30 = vmax.f32 %v1008_v57, 0.0  ;;  %v1291_v14 = vmul.f32 %v2522_v49, %v1033_v52  ;;  %v1388_v7 = vmul.f32 %v2524_v44, %v1049_v38  ;;  %v1411_v22 = vmul.f32 %v2518_v51, %v1049_v38  ;;  %v1552_v9 = vpop.f32.mrf.mxu0  ;;  %v1600_v57 = vpop.f32.mrf.mxu1 }
 0x1f2   :  { %v1434_v13 = vmul.f32 %v2522_v49, %v1049_v38  ;;  %1241 = vst [vmem:[%s2791_s7] sm:$0x4] %v1240_v4  ;;  %v1417_v20 = vadd.f32 %v1416_v37, %v1410_v6  ;;  %v1440_v56 = vadd.f32 %v1439_v31, %v1433_v41  ;;  %v1246_v15 = vmul.f32 %v2528_v43, %v1034_v47  ;;  %v2880_v6 = vld [vmem:[#allocation2_spill] sm:$0xff] }
 0x1f3   :  { %v1269_v11 = vmul.f32 %v2877_v39, %v1034_v47  ;;  %v1252_v27 = vadd.f32 %v1251_v48, %v1245_v60  ;;  %v1275_v3 = vadd.f32 %v1274_v36, %v1268_v26  ;;  %v1298_v5 = vadd.f32 %v1297_v32, %v1291_v14  ;;  %v2879_v48 = vld [vmem:[#allocation14_spill] sm:$0xff]  ;;  %v2739_v14 = vpop.permute.xlu1 %1380 }
 0x1f4   :  { %v1395_v44 = vadd.f32 %v1394_v54, %v1388_v7  ;;  %v1418_v18 = vadd.f32 %v1417_v20, %v1411_v22  ;;  %v1441_v51 = vadd.f32 %v1440_v56, %v1434_v13  ;;  %v1292_v49 = vmul.f32 %v2559_v53, %v1034_v47  ;;  %v2881_v47 = vld [vmem:[#allocation7_spill] sm:$0xff] }
 0x1f5   :  { %v1253_v23 = vadd.f32 %v1252_v27, %v1246_v15  ;;  %v1389_v19 = vmul.f32 %v2528_v43, %v1050_v30  ;;  %v1332_v25 = vadd.f32 %v2651_v28, %v2660_v12  ;;  %v1355_v59 = vadd.f32 %v2662_v16, %v2660_v12  ;;  %v2878_v16 = vld [vmem:[#allocation10_spill] sm:$0xff]  ;;  %v2883_v54 = vld [vmem:[#allocation15_spill] sm:$0xff] }
 0x1f6   :  { %v1276_v17 = vadd.f32 %v1275_v3, %v1269_v11  ;;  %v1412_v42 = vmul.f32 %v2877_v39, %v1050_v30  ;;  %v1373_v46 = vadd.f32 %v1372_v40, %v2625_v24  ;;  %v1547_v29 = vadd.f32 %v2649_v2, %v2640_v8 }
 0x1f7   :  { %v1299_v37 = vadd.f32 %v1298_v5, %v1292_v49  ;;  %v1435_v43 = vmul.f32 %v2559_v53, %v1050_v30  ;;  %1333 = vst [vmem:[%s2791_s7] sm:$0x40] %v1332_v25  ;;  %1356 = vst [vmem:[%s2791_s7] sm:$0x80] %v1355_v59  ;;  %v1595_v28 = vadd.f32 %v2654_v33, %v2645_v58 }
 0x1f8   :  { %v1550_v24 = vadd.f32 %v1549_v45, %v2670_v21  ;;  %v1374_v40 = vrot.slane %v1373_v46, 2  ;;  %v947_v8 = vadd.f32 %v1547_v29, %v2878_v16  ;;  %v1598_v2 = vadd.f32 %v1597_v62, %v2676_v55  ;;  %v2882_v21 = vld [vmem:[#allocation4_spill] sm:$0xff] }
 0x1f9   :  { %v1553_v31 = vadd.f32 %v1552_v9, %v1551_v34  ;;  %v1396_v53 = vadd.f32 %v1395_v44, %v1389_v19  ;;  %v1011_v35 = vadd.f32 %v1595_v28, %v2879_v48  ;;  %v1601_v52 = vadd.f32 %v1600_v57, %v1599_v1  ;;  %v2887_v57 = vld [vmem:[#allocation21_spill] sm:$0xff] }
 0x1fa   :  { %v952_v41 = vadd.f32 %v1550_v24, %v2880_v6  ;;  %v1419_v38 = vadd.f32 %v1418_v18, %v1412_v42  ;;  %v1375_v36 = vadd.f32 %v1374_v40, %v1373_v46  ;;  %v1035_v32 = vmax.f32 %v947_v8, 0.0  ;;  %v2884_v18 = vld [vmem:[#allocation18_spill] sm:$0xff]  ;;  %v2886_v46 = vld [vmem:[#allocation20_spill] sm:$0xff] }
 0x1fb   :  { %v1016_v4 = vadd.f32 %v1598_v2, %v2881_v47  ;;  %v1051_v58 = vmax.f32 %v1011_v35, 0.0  ;;  %v955_v45 = vadd.f32 %v1553_v31, %v2882_v21  ;;  %v1019_v60 = vadd.f32 %v1601_v52, %v2883_v54 }
 0x1fc   :  { %v1036_v33 = vmax.f32 %v952_v41, 0.0  ;;  %v1376_v26 = vrot.slane %v1375_v36, 1  ;;  %v1247_v55 = vmul.f32 %v2530_v10, %v1035_v32  ;;  %v1270_v62 = vmul.f32 %v2546_v61, %v1035_v32 }
 0x1fd   :  { %v1293_v30 = vmul.f32 %v2574_v63, %v1035_v32  ;;  %v1390_v7 = vmul.f32 %v2530_v10, %v1051_v58  ;;  %v1413_v22 = vmul.f32 %v2546_v61, %v1051_v58  ;;  %v1436_v13 = vmul.f32 %v2574_v63, %v1051_v58 }
 0x1fe   :  { %v1248_v34 = vmul.f32 %v2561_v50, %v1036_v33  ;;  %v1442_v20 = vadd.f32 %v1441_v51, %v1435_v43  ;;  %v1377_v56 = vadd.f32 %v1376_v26, %v1375_v36  ;;  %v1254_v15 = vadd.f32 %v1253_v23, %v1247_v55 }
 0x1ff   :  { %v1277_v39 = vadd.f32 %v1276_v17, %v1270_v62  ;;  %v1300_v11 = vadd.f32 %v1299_v37, %v1293_v30  ;;  %v1397_v1 = vadd.f32 %v1396_v53, %v1390_v7  ;;  %v1420_v27 = vadd.f32 %v1419_v38, %v1413_v22  ;;  %v2885_v17 = vld [vmem:[#allocation19_spill] sm:$0xff] }
 0x200   :  { %v1271_v3 = vmul.f32 %v2589_v0, %v1036_v33  ;;  %v1383_v5 = vadd.f32 %v2739_v14, %v1377_v56  ;;  %v1443_v44 = vadd.f32 %v1442_v20, %v1436_v13  ;;  %v1294_v10 = vmul.f32 %v2884_v18, %v1036_v33 }
 0x201   :  { %v1052_v49 = vmax.f32 %v1016_v4, 0.0  ;;  %v1255_v61 = vadd.f32 %v1254_v15, %v1248_v34  ;;  %v1037_v63 = vmax.f32 %v955_v45, 0.0  ;;  %v1053_v25 = vmax.f32 %v1019_v60, 0.0 }
 0x202   :  { %v1278_v19 = vadd.f32 %v1277_v39, %v1271_v3  ;;  %1384 = vst [vmem:[%s2791_s7 + $0x8] sm:$0x1] %v1383_v5  ;;  %v1301_v51 = vadd.f32 %v1300_v11, %v1294_v10 }
 0x203   :  { %v1391_v23 = vmul.f32 %v2561_v50, %v1052_v49  ;;  %v1414_v59 = vmul.f32 %v2589_v0, %v1052_v49  ;;  %v1437_v9 = vmul.f32 %v2884_v18, %v1052_v49  ;;  %v1249_v42 = vmul.f32 %v2885_v17, %v1037_v63 }
 0x204   :  { %v1272_v29 = vmul.f32 %v2886_v46, %v1037_v63  ;;  %v1295_v37 = vmul.f32 %v2887_v57, %v1037_v63  ;;  %v1392_v43 = vmul.f32 %v2885_v17, %v1053_v25  ;;  %v1415_v16 = vmul.f32 %v2886_v46, %v1053_v25 }
 0x205   :  { %v1398_v28 = vadd.f32 %v1397_v1, %v1391_v23  ;;  %v1421_v24 = vadd.f32 %v1420_v27, %v1414_v59  ;;  %v1444_v40 = vadd.f32 %v1443_v44, %v1437_v9  ;;  %v1256_v8 = vadd.f32 %v1255_v61, %v1249_v42 }
 0x206   :  { %v1279_v2 = vadd.f32 %v1278_v19, %v1272_v29  ;;  %v1302_v50 = vadd.f32 %v1301_v51, %v1295_v37  ;;  %v1438_v0 = vmul.f32 %v2887_v57, %v1053_v25 }
 0x207   :  { %v1399_v31 = vadd.f32 %v1398_v28, %v1392_v43  ;;  %v1422_v53 = vadd.f32 %v1421_v24, %v1415_v16  ;;  %v1257_v48 = vrot.slane %v1256_v8, 4 }
 0x208   :  { %v1280_v35 = vrot.slane %v1279_v2, 4  ;;  %v1303_v6 = vrot.slane %v1302_v50, 4  ;;  %v1445_v41 = vadd.f32 %v1444_v40, %v1438_v0 }
 0x209   :  { %v1400_v52 = vrot.slane %v1399_v31, 4  ;;  %v1423_v38 = vrot.slane %v1422_v53, 4  ;;  %v1258_v36 = vadd.f32 %v1257_v48, %v1256_v8 }
 0x20a   :  { %v1281_v32 = vadd.f32 %v1280_v35, %v1279_v2  ;;  %v1304_v47 = vadd.f32 %v1303_v6, %v1302_v50  ;;  %v1446_v4 = vrot.slane %v1445_v41, 4 }
 0x20b   :  { %v1401_v58 = vadd.f32 %v1400_v52, %v1399_v31  ;;  %v1424_v33 = vadd.f32 %v1423_v38, %v1422_v53  ;;  %v1259_v21 = vrot.slane %v1258_v36, 2 }
 0x20c   :  { %v1282_v45 = vrot.slane %v1281_v32, 2  ;;  %v1305_v54 = vrot.slane %v1304_v47, 2  ;;  %v1447_v60 = vadd.f32 %v1446_v4, %v1445_v41 }
 0x20d   :  { %v1402_v26 = vrot.slane %v1401_v58, 2  ;;  %v1425_v55 = vrot.slane %v1424_v33, 2  ;;  %v1260_v62 = vadd.f32 %v1259_v21, %v1258_v36 }
 0x20e   :  { %v1283_v30 = vadd.f32 %v1282_v45, %v1281_v32  ;;  %v1306_v7 = vadd.f32 %v1305_v54, %v1304_v47  ;;  %v1448_v22 = vrot.slane %v1447_v60, 2 }
 0x20f   :  { %v1403_v13 = vadd.f32 %v1402_v26, %v1401_v58  ;;  %v1426_v34 = vadd.f32 %v1425_v55, %v1424_v33  ;;  %v1261_v20 = vrot.slane %v1260_v62, 1 }
 0x210   :  { %v1284_v56 = vrot.slane %v1283_v30, 1  ;;  %v1307_v15 = vrot.slane %v1306_v7, 1  ;;  %v1449_v39 = vadd.f32 %v1448_v22, %v1447_v60 }
 0x211   :  { %v1404_v11 = vrot.slane %v1403_v13, 1  ;;  %v1427_v1 = vrot.slane %v1426_v34, 1  ;;  %v1262_v27 = vadd.f32 %v1261_v20, %v1260_v62 }
 0x212   :  { %v1285_v3 = vadd.f32 %v1284_v56, %v1283_v30  ;;  %v1308_v5 = vadd.f32 %v1307_v15, %v1306_v7  ;;  %v1450_v44 = vrot.slane %v1449_v39, 1 }
 0x213   :  { %v1405_v18 = vadd.f32 %v1404_v11, %v1403_v13  ;;  %v1428_v10 = vadd.f32 %v1427_v1, %v1426_v34  ;;  %v1263_v49 = vadd.f32 %v1262_v27, %v2660_v12 }
 0x214   :  { %v1286_v61 = vadd.f32 %v1285_v3, %v2660_v12  ;;  %v1309_v19 = vadd.f32 %v1308_v5, %v2660_v12  ;;  %v1451_v63 = vadd.f32 %v1450_v44, %v1449_v39 }
 0x215   :  { %v1406_v25 = vadd.f32 %v1405_v18, %v2739_v14  ;;  %v1429_v51 = vadd.f32 %v1428_v10, %v2739_v14  ;;  %1264 = vst [vmem:[%s2791_s7] sm:$0x8] %v1263_v49 }
 0x216   :  { %1287 = vst [vmem:[%s2791_s7] sm:$0x10] %v1286_v61  ;;  %1310 = vst [vmem:[%s2791_s7] sm:$0x20] %v1309_v19  ;;  %v1452_v23 = vadd.f32 %v1451_v63, %v2739_v14 }
 0x217   :  { %1407 = vst [vmem:[%s2791_s7 + $0x8] sm:$0x2] %v1406_v25  ;;  %1430 = vst [vmem:[%s2791_s7 + $0x8] sm:$0x4] %v1429_v51 }
 0x218   :  { %1453 = vst [vmem:[%s2791_s7 + $0x8] sm:$0x8] %v1452_v23 }

</bundles_post_ra>
